<compile_context>
chip_gen: v7x
topology: tpu7x:2x2x1
jax: 0.10.0
libtpu: 0.0.40
codegen_flags: <defaults>
</compile_context>

<pallas_src>
import math

import jax
import jax.numpy as jnp
from jax import lax
from jax.experimental import pallas as pl
from jax.experimental.pallas import tpu as pltpu

# ----- config (synthetic stand-in for config.model.*) -----
MAX_SEQ_LEN = 8          # config.model.MAX_SEQ_LEN  (== S)
ENC_DIM = 32             # config.model.encoder.DIM
N_HEADS = 4              # config.model.encoder.N_HEADS
HEAD_DIM = ENC_DIM // N_HEADS
FF_DIM = 64              # config.model.encoder.FF_DIM
N_LAYERS = 2             # len(config.model.encoder.N_LAYERS)
GLOBAL_EMB_DIM = 16      # config.model.GLOBAL_EMB_DIM
DEC_HIDDEN = 32          # config.model.decoder.HIDDEN_DIMS = [32]
INPUT_DIM = 6
GLOBAL_DIM = 5
BATCH = 2
LN_EPS = 1e-5            # PyTorch nn.LayerNorm default


# ------------------------------------------------------------------ fused kernel

def fused_forward_kernel(
    # activations / inputs
    obs_ref,        # (B*S, INPUT_DIM)   batch-major
    pos_ref,        # (B*S, ENC_DIM)     pos-encoding tiled over batch
    mask_ref,       # (B, S)             additive key-padding mask (0 / -1e9)
    glob_ref,       # (B, GLOBAL_DIM)
    # mlp_in
    w_in_ref, b_in_ref,
    # encoder layers (stacked over L)
    ln1_g_ref, ln1_b_ref,        # (L, 1, D)
    w_qkv_ref, b_qkv_ref,        # (L, D, 3D), (L, 1, 3D)
    w_o_ref, b_o_ref,            # (L, D, D),  (L, 1, D)
    ln2_g_ref, ln2_b_ref,        # (L, 1, D)
    w_ff1_ref, b_ff1_ref,        # (L, D, FF), (L, 1, FF)
    w_ff2_ref, b_ff2_ref,        # (L, FF, D), (L, 1, D)
    # global embedding
    w_g_ref, b_g_ref,            # (GLOBAL_DIM, GEMB), (1, GEMB)
    # decoder (dec1 split so the concat never materializes)
    w1x_ref, w1g_ref, b1_ref,    # (D, HID), (GEMB, HID), (1, HID)
    w2_ref, b2_ref,              # (HID, INPUT_DIM), (1, INPUT_DIM)
    # output
    out_ref,                     # (B*S, INPUT_DIM)
    # scratch
    attn_scratch,                # VMEM (B*S, D)
):
    f32 = jnp.float32
    S, B = MAX_SEQ_LEN, BATCH

    def layer_norm(xv, g, b):
        mean = jnp.mean(xv, axis=-1, keepdims=True)
        c = xv - mean
        var = jnp.mean(c * c, axis=-1, keepdims=True)
        return c * lax.rsqrt(var + LN_EPS) * g + b

    # ---- mlp_in + positional encoding (dropout == identity) ----
    x = jnp.dot(obs_ref[...], w_in_ref[...], preferred_element_type=f32) + b_in_ref[...]
    x = x + pos_ref[...]                                   # (B*S, D)

    neg_mask = mask_ref[...]                               # (B, S) additive
    scale = 1.0 / math.sqrt(HEAD_DIM)

    # ---- encoder stack (pre-norm, as written in the source module) ----
    for l in range(N_LAYERS):
        # -- self-attention block --
        # TODO(synk): PyTorch nn.MultiheadAttention returns (out, weights); the source
        # adds the raw tuple into the residual — we use the attention output (evident intent).
        x2 = layer_norm(x, ln1_g_ref[l], ln1_b_ref[l])
        qkv = jnp.dot(x2, w_qkv_ref[l], preferred_element_type=f32) + b_qkv_ref[l]  # (B*S, 3D)

        for b in range(B):                                  # unrolled: B*H = 8 tiny matmul pairs
            rows = slice(b * S, (b + 1) * S)
            m_b = neg_mask[b:b + 1, :]                      # (1, S)
            for h in range(N_HEADS):
                c0 = h * HEAD_DIM
                q_bh = qkv[rows, c0:c0 + HEAD_DIM]                              # (S, hd)
                k_bh = qkv[rows, ENC_DIM + c0:ENC_DIM + c0 + HEAD_DIM]          # (S, hd)
                v_bh = qkv[rows, 2 * ENC_DIM + c0:2 * ENC_DIM + c0 + HEAD_DIM]  # (S, hd)
                # Q @ K^T via dot_general on last dims (no materialized transpose)
                s_bh = lax.dot_general(
                    q_bh, k_bh, (((1,), (1,)), ((), ())),
                    preferred_element_type=f32) * scale + m_b                   # (S, S)
                s_bh = s_bh - jnp.max(s_bh, axis=-1, keepdims=True)
                p = jnp.exp(s_bh)
                p = p * pl.reciprocal(jnp.sum(p, axis=-1, keepdims=True), approx=True)
                attn_scratch[rows, c0:c0 + HEAD_DIM] = jnp.dot(
                    p, v_bh, preferred_element_type=f32)

        attn_out = (jnp.dot(attn_scratch[...], w_o_ref[l], preferred_element_type=f32)
                    + b_o_ref[l])
        x = x + attn_out                                    # attn_dropout == identity

        # -- feed-forward block --
        x2 = layer_norm(x, ln2_g_ref[l], ln2_b_ref[l])
        h1 = jnp.maximum(
            jnp.dot(x2, w_ff1_ref[l], preferred_element_type=f32) + b_ff1_ref[l], 0.0)
        x = x + jnp.dot(h1, w_ff2_ref[l], preferred_element_type=f32) + b_ff2_ref[l]

    # ---- global embedding + decoder ----
    # TODO(synk): source forward is truncated at `torch.cat([])`; implemented the evident
    # intent: concat encoder output with broadcast global embedding, then Decoder MLP.
    g = jnp.dot(glob_ref[...], w_g_ref[...], preferred_element_type=f32) + b_g_ref[...]  # (B, GEMB)
    g_h = jnp.dot(g, w1g_ref[...], preferred_element_type=f32)                           # (B, HID)
    x_h = jnp.dot(x, w1x_ref[...], preferred_element_type=f32) + b1_ref[...]             # (B*S, HID)

    w2 = w2_ref[...]
    b2 = b2_ref[...]
    for b in range(B):
        rows = slice(b * S, (b + 1) * S)
        h_b = jnp.maximum(x_h[rows, :] + g_h[b:b + 1, :], 0.0)                  # (S, HID)
        out_ref[rows, :] = jnp.dot(h_b, w2, preferred_element_type=f32) + b2    # (S, INPUT_DIM)


# ------------------------------------------------------------------ params & wrapper

def init_params(key, input_dim, global_dim):
    keys = iter(jax.random.split(key, 64))

    def dense(din, dout):
        lim = 1.0 / math.sqrt(din)
        w = jax.random.uniform(next(keys), (din, dout), jnp.float32, -lim, lim)
        b = jax.random.uniform(next(keys), (1, dout), jnp.float32, -lim, lim)
        return w, b

    w_in, b_in = dense(input_dim, ENC_DIM)
    pos_enc = jax.random.normal(next(keys), (MAX_SEQ_LEN, 1, ENC_DIM), jnp.float32)

    ln1_g, ln1_b, w_qkv, b_qkv, w_o, b_o = [], [], [], [], [], []
    ln2_g, ln2_b, w_ff1, b_ff1, w_ff2, b_ff2 = [], [], [], [], [], []
    for _ in range(N_LAYERS):
        ln1_g.append(jnp.ones((1, ENC_DIM), jnp.float32))
        ln1_b.append(jnp.zeros((1, ENC_DIM), jnp.float32))
        wq, bq = dense(ENC_DIM, 3 * ENC_DIM); w_qkv.append(wq); b_qkv.append(bq)
        wo, bo = dense(ENC_DIM, ENC_DIM);     w_o.append(wo);   b_o.append(bo)
        ln2_g.append(jnp.ones((1, ENC_DIM), jnp.float32))
        ln2_b.append(jnp.zeros((1, ENC_DIM), jnp.float32))
        wf1, bf1 = dense(ENC_DIM, FF_DIM);    w_ff1.append(wf1); b_ff1.append(bf1)
        wf2, bf2 = dense(FF_DIM, ENC_DIM);    w_ff2.append(wf2); b_ff2.append(bf2)

    w_g, b_g = dense(global_dim, GLOBAL_EMB_DIM)
    w_dec1, b_dec1 = dense(ENC_DIM + GLOBAL_EMB_DIM, DEC_HIDDEN)
    w_dec2, b_dec2 = dense(DEC_HIDDEN, input_dim)

    stack = lambda xs: jnp.stack(xs, axis=0)
    return {
        "w_in": w_in, "b_in": b_in, "pos_enc": pos_enc,
        "ln1_g": stack(ln1_g), "ln1_b": stack(ln1_b),
        "w_qkv": stack(w_qkv), "b_qkv": stack(b_qkv),
        "w_o": stack(w_o), "b_o": stack(b_o),
        "ln2_g": stack(ln2_g), "ln2_b": stack(ln2_b),
        "w_ff1": stack(w_ff1), "b_ff1": stack(b_ff1),
        "w_ff2": stack(w_ff2), "b_ff2": stack(b_ff2),
        "w_g": w_g, "b_g": b_g,
        # decoder Linear([D ‖ GEMB] -> HID) split row-wise so no concat is needed in-kernel
        "w1x": w_dec1[:ENC_DIM, :], "w1g": w_dec1[ENC_DIM:, :], "b1": b_dec1,
        "w2": w_dec2, "b2": b_dec2,
    }


def model_forward(params, obs, obs_mask, global_obs):
    S, B, Din = obs.shape
    assert (S, B, Din) == (MAX_SEQ_LEN, BATCH, INPUT_DIM)

    # Tiny input-side layout prep (batch-major 2-D slab); the only activation that
    # ever round-trips HBM afterwards is the final (B*S, INPUT_DIM) result.
    obs2d = obs.transpose(1, 0, 2).reshape(B * S, Din)
    pos2d = jnp.tile(params["pos_enc"][:, 0, :], (B, 1))                      # (B*S, D)
    neg_mask = jnp.where(obs_mask, -1e9, 0.0).astype(jnp.float32)             # (B, S)

    inputs = (
        obs2d, pos2d, neg_mask, global_obs,
        params["w_in"], params["b_in"],
        params["ln1_g"], params["ln1_b"],
        params["w_qkv"], params["b_qkv"],
        params["w_o"], params["b_o"],
        params["ln2_g"], params["ln2_b"],
        params["w_ff1"], params["b_ff1"],
        params["w_ff2"], params["b_ff2"],
        params["w_g"], params["b_g"],
        params["w1x"], params["w1g"], params["b1"],
        params["w2"], params["b2"],
    )

    out2d = pl.pallas_call(
        fused_forward_kernel,
        out_shape=jax.ShapeDtypeStruct((B * S, Din), jnp.float32),
        in_specs=[pl.BlockSpec(memory_space=pltpu.MemorySpace.VMEM)] * len(inputs),
        out_specs=pl.BlockSpec(memory_space=pltpu.MemorySpace.VMEM),
        scratch_shapes=[pltpu.VMEM((B * S, ENC_DIM), jnp.float32)],
    )(*inputs)

    return out2d.reshape(B, S, Din).transpose(1, 0, 2)                        # (S, B, Din)


if __name__ == "__main__":
    key = jax.random.PRNGKey(0)
    kp, ko, kg = jax.random.split(key, 3)

    params = init_params(kp, INPUT_DIM, GLOBAL_DIM)
    obs = jax.random.normal(ko, (MAX_SEQ_LEN, BATCH, INPUT_DIM), jnp.float32)
    # mask the last two sequence positions of every batch element
    obs_mask = jnp.zeros((BATCH, MAX_SEQ_LEN), dtype=bool).at[:, -2:].set(True)
    global_obs = jax.random.normal(kg, (BATCH, GLOBAL_DIM), jnp.float32)

    out = jax.jit(model_forward)(params, obs, obs_mask, global_obs)
    jax.block_until_ready(out)
    assert out.shape == (MAX_SEQ_LEN, BATCH, INPUT_DIM)
    assert jnp.all(jnp.isfinite(out))
    print("KERNEL_OK")
</pallas_src>

<mosaic_0001>
module attributes {stable_mosaic.version = 11 : i64} {
  func.func @fused_forward_kernel(%arg0: memref<16x6xf32, #tpu.memory_space<vmem>>, %arg1: memref<16x32xf32, #tpu.memory_space<vmem>>, %arg2: memref<2x8xf32, #tpu.memory_space<vmem>>, %arg3: memref<2x5xf32, #tpu.memory_space<vmem>>, %arg4: memref<6x32xf32, #tpu.memory_space<vmem>>, %arg5: memref<1x32xf32, #tpu.memory_space<vmem>>, %arg6: memref<2x1x32xf32, #tpu.memory_space<vmem>>, %arg7: memref<2x1x32xf32, #tpu.memory_space<vmem>>, %arg8: memref<2x32x96xf32, #tpu.memory_space<vmem>>, %arg9: memref<2x1x96xf32, #tpu.memory_space<vmem>>, %arg10: memref<2x32x32xf32, #tpu.memory_space<vmem>>, %arg11: memref<2x1x32xf32, #tpu.memory_space<vmem>>, %arg12: memref<2x1x32xf32, #tpu.memory_space<vmem>>, %arg13: memref<2x1x32xf32, #tpu.memory_space<vmem>>, %arg14: memref<2x32x64xf32, #tpu.memory_space<vmem>>, %arg15: memref<2x1x64xf32, #tpu.memory_space<vmem>>, %arg16: memref<2x64x32xf32, #tpu.memory_space<vmem>>, %arg17: memref<2x1x32xf32, #tpu.memory_space<vmem>>, %arg18: memref<5x16xf32, #tpu.memory_space<vmem>>, %arg19: memref<1x16xf32, #tpu.memory_space<vmem>>, %arg20: memref<32x32xf32, #tpu.memory_space<vmem>>, %arg21: memref<16x32xf32, #tpu.memory_space<vmem>>, %arg22: memref<1x32xf32, #tpu.memory_space<vmem>>, %arg23: memref<32x6xf32, #tpu.memory_space<vmem>>, %arg24: memref<1x6xf32, #tpu.memory_space<vmem>>, %arg25: memref<16x6xf32, #tpu.memory_space<vmem>>, %arg26: memref<16x32xf32, #tpu.memory_space<vmem>>) attributes {dimension_semantics = [], scalar_prefetch = 0 : i64, scratch_operands = 1 : i64, tpu.core_type = #tpu.core_type<tc>} {
    %c0 = arith.constant 0 : index
    %c0_0 = arith.constant 0 : index
    %0 = vector.load %arg0[%c0, %c0_0] : memref<16x6xf32, #tpu.memory_space<vmem>>, vector<16x6xf32>
    %c0_1 = arith.constant 0 : index
    %c0_2 = arith.constant 0 : index
    %1 = vector.load %arg4[%c0_1, %c0_2] : memref<6x32xf32, #tpu.memory_space<vmem>>, vector<6x32xf32>
    %cst = arith.constant dense<0.000000e+00> : vector<16x32xf32>
    %2 = tpu.matmul %0, %1, %cst {dimension_numbers = #tpu.dot_dimension_numbers<[1], [0], [0], [1], [0, 0, 1, 1], [], []>} : vector<16x6xf32>, vector<6x32xf32>, vector<16x32xf32> -> vector<16x32xf32>
    %c0_3 = arith.constant 0 : index
    %c0_4 = arith.constant 0 : index
    %3 = vector.load %arg5[%c0_3, %c0_4] : memref<1x32xf32, #tpu.memory_space<vmem>>, vector<1x32xf32>
    %4 = vector.broadcast %3 : vector<1x32xf32> to vector<16x32xf32>
    %5 = arith.addf %2, %4 : vector<16x32xf32>
    %c0_5 = arith.constant 0 : index
    %c0_6 = arith.constant 0 : index
    %6 = vector.load %arg1[%c0_5, %c0_6] : memref<16x32xf32, #tpu.memory_space<vmem>>, vector<16x32xf32>
    %7 = arith.addf %5, %6 : vector<16x32xf32>
    %c0_7 = arith.constant 0 : index
    %c0_8 = arith.constant 0 : index
    %8 = vector.load %arg2[%c0_7, %c0_8] : memref<2x8xf32, #tpu.memory_space<vmem>>, vector<2x8xf32>
    %c0_9 = arith.constant 0 : index
    %c0_10 = arith.constant 0 : index
    %c0_11 = arith.constant 0 : index
    %9 = vector.load %arg6[%c0_9, %c0_10, %c0_11] : memref<2x1x32xf32, #tpu.memory_space<vmem>>, vector<1x1x32xf32>
    %10 = vector.shape_cast %9 : vector<1x1x32xf32> to vector<1x32xf32>
    %c0_12 = arith.constant 0 : index
    %c0_13 = arith.constant 0 : index
    %c0_14 = arith.constant 0 : index
    %11 = vector.load %arg7[%c0_12, %c0_13, %c0_14] : memref<2x1x32xf32, #tpu.memory_space<vmem>>, vector<1x1x32xf32>
    %12 = vector.shape_cast %11 : vector<1x1x32xf32> to vector<1x32xf32>
    %cst_15 = arith.constant dense<0.000000e+00> : vector<16xf32>
    %13 = vector.multi_reduction <add>, %7, %cst_15 [1] : vector<16x32xf32> to vector<16xf32>
    %14 = vector.shape_cast %13 : vector<16xf32> to vector<16x1xf32>
    %cst_16 = arith.constant 3.200000e+01 : f32
    %15 = vector.broadcast %cst_16 : f32 to vector<16x1xf32>
    %16 = arith.divf %14, %15 : vector<16x1xf32>
    %17 = vector.broadcast %16 : vector<16x1xf32> to vector<16x32xf32>
    %18 = arith.subf %7, %17 : vector<16x32xf32>
    %19 = arith.mulf %18, %18 : vector<16x32xf32>
    %cst_17 = arith.constant dense<0.000000e+00> : vector<16xf32>
    %20 = vector.multi_reduction <add>, %19, %cst_17 [1] : vector<16x32xf32> to vector<16xf32>
    %21 = vector.shape_cast %20 : vector<16xf32> to vector<16x1xf32>
    %cst_18 = arith.constant 3.200000e+01 : f32
    %22 = vector.broadcast %cst_18 : f32 to vector<16x1xf32>
    %23 = arith.divf %21, %22 : vector<16x1xf32>
    %cst_19 = arith.constant 9.99999974E-6 : f32
    %24 = vector.broadcast %cst_19 : f32 to vector<16x1xf32>
    %25 = arith.addf %23, %24 : vector<16x1xf32>
    %26 = math.rsqrt %25 : vector<16x1xf32>
    %27 = vector.broadcast %26 : vector<16x1xf32> to vector<16x32xf32>
    %28 = arith.mulf %18, %27 : vector<16x32xf32>
    %29 = vector.broadcast %10 : vector<1x32xf32> to vector<16x32xf32>
    %30 = arith.mulf %28, %29 : vector<16x32xf32>
    %31 = vector.broadcast %12 : vector<1x32xf32> to vector<16x32xf32>
    %32 = arith.addf %30, %31 : vector<16x32xf32>
    %c0_20 = arith.constant 0 : index
    %c0_21 = arith.constant 0 : index
    %c0_22 = arith.constant 0 : index
    %33 = vector.load %arg8[%c0_20, %c0_21, %c0_22] : memref<2x32x96xf32, #tpu.memory_space<vmem>>, vector<1x32x96xf32>
    %34 = vector.shape_cast %33 : vector<1x32x96xf32> to vector<32x96xf32>
    %cst_23 = arith.constant dense<0.000000e+00> : vector<16x96xf32>
    %35 = tpu.matmul %32, %34, %cst_23 {dimension_numbers = #tpu.dot_dimension_numbers<[1], [0], [0], [1], [0, 0, 1, 1], [], []>} : vector<16x32xf32>, vector<32x96xf32>, vector<16x96xf32> -> vector<16x96xf32>
    %c0_24 = arith.constant 0 : index
    %c0_25 = arith.constant 0 : index
    %c0_26 = arith.constant 0 : index
    %36 = vector.load %arg9[%c0_24, %c0_25, %c0_26] : memref<2x1x96xf32, #tpu.memory_space<vmem>>, vector<1x1x96xf32>
    %37 = vector.shape_cast %36 : vector<1x1x96xf32> to vector<1x96xf32>
    %38 = vector.broadcast %37 : vector<1x96xf32> to vector<16x96xf32>
    %39 = arith.addf %35, %38 : vector<16x96xf32>
    %40 = vector.extract_strided_slice %8 {offsets = [0, 0], sizes = [1, 8], strides = [1, 1]} : vector<2x8xf32> to vector<1x8xf32>
    %41 = vector.extract_strided_slice %39 {offsets = [0, 0], sizes = [8, 8], strides = [1, 1]} : vector<16x96xf32> to vector<8x8xf32>
    %42 = vector.extract_strided_slice %39 {offsets = [0, 32], sizes = [8, 8], strides = [1, 1]} : vector<16x96xf32> to vector<8x8xf32>
    %43 = vector.extract_strided_slice %39 {offsets = [0, 64], sizes = [8, 8], strides = [1, 1]} : vector<16x96xf32> to vector<8x8xf32>
    %cst_27 = arith.constant dense<0.000000e+00> : vector<8x8xf32>
    %44 = tpu.matmul %41, %42, %cst_27 {dimension_numbers = #tpu.dot_dimension_numbers<[1], [1], [0], [0], [0, 0, 1, 0], [], []>} : vector<8x8xf32>, vector<8x8xf32>, vector<8x8xf32> -> vector<8x8xf32>
    %cst_28 = arith.constant 0.353553385 : f32
    %45 = vector.broadcast %cst_28 : f32 to vector<8x8xf32>
    %46 = arith.mulf %44, %45 : vector<8x8xf32>
    %47 = vector.broadcast %40 : vector<1x8xf32> to vector<8x8xf32>
    %48 = arith.addf %46, %47 : vector<8x8xf32>
    %cst_29 = arith.constant dense<0xFF800000> : vector<8xf32>
    %49 = vector.multi_reduction <maximumf>, %48, %cst_29 [1] : vector<8x8xf32> to vector<8xf32>
    %50 = vector.shape_cast %49 : vector<8xf32> to vector<8x1xf32>
    %51 = vector.broadcast %50 : vector<8x1xf32> to vector<8x8xf32>
    %52 = arith.subf %48, %51 : vector<8x8xf32>
    %53 = math.exp %52 : vector<8x8xf32>
    %cst_30 = arith.constant dense<0.000000e+00> : vector<8xf32>
    %54 = vector.multi_reduction <add>, %53, %cst_30 [1] : vector<8x8xf32> to vector<8xf32>
    %55 = vector.shape_cast %54 : vector<8xf32> to vector<8x1xf32>
    %56 = tpu.reciprocal %55 {approx = true} : vector<8x1xf32> -> vector<8x1xf32>
    %57 = vector.broadcast %56 : vector<8x1xf32> to vector<8x8xf32>
    %58 = arith.mulf %53, %57 : vector<8x8xf32>
    %cst_31 = arith.constant dense<0.000000e+00> : vector<8x8xf32>
    %59 = tpu.matmul %58, %43, %cst_31 {dimension_numbers = #tpu.dot_dimension_numbers<[1], [0], [0], [1], [0, 0, 1, 1], [], []>} : vector<8x8xf32>, vector<8x8xf32>, vector<8x8xf32> -> vector<8x8xf32>
    %c0_32 = arith.constant 0 : index
    %c0_33 = arith.constant 0 : index
    %60 = vector.load %arg26[%c0_32, %c0_33] : memref<16x32xf32, #tpu.memory_space<vmem>>, vector<8x8xf32>
    tpu.vector_store %arg26[%c0_32, %c0_33], %59 {strides = array<i32>} : memref<16x32xf32, #tpu.memory_space<vmem>>, vector<8x8xf32>,
    %61 = vector.extract_strided_slice %39 {offsets = [0, 8], sizes = [8, 8], strides = [1, 1]} : vector<16x96xf32> to vector<8x8xf32>
    %62 = vector.extract_strided_slice %39 {offsets = [0, 40], sizes = [8, 8], strides = [1, 1]} : vector<16x96xf32> to vector<8x8xf32>
    %63 = vector.extract_strided_slice %39 {offsets = [0, 72], sizes = [8, 8], strides = [1, 1]} : vector<16x96xf32> to vector<8x8xf32>
    %cst_34 = arith.constant dense<0.000000e+00> : vector<8x8xf32>
    %64 = tpu.matmul %61, %62, %cst_34 {dimension_numbers = #tpu.dot_dimension_numbers<[1], [1], [0], [0], [0, 0, 1, 0], [], []>} : vector<8x8xf32>, vector<8x8xf32>, vector<8x8xf32> -> vector<8x8xf32>
    %cst_35 = arith.constant 0.353553385 : f32
    %65 = vector.broadcast %cst_35 : f32 to vector<8x8xf32>
    %66 = arith.mulf %64, %65 : vector<8x8xf32>
    %67 = vector.broadcast %40 : vector<1x8xf32> to vector<8x8xf32>
    %68 = arith.addf %66, %67 : vector<8x8xf32>
    %cst_36 = arith.constant dense<0xFF800000> : vector<8xf32>
    %69 = vector.multi_reduction <maximumf>, %68, %cst_36 [1] : vector<8x8xf32> to vector<8xf32>
    %70 = vector.shape_cast %69 : vector<8xf32> to vector<8x1xf32>
    %71 = vector.broadcast %70 : vector<8x1xf32> to vector<8x8xf32>
    %72 = arith.subf %68, %71 : vector<8x8xf32>
    %73 = math.exp %72 : vector<8x8xf32>
    %cst_37 = arith.constant dense<0.000000e+00> : vector<8xf32>
    %74 = vector.multi_reduction <add>, %73, %cst_37 [1] : vector<8x8xf32> to vector<8xf32>
    %75 = vector.shape_cast %74 : vector<8xf32> to vector<8x1xf32>
    %76 = tpu.reciprocal %75 {approx = true} : vector<8x1xf32> -> vector<8x1xf32>
    %77 = vector.broadcast %76 : vector<8x1xf32> to vector<8x8xf32>
    %78 = arith.mulf %73, %77 : vector<8x8xf32>
    %cst_38 = arith.constant dense<0.000000e+00> : vector<8x8xf32>
    %79 = tpu.matmul %78, %63, %cst_38 {dimension_numbers = #tpu.dot_dimension_numbers<[1], [0], [0], [1], [0, 0, 1, 1], [], []>} : vector<8x8xf32>, vector<8x8xf32>, vector<8x8xf32> -> vector<8x8xf32>
    %c0_39 = arith.constant 0 : index
    %c8 = arith.constant 8 : index
    %80 = vector.load %arg26[%c0_39, %c8] : memref<16x32xf32, #tpu.memory_space<vmem>>, vector<8x8xf32>
    tpu.vector_store %arg26[%c0_39, %c8], %79 {strides = array<i32>} : memref<16x32xf32, #tpu.memory_space<vmem>>, vector<8x8xf32>,
    %81 = vector.extract_strided_slice %39 {offsets = [0, 16], sizes = [8, 8], strides = [1, 1]} : vector<16x96xf32> to vector<8x8xf32>
    %82 = vector.extract_strided_slice %39 {offsets = [0, 48], sizes = [8, 8], strides = [1, 1]} : vector<16x96xf32> to vector<8x8xf32>
    %83 = vector.extract_strided_slice %39 {offsets = [0, 80], sizes = [8, 8], strides = [1, 1]} : vector<16x96xf32> to vector<8x8xf32>
    %cst_40 = arith.constant dense<0.000000e+00> : vector<8x8xf32>
    %84 = tpu.matmul %81, %82, %cst_40 {dimension_numbers = #tpu.dot_dimension_numbers<[1], [1], [0], [0], [0, 0, 1, 0], [], []>} : vector<8x8xf32>, vector<8x8xf32>, vector<8x8xf32> -> vector<8x8xf32>
    %cst_41 = arith.constant 0.353553385 : f32
    %85 = vector.broadcast %cst_41 : f32 to vector<8x8xf32>
    %86 = arith.mulf %84, %85 : vector<8x8xf32>
    %87 = vector.broadcast %40 : vector<1x8xf32> to vector<8x8xf32>
    %88 = arith.addf %86, %87 : vector<8x8xf32>
    %cst_42 = arith.constant dense<0xFF800000> : vector<8xf32>
    %89 = vector.multi_reduction <maximumf>, %88, %cst_42 [1] : vector<8x8xf32> to vector<8xf32>
    %90 = vector.shape_cast %89 : vector<8xf32> to vector<8x1xf32>
    %91 = vector.broadcast %90 : vector<8x1xf32> to vector<8x8xf32>
    %92 = arith.subf %88, %91 : vector<8x8xf32>
    %93 = math.exp %92 : vector<8x8xf32>
    %cst_43 = arith.constant dense<0.000000e+00> : vector<8xf32>
    %94 = vector.multi_reduction <add>, %93, %cst_43 [1] : vector<8x8xf32> to vector<8xf32>
    %95 = vector.shape_cast %94 : vector<8xf32> to vector<8x1xf32>
    %96 = tpu.reciprocal %95 {approx = true} : vector<8x1xf32> -> vector<8x1xf32>
    %97 = vector.broadcast %96 : vector<8x1xf32> to vector<8x8xf32>
    %98 = arith.mulf %93, %97 : vector<8x8xf32>
    %cst_44 = arith.constant dense<0.000000e+00> : vector<8x8xf32>
    %99 = tpu.matmul %98, %83, %cst_44 {dimension_numbers = #tpu.dot_dimension_numbers<[1], [0], [0], [1], [0, 0, 1, 1], [], []>} : vector<8x8xf32>, vector<8x8xf32>, vector<8x8xf32> -> vector<8x8xf32>
    %c0_45 = arith.constant 0 : index
    %c16 = arith.constant 16 : index
    %100 = vector.load %arg26[%c0_45, %c16] : memref<16x32xf32, #tpu.memory_space<vmem>>, vector<8x8xf32>
    tpu.vector_store %arg26[%c0_45, %c16], %99 {strides = array<i32>} : memref<16x32xf32, #tpu.memory_space<vmem>>, vector<8x8xf32>,
    %101 = vector.extract_strided_slice %39 {offsets = [0, 24], sizes = [8, 8], strides = [1, 1]} : vector<16x96xf32> to vector<8x8xf32>
    %102 = vector.extract_strided_slice %39 {offsets = [0, 56], sizes = [8, 8], strides = [1, 1]} : vector<16x96xf32> to vector<8x8xf32>
    %103 = vector.extract_strided_slice %39 {offsets = [0, 88], sizes = [8, 8], strides = [1, 1]} : vector<16x96xf32> to vector<8x8xf32>
    %cst_46 = arith.constant dense<0.000000e+00> : vector<8x8xf32>
    %104 = tpu.matmul %101, %102, %cst_46 {dimension_numbers = #tpu.dot_dimension_numbers<[1], [1], [0], [0], [0, 0, 1, 0], [], []>} : vector<8x8xf32>, vector<8x8xf32>, vector<8x8xf32> -> vector<8x8xf32>
    %cst_47 = arith.constant 0.353553385 : f32
    %105 = vector.broadcast %cst_47 : f32 to vector<8x8xf32>
    %106 = arith.mulf %104, %105 : vector<8x8xf32>
    %107 = vector.broadcast %40 : vector<1x8xf32> to vector<8x8xf32>
    %108 = arith.addf %106, %107 : vector<8x8xf32>
    %cst_48 = arith.constant dense<0xFF800000> : vector<8xf32>
    %109 = vector.multi_reduction <maximumf>, %108, %cst_48 [1] : vector<8x8xf32> to vector<8xf32>
    %110 = vector.shape_cast %109 : vector<8xf32> to vector<8x1xf32>
    %111 = vector.broadcast %110 : vector<8x1xf32> to vector<8x8xf32>
    %112 = arith.subf %108, %111 : vector<8x8xf32>
    %113 = math.exp %112 : vector<8x8xf32>
    %cst_49 = arith.constant dense<0.000000e+00> : vector<8xf32>
    %114 = vector.multi_reduction <add>, %113, %cst_49 [1] : vector<8x8xf32> to vector<8xf32>
    %115 = vector.shape_cast %114 : vector<8xf32> to vector<8x1xf32>
    %116 = tpu.reciprocal %115 {approx = true} : vector<8x1xf32> -> vector<8x1xf32>
    %117 = vector.broadcast %116 : vector<8x1xf32> to vector<8x8xf32>
    %118 = arith.mulf %113, %117 : vector<8x8xf32>
    %cst_50 = arith.constant dense<0.000000e+00> : vector<8x8xf32>
    %119 = tpu.matmul %118, %103, %cst_50 {dimension_numbers = #tpu.dot_dimension_numbers<[1], [0], [0], [1], [0, 0, 1, 1], [], []>} : vector<8x8xf32>, vector<8x8xf32>, vector<8x8xf32> -> vector<8x8xf32>
    %c0_51 = arith.constant 0 : index
    %c24 = arith.constant 24 : index
    %120 = vector.load %arg26[%c0_51, %c24] : memref<16x32xf32, #tpu.memory_space<vmem>>, vector<8x8xf32>
    tpu.vector_store %arg26[%c0_51, %c24], %119 {strides = array<i32>} : memref<16x32xf32, #tpu.memory_space<vmem>>, vector<8x8xf32>,
    %121 = vector.extract_strided_slice %8 {offsets = [1, 0], sizes = [1, 8], strides = [1, 1]} : vector<2x8xf32> to vector<1x8xf32>
    %122 = vector.extract_strided_slice %39 {offsets = [8, 0], sizes = [8, 8], strides = [1, 1]} : vector<16x96xf32> to vector<8x8xf32>
    %123 = vector.extract_strided_slice %39 {offsets = [8, 32], sizes = [8, 8], strides = [1, 1]} : vector<16x96xf32> to vector<8x8xf32>
    %124 = vector.extract_strided_slice %39 {offsets = [8, 64], sizes = [8, 8], strides = [1, 1]} : vector<16x96xf32> to vector<8x8xf32>
    %cst_52 = arith.constant dense<0.000000e+00> : vector<8x8xf32>
    %125 = tpu.matmul %122, %123, %cst_52 {dimension_numbers = #tpu.dot_dimension_numbers<[1], [1], [0], [0], [0, 0, 1, 0], [], []>} : vector<8x8xf32>, vector<8x8xf32>, vector<8x8xf32> -> vector<8x8xf32>
    %cst_53 = arith.constant 0.353553385 : f32
    %126 = vector.broadcast %cst_53 : f32 to vector<8x8xf32>
    %127 = arith.mulf %125, %126 : vector<8x8xf32>
    %128 = vector.broadcast %121 : vector<1x8xf32> to vector<8x8xf32>
    %129 = arith.addf %127, %128 : vector<8x8xf32>
    %cst_54 = arith.constant dense<0xFF800000> : vector<8xf32>
    %130 = vector.multi_reduction <maximumf>, %129, %cst_54 [1] : vector<8x8xf32> to vector<8xf32>
    %131 = vector.shape_cast %130 : vector<8xf32> to vector<8x1xf32>
    %132 = vector.broadcast %131 : vector<8x1xf32> to vector<8x8xf32>
    %133 = arith.subf %129, %132 : vector<8x8xf32>
    %134 = math.exp %133 : vector<8x8xf32>
    %cst_55 = arith.constant dense<0.000000e+00> : vector<8xf32>
    %135 = vector.multi_reduction <add>, %134, %cst_55 [1] : vector<8x8xf32> to vector<8xf32>
    %136 = vector.shape_cast %135 : vector<8xf32> to vector<8x1xf32>
    %137 = tpu.reciprocal %136 {approx = true} : vector<8x1xf32> -> vector<8x1xf32>
    %138 = vector.broadcast %137 : vector<8x1xf32> to vector<8x8xf32>
    %139 = arith.mulf %134, %138 : vector<8x8xf32>
    %cst_56 = arith.constant dense<0.000000e+00> : vector<8x8xf32>
    %140 = tpu.matmul %139, %124, %cst_56 {dimension_numbers = #tpu.dot_dimension_numbers<[1], [0], [0], [1], [0, 0, 1, 1], [], []>} : vector<8x8xf32>, vector<8x8xf32>, vector<8x8xf32> -> vector<8x8xf32>
    %c8_57 = arith.constant 8 : index
    %c0_58 = arith.constant 0 : index
    %141 = vector.load %arg26[%c8_57, %c0_58] : memref<16x32xf32, #tpu.memory_space<vmem>>, vector<8x8xf32>
    tpu.vector_store %arg26[%c8_57, %c0_58], %140 {strides = array<i32>} : memref<16x32xf32, #tpu.memory_space<vmem>>, vector<8x8xf32>,
    %142 = vector.extract_strided_slice %39 {offsets = [8, 8], sizes = [8, 8], strides = [1, 1]} : vector<16x96xf32> to vector<8x8xf32>
    %143 = vector.extract_strided_slice %39 {offsets = [8, 40], sizes = [8, 8], strides = [1, 1]} : vector<16x96xf32> to vector<8x8xf32>
    %144 = vector.extract_strided_slice %39 {offsets = [8, 72], sizes = [8, 8], strides = [1, 1]} : vector<16x96xf32> to vector<8x8xf32>
    %cst_59 = arith.constant dense<0.000000e+00> : vector<8x8xf32>
    %145 = tpu.matmul %142, %143, %cst_59 {dimension_numbers = #tpu.dot_dimension_numbers<[1], [1], [0], [0], [0, 0, 1, 0], [], []>} : vector<8x8xf32>, vector<8x8xf32>, vector<8x8xf32> -> vector<8x8xf32>
    %cst_60 = arith.constant 0.353553385 : f32
    %146 = vector.broadcast %cst_60 : f32 to vector<8x8xf32>
    %147 = arith.mulf %145, %146 : vector<8x8xf32>
    %148 = vector.broadcast %121 : vector<1x8xf32> to vector<8x8xf32>
    %149 = arith.addf %147, %148 : vector<8x8xf32>
    %cst_61 = arith.constant dense<0xFF800000> : vector<8xf32>
    %150 = vector.multi_reduction <maximumf>, %149, %cst_61 [1] : vector<8x8xf32> to vector<8xf32>
    %151 = vector.shape_cast %150 : vector<8xf32> to vector<8x1xf32>
    %152 = vector.broadcast %151 : vector<8x1xf32> to vector<8x8xf32>
    %153 = arith.subf %149, %152 : vector<8x8xf32>
    %154 = math.exp %153 : vector<8x8xf32>
    %cst_62 = arith.constant dense<0.000000e+00> : vector<8xf32>
    %155 = vector.multi_reduction <add>, %154, %cst_62 [1] : vector<8x8xf32> to vector<8xf32>
    %156 = vector.shape_cast %155 : vector<8xf32> to vector<8x1xf32>
    %157 = tpu.reciprocal %156 {approx = true} : vector<8x1xf32> -> vector<8x1xf32>
    %158 = vector.broadcast %157 : vector<8x1xf32> to vector<8x8xf32>
    %159 = arith.mulf %154, %158 : vector<8x8xf32>
    %cst_63 = arith.constant dense<0.000000e+00> : vector<8x8xf32>
    %160 = tpu.matmul %159, %144, %cst_63 {dimension_numbers = #tpu.dot_dimension_numbers<[1], [0], [0], [1], [0, 0, 1, 1], [], []>} : vector<8x8xf32>, vector<8x8xf32>, vector<8x8xf32> -> vector<8x8xf32>
    %c8_64 = arith.constant 8 : index
    %c8_65 = arith.constant 8 : index
    %161 = vector.load %arg26[%c8_64, %c8_65] : memref<16x32xf32, #tpu.memory_space<vmem>>, vector<8x8xf32>
    tpu.vector_store %arg26[%c8_64, %c8_65], %160 {strides = array<i32>} : memref<16x32xf32, #tpu.memory_space<vmem>>, vector<8x8xf32>,
    %162 = vector.extract_strided_slice %39 {offsets = [8, 16], sizes = [8, 8], strides = [1, 1]} : vector<16x96xf32> to vector<8x8xf32>
    %163 = vector.extract_strided_slice %39 {offsets = [8, 48], sizes = [8, 8], strides = [1, 1]} : vector<16x96xf32> to vector<8x8xf32>
    %164 = vector.extract_strided_slice %39 {offsets = [8, 80], sizes = [8, 8], strides = [1, 1]} : vector<16x96xf32> to vector<8x8xf32>
    %cst_66 = arith.constant dense<0.000000e+00> : vector<8x8xf32>
    %165 = tpu.matmul %162, %163, %cst_66 {dimension_numbers = #tpu.dot_dimension_numbers<[1], [1], [0], [0], [0, 0, 1, 0], [], []>} : vector<8x8xf32>, vector<8x8xf32>, vector<8x8xf32> -> vector<8x8xf32>
    %cst_67 = arith.constant 0.353553385 : f32
    %166 = vector.broadcast %cst_67 : f32 to vector<8x8xf32>
    %167 = arith.mulf %165, %166 : vector<8x8xf32>
    %168 = vector.broadcast %121 : vector<1x8xf32> to vector<8x8xf32>
    %169 = arith.addf %167, %168 : vector<8x8xf32>
    %cst_68 = arith.constant dense<0xFF800000> : vector<8xf32>
    %170 = vector.multi_reduction <maximumf>, %169, %cst_68 [1] : vector<8x8xf32> to vector<8xf32>
    %171 = vector.shape_cast %170 : vector<8xf32> to vector<8x1xf32>
    %172 = vector.broadcast %171 : vector<8x1xf32> to vector<8x8xf32>
    %173 = arith.subf %169, %172 : vector<8x8xf32>
    %174 = math.exp %173 : vector<8x8xf32>
    %cst_69 = arith.constant dense<0.000000e+00> : vector<8xf32>
    %175 = vector.multi_reduction <add>, %174, %cst_69 [1] : vector<8x8xf32> to vector<8xf32>
    %176 = vector.shape_cast %175 : vector<8xf32> to vector<8x1xf32>
    %177 = tpu.reciprocal %176 {approx = true} : vector<8x1xf32> -> vector<8x1xf32>
    %178 = vector.broadcast %177 : vector<8x1xf32> to vector<8x8xf32>
    %179 = arith.mulf %174, %178 : vector<8x8xf32>
    %cst_70 = arith.constant dense<0.000000e+00> : vector<8x8xf32>
    %180 = tpu.matmul %179, %164, %cst_70 {dimension_numbers = #tpu.dot_dimension_numbers<[1], [0], [0], [1], [0, 0, 1, 1], [], []>} : vector<8x8xf32>, vector<8x8xf32>, vector<8x8xf32> -> vector<8x8xf32>
    %c8_71 = arith.constant 8 : index
    %c16_72 = arith.constant 16 : index
    %181 = vector.load %arg26[%c8_71, %c16_72] : memref<16x32xf32, #tpu.memory_space<vmem>>, vector<8x8xf32>
    tpu.vector_store %arg26[%c8_71, %c16_72], %180 {strides = array<i32>} : memref<16x32xf32, #tpu.memory_space<vmem>>, vector<8x8xf32>,
    %182 = vector.extract_strided_slice %39 {offsets = [8, 24], sizes = [8, 8], strides = [1, 1]} : vector<16x96xf32> to vector<8x8xf32>
    %183 = vector.extract_strided_slice %39 {offsets = [8, 56], sizes = [8, 8], strides = [1, 1]} : vector<16x96xf32> to vector<8x8xf32>
    %184 = vector.extract_strided_slice %39 {offsets = [8, 88], sizes = [8, 8], strides = [1, 1]} : vector<16x96xf32> to vector<8x8xf32>
    %cst_73 = arith.constant dense<0.000000e+00> : vector<8x8xf32>
    %185 = tpu.matmul %182, %183, %cst_73 {dimension_numbers = #tpu.dot_dimension_numbers<[1], [1], [0], [0], [0, 0, 1, 0], [], []>} : vector<8x8xf32>, vector<8x8xf32>, vector<8x8xf32> -> vector<8x8xf32>
    %cst_74 = arith.constant 0.353553385 : f32
    %186 = vector.broadcast %cst_74 : f32 to vector<8x8xf32>
    %187 = arith.mulf %185, %186 : vector<8x8xf32>
    %188 = vector.broadcast %121 : vector<1x8xf32> to vector<8x8xf32>
    %189 = arith.addf %187, %188 : vector<8x8xf32>
    %cst_75 = arith.constant dense<0xFF800000> : vector<8xf32>
    %190 = vector.multi_reduction <maximumf>, %189, %cst_75 [1] : vector<8x8xf32> to vector<8xf32>
    %191 = vector.shape_cast %190 : vector<8xf32> to vector<8x1xf32>
    %192 = vector.broadcast %191 : vector<8x1xf32> to vector<8x8xf32>
    %193 = arith.subf %189, %192 : vector<8x8xf32>
    %194 = math.exp %193 : vector<8x8xf32>
    %cst_76 = arith.constant dense<0.000000e+00> : vector<8xf32>
    %195 = vector.multi_reduction <add>, %194, %cst_76 [1] : vector<8x8xf32> to vector<8xf32>
    %196 = vector.shape_cast %195 : vector<8xf32> to vector<8x1xf32>
    %197 = tpu.reciprocal %196 {approx = true} : vector<8x1xf32> -> vector<8x1xf32>
    %198 = vector.broadcast %197 : vector<8x1xf32> to vector<8x8xf32>
    %199 = arith.mulf %194, %198 : vector<8x8xf32>
    %cst_77 = arith.constant dense<0.000000e+00> : vector<8x8xf32>
    %200 = tpu.matmul %199, %184, %cst_77 {dimension_numbers = #tpu.dot_dimension_numbers<[1], [0], [0], [1], [0, 0, 1, 1], [], []>} : vector<8x8xf32>, vector<8x8xf32>, vector<8x8xf32> -> vector<8x8xf32>
    %c8_78 = arith.constant 8 : index
    %c24_79 = arith.constant 24 : index
    %201 = vector.load %arg26[%c8_78, %c24_79] : memref<16x32xf32, #tpu.memory_space<vmem>>, vector<8x8xf32>
    tpu.vector_store %arg26[%c8_78, %c24_79], %200 {strides = array<i32>} : memref<16x32xf32, #tpu.memory_space<vmem>>, vector<8x8xf32>,
    %c0_80 = arith.constant 0 : index
    %c0_81 = arith.constant 0 : index
    %202 = vector.load %arg26[%c0_80, %c0_81] : memref<16x32xf32, #tpu.memory_space<vmem>>, vector<16x32xf32>
    %c0_82 = arith.constant 0 : index
    %c0_83 = arith.constant 0 : index
    %c0_84 = arith.constant 0 : index
    %203 = vector.load %arg10[%c0_82, %c0_83, %c0_84] : memref<2x32x32xf32, #tpu.memory_space<vmem>>, vector<1x32x32xf32>
    %204 = vector.shape_cast %203 : vector<1x32x32xf32> to vector<32x32xf32>
    %cst_85 = arith.constant dense<0.000000e+00> : vector<16x32xf32>
    %205 = tpu.matmul %202, %204, %cst_85 {dimension_numbers = #tpu.dot_dimension_numbers<[1], [0], [0], [1], [0, 0, 1, 1], [], []>} : vector<16x32xf32>, vector<32x32xf32>, vector<16x32xf32> -> vector<16x32xf32>
    %c0_86 = arith.constant 0 : index
    %c0_87 = arith.constant 0 : index
    %c0_88 = arith.constant 0 : index
    %206 = vector.load %arg11[%c0_86, %c0_87, %c0_88] : memref<2x1x32xf32, #tpu.memory_space<vmem>>, vector<1x1x32xf32>
    %207 = vector.shape_cast %206 : vector<1x1x32xf32> to vector<1x32xf32>
    %208 = vector.broadcast %207 : vector<1x32xf32> to vector<16x32xf32>
    %209 = arith.addf %205, %208 : vector<16x32xf32>
    %210 = arith.addf %7, %209 : vector<16x32xf32>
    %c0_89 = arith.constant 0 : index
    %c0_90 = arith.constant 0 : index
    %c0_91 = arith.constant 0 : index
    %211 = vector.load %arg12[%c0_89, %c0_90, %c0_91] : memref<2x1x32xf32, #tpu.memory_space<vmem>>, vector<1x1x32xf32>
    %212 = vector.shape_cast %211 : vector<1x1x32xf32> to vector<1x32xf32>
    %c0_92 = arith.constant 0 : index
    %c0_93 = arith.constant 0 : index
    %c0_94 = arith.constant 0 : index
    %213 = vector.load %arg13[%c0_92, %c0_93, %c0_94] : memref<2x1x32xf32, #tpu.memory_space<vmem>>, vector<1x1x32xf32>
    %214 = vector.shape_cast %213 : vector<1x1x32xf32> to vector<1x32xf32>
    %cst_95 = arith.constant dense<0.000000e+00> : vector<16xf32>
    %215 = vector.multi_reduction <add>, %210, %cst_95 [1] : vector<16x32xf32> to vector<16xf32>
    %216 = vector.shape_cast %215 : vector<16xf32> to vector<16x1xf32>
    %cst_96 = arith.constant 3.200000e+01 : f32
    %217 = vector.broadcast %cst_96 : f32 to vector<16x1xf32>
    %218 = arith.divf %216, %217 : vector<16x1xf32>
    %219 = vector.broadcast %218 : vector<16x1xf32> to vector<16x32xf32>
    %220 = arith.subf %210, %219 : vector<16x32xf32>
    %221 = arith.mulf %220, %220 : vector<16x32xf32>
    %cst_97 = arith.constant dense<0.000000e+00> : vector<16xf32>
    %222 = vector.multi_reduction <add>, %221, %cst_97 [1] : vector<16x32xf32> to vector<16xf32>
    %223 = vector.shape_cast %222 : vector<16xf32> to vector<16x1xf32>
    %cst_98 = arith.constant 3.200000e+01 : f32
    %224 = vector.broadcast %cst_98 : f32 to vector<16x1xf32>
    %225 = arith.divf %223, %224 : vector<16x1xf32>
    %cst_99 = arith.constant 9.99999974E-6 : f32
    %226 = vector.broadcast %cst_99 : f32 to vector<16x1xf32>
    %227 = arith.addf %225, %226 : vector<16x1xf32>
    %228 = math.rsqrt %227 : vector<16x1xf32>
    %229 = vector.broadcast %228 : vector<16x1xf32> to vector<16x32xf32>
    %230 = arith.mulf %220, %229 : vector<16x32xf32>
    %231 = vector.broadcast %212 : vector<1x32xf32> to vector<16x32xf32>
    %232 = arith.mulf %230, %231 : vector<16x32xf32>
    %233 = vector.broadcast %214 : vector<1x32xf32> to vector<16x32xf32>
    %234 = arith.addf %232, %233 : vector<16x32xf32>
    %c0_100 = arith.constant 0 : index
    %c0_101 = arith.constant 0 : index
    %c0_102 = arith.constant 0 : index
    %235 = vector.load %arg14[%c0_100, %c0_101, %c0_102] : memref<2x32x64xf32, #tpu.memory_space<vmem>>, vector<1x32x64xf32>
    %236 = vector.shape_cast %235 : vector<1x32x64xf32> to vector<32x64xf32>
    %cst_103 = arith.constant dense<0.000000e+00> : vector<16x64xf32>
    %237 = tpu.matmul %234, %236, %cst_103 {dimension_numbers = #tpu.dot_dimension_numbers<[1], [0], [0], [1], [0, 0, 1, 1], [], []>} : vector<16x32xf32>, vector<32x64xf32>, vector<16x64xf32> -> vector<16x64xf32>
    %c0_104 = arith.constant 0 : index
    %c0_105 = arith.constant 0 : index
    %c0_106 = arith.constant 0 : index
    %238 = vector.load %arg15[%c0_104, %c0_105, %c0_106] : memref<2x1x64xf32, #tpu.memory_space<vmem>>, vector<1x1x64xf32>
    %239 = vector.shape_cast %238 : vector<1x1x64xf32> to vector<1x64xf32>
    %240 = vector.broadcast %239 : vector<1x64xf32> to vector<16x64xf32>
    %241 = arith.addf %237, %240 : vector<16x64xf32>
    %cst_107 = arith.constant 0.000000e+00 : f32
    %242 = vector.broadcast %cst_107 : f32 to vector<16x64xf32>
    %243 = arith.maximumf %241, %242 : vector<16x64xf32>
    %c0_108 = arith.constant 0 : index
    %c0_109 = arith.constant 0 : index
    %c0_110 = arith.constant 0 : index
    %244 = vector.load %arg16[%c0_108, %c0_109, %c0_110] : memref<2x64x32xf32, #tpu.memory_space<vmem>>, vector<1x64x32xf32>
    %245 = vector.shape_cast %244 : vector<1x64x32xf32> to vector<64x32xf32>
    %cst_111 = arith.constant dense<0.000000e+00> : vector<16x32xf32>
    %246 = tpu.matmul %243, %245, %cst_111 {dimension_numbers = #tpu.dot_dimension_numbers<[1], [0], [0], [1], [0, 0, 1, 1], [], []>} : vector<16x64xf32>, vector<64x32xf32>, vector<16x32xf32> -> vector<16x32xf32>
    %247 = arith.addf %210, %246 : vector<16x32xf32>
    %c0_112 = arith.constant 0 : index
    %c0_113 = arith.constant 0 : index
    %c0_114 = arith.constant 0 : index
    %248 = vector.load %arg17[%c0_112, %c0_113, %c0_114] : memref<2x1x32xf32, #tpu.memory_space<vmem>>, vector<1x1x32xf32>
    %249 = vector.shape_cast %248 : vector<1x1x32xf32> to vector<1x32xf32>
    %250 = vector.broadcast %249 : vector<1x32xf32> to vector<16x32xf32>
    %251 = arith.addf %247, %250 : vector<16x32xf32>
    %c1 = arith.constant 1 : index
    %c0_115 = arith.constant 0 : index
    %c0_116 = arith.constant 0 : index
    %252 = vector.load %arg6[%c1, %c0_115, %c0_116] : memref<2x1x32xf32, #tpu.memory_space<vmem>>, vector<1x1x32xf32>
    %253 = vector.shape_cast %252 : vector<1x1x32xf32> to vector<1x32xf32>
    %c1_117 = arith.constant 1 : index
    %c0_118 = arith.constant 0 : index
    %c0_119 = arith.constant 0 : index
    %254 = vector.load %arg7[%c1_117, %c0_118, %c0_119] : memref<2x1x32xf32, #tpu.memory_space<vmem>>, vector<1x1x32xf32>
    %255 = vector.shape_cast %254 : vector<1x1x32xf32> to vector<1x32xf32>
    %cst_120 = arith.constant dense<0.000000e+00> : vector<16xf32>
    %256 = vector.multi_reduction <add>, %251, %cst_120 [1] : vector<16x32xf32> to vector<16xf32>
    %257 = vector.shape_cast %256 : vector<16xf32> to vector<16x1xf32>
    %cst_121 = arith.constant 3.200000e+01 : f32
    %258 = vector.broadcast %cst_121 : f32 to vector<16x1xf32>
    %259 = arith.divf %257, %258 : vector<16x1xf32>
    %260 = vector.broadcast %259 : vector<16x1xf32> to vector<16x32xf32>
    %261 = arith.subf %251, %260 : vector<16x32xf32>
    %262 = arith.mulf %261, %261 : vector<16x32xf32>
    %cst_122 = arith.constant dense<0.000000e+00> : vector<16xf32>
    %263 = vector.multi_reduction <add>, %262, %cst_122 [1] : vector<16x32xf32> to vector<16xf32>
    %264 = vector.shape_cast %263 : vector<16xf32> to vector<16x1xf32>
    %cst_123 = arith.constant 3.200000e+01 : f32
    %265 = vector.broadcast %cst_123 : f32 to vector<16x1xf32>
    %266 = arith.divf %264, %265 : vector<16x1xf32>
    %cst_124 = arith.constant 9.99999974E-6 : f32
    %267 = vector.broadcast %cst_124 : f32 to vector<16x1xf32>
    %268 = arith.addf %266, %267 : vector<16x1xf32>
    %269 = math.rsqrt %268 : vector<16x1xf32>
    %270 = vector.broadcast %269 : vector<16x1xf32> to vector<16x32xf32>
    %271 = arith.mulf %261, %270 : vector<16x32xf32>
    %272 = vector.broadcast %253 : vector<1x32xf32> to vector<16x32xf32>
    %273 = arith.mulf %271, %272 : vector<16x32xf32>
    %274 = vector.broadcast %255 : vector<1x32xf32> to vector<16x32xf32>
    %275 = arith.addf %273, %274 : vector<16x32xf32>
    %c1_125 = arith.constant 1 : index
    %c0_126 = arith.constant 0 : index
    %c0_127 = arith.constant 0 : index
    %276 = vector.load %arg8[%c1_125, %c0_126, %c0_127] : memref<2x32x96xf32, #tpu.memory_space<vmem>>, vector<1x32x96xf32>
    %277 = vector.shape_cast %276 : vector<1x32x96xf32> to vector<32x96xf32>
    %cst_128 = arith.constant dense<0.000000e+00> : vector<16x96xf32>
    %278 = tpu.matmul %275, %277, %cst_128 {dimension_numbers = #tpu.dot_dimension_numbers<[1], [0], [0], [1], [0, 0, 1, 1], [], []>} : vector<16x32xf32>, vector<32x96xf32>, vector<16x96xf32> -> vector<16x96xf32>
    %c1_129 = arith.constant 1 : index
    %c0_130 = arith.constant 0 : index
    %c0_131 = arith.constant 0 : index
    %279 = vector.load %arg9[%c1_129, %c0_130, %c0_131] : memref<2x1x96xf32, #tpu.memory_space<vmem>>, vector<1x1x96xf32>
    %280 = vector.shape_cast %279 : vector<1x1x96xf32> to vector<1x96xf32>
    %281 = vector.broadcast %280 : vector<1x96xf32> to vector<16x96xf32>
    %282 = arith.addf %278, %281 : vector<16x96xf32>
    %283 = vector.extract_strided_slice %8 {offsets = [0, 0], sizes = [1, 8], strides = [1, 1]} : vector<2x8xf32> to vector<1x8xf32>
    %284 = vector.extract_strided_slice %282 {offsets = [0, 0], sizes = [8, 8], strides = [1, 1]} : vector<16x96xf32> to vector<8x8xf32>
    %285 = vector.extract_strided_slice %282 {offsets = [0, 32], sizes = [8, 8], strides = [1, 1]} : vector<16x96xf32> to vector<8x8xf32>
    %286 = vector.extract_strided_slice %282 {offsets = [0, 64], sizes = [8, 8], strides = [1, 1]} : vector<16x96xf32> to vector<8x8xf32>
    %cst_132 = arith.constant dense<0.000000e+00> : vector<8x8xf32>
    %287 = tpu.matmul %284, %285, %cst_132 {dimension_numbers = #tpu.dot_dimension_numbers<[1], [1], [0], [0], [0, 0, 1, 0], [], []>} : vector<8x8xf32>, vector<8x8xf32>, vector<8x8xf32> -> vector<8x8xf32>
    %cst_133 = arith.constant 0.353553385 : f32
    %288 = vector.broadcast %cst_133 : f32 to vector<8x8xf32>
    %289 = arith.mulf %287, %288 : vector<8x8xf32>
    %290 = vector.broadcast %283 : vector<1x8xf32> to vector<8x8xf32>
    %291 = arith.addf %289, %290 : vector<8x8xf32>
    %cst_134 = arith.constant dense<0xFF800000> : vector<8xf32>
    %292 = vector.multi_reduction <maximumf>, %291, %cst_134 [1] : vector<8x8xf32> to vector<8xf32>
    %293 = vector.shape_cast %292 : vector<8xf32> to vector<8x1xf32>
    %294 = vector.broadcast %293 : vector<8x1xf32> to vector<8x8xf32>
    %295 = arith.subf %291, %294 : vector<8x8xf32>
    %296 = math.exp %295 : vector<8x8xf32>
    %cst_135 = arith.constant dense<0.000000e+00> : vector<8xf32>
    %297 = vector.multi_reduction <add>, %296, %cst_135 [1] : vector<8x8xf32> to vector<8xf32>
    %298 = vector.shape_cast %297 : vector<8xf32> to vector<8x1xf32>
    %299 = tpu.reciprocal %298 {approx = true} : vector<8x1xf32> -> vector<8x1xf32>
    %300 = vector.broadcast %299 : vector<8x1xf32> to vector<8x8xf32>
    %301 = arith.mulf %296, %300 : vector<8x8xf32>
    %cst_136 = arith.constant dense<0.000000e+00> : vector<8x8xf32>
    %302 = tpu.matmul %301, %286, %cst_136 {dimension_numbers = #tpu.dot_dimension_numbers<[1], [0], [0], [1], [0, 0, 1, 1], [], []>} : vector<8x8xf32>, vector<8x8xf32>, vector<8x8xf32> -> vector<8x8xf32>
    %c0_137 = arith.constant 0 : index
    %c0_138 = arith.constant 0 : index
    %303 = vector.load %arg26[%c0_137, %c0_138] : memref<16x32xf32, #tpu.memory_space<vmem>>, vector<8x8xf32>
    tpu.vector_store %arg26[%c0_137, %c0_138], %302 {strides = array<i32>} : memref<16x32xf32, #tpu.memory_space<vmem>>, vector<8x8xf32>,
    %304 = vector.extract_strided_slice %282 {offsets = [0, 8], sizes = [8, 8], strides = [1, 1]} : vector<16x96xf32> to vector<8x8xf32>
    %305 = vector.extract_strided_slice %282 {offsets = [0, 40], sizes = [8, 8], strides = [1, 1]} : vector<16x96xf32> to vector<8x8xf32>
    %306 = vector.extract_strided_slice %282 {offsets = [0, 72], sizes = [8, 8], strides = [1, 1]} : vector<16x96xf32> to vector<8x8xf32>
    %cst_139 = arith.constant dense<0.000000e+00> : vector<8x8xf32>
    %307 = tpu.matmul %304, %305, %cst_139 {dimension_numbers = #tpu.dot_dimension_numbers<[1], [1], [0], [0], [0, 0, 1, 0], [], []>} : vector<8x8xf32>, vector<8x8xf32>, vector<8x8xf32> -> vector<8x8xf32>
    %cst_140 = arith.constant 0.353553385 : f32
    %308 = vector.broadcast %cst_140 : f32 to vector<8x8xf32>
    %309 = arith.mulf %307, %308 : vector<8x8xf32>
    %310 = vector.broadcast %283 : vector<1x8xf32> to vector<8x8xf32>
    %311 = arith.addf %309, %310 : vector<8x8xf32>
    %cst_141 = arith.constant dense<0xFF800000> : vector<8xf32>
    %312 = vector.multi_reduction <maximumf>, %311, %cst_141 [1] : vector<8x8xf32> to vector<8xf32>
    %313 = vector.shape_cast %312 : vector<8xf32> to vector<8x1xf32>
    %314 = vector.broadcast %313 : vector<8x1xf32> to vector<8x8xf32>
    %315 = arith.subf %311, %314 : vector<8x8xf32>
    %316 = math.exp %315 : vector<8x8xf32>
    %cst_142 = arith.constant dense<0.000000e+00> : vector<8xf32>
    %317 = vector.multi_reduction <add>, %316, %cst_142 [1] : vector<8x8xf32> to vector<8xf32>
    %318 = vector.shape_cast %317 : vector<8xf32> to vector<8x1xf32>
    %319 = tpu.reciprocal %318 {approx = true} : vector<8x1xf32> -> vector<8x1xf32>
    %320 = vector.broadcast %319 : vector<8x1xf32> to vector<8x8xf32>
    %321 = arith.mulf %316, %320 : vector<8x8xf32>
    %cst_143 = arith.constant dense<0.000000e+00> : vector<8x8xf32>
    %322 = tpu.matmul %321, %306, %cst_143 {dimension_numbers = #tpu.dot_dimension_numbers<[1], [0], [0], [1], [0, 0, 1, 1], [], []>} : vector<8x8xf32>, vector<8x8xf32>, vector<8x8xf32> -> vector<8x8xf32>
    %c0_144 = arith.constant 0 : index
    %c8_145 = arith.constant 8 : index
    %323 = vector.load %arg26[%c0_144, %c8_145] : memref<16x32xf32, #tpu.memory_space<vmem>>, vector<8x8xf32>
    tpu.vector_store %arg26[%c0_144, %c8_145], %322 {strides = array<i32>} : memref<16x32xf32, #tpu.memory_space<vmem>>, vector<8x8xf32>,
    %324 = vector.extract_strided_slice %282 {offsets = [0, 16], sizes = [8, 8], strides = [1, 1]} : vector<16x96xf32> to vector<8x8xf32>
    %325 = vector.extract_strided_slice %282 {offsets = [0, 48], sizes = [8, 8], strides = [1, 1]} : vector<16x96xf32> to vector<8x8xf32>
    %326 = vector.extract_strided_slice %282 {offsets = [0, 80], sizes = [8, 8], strides = [1, 1]} : vector<16x96xf32> to vector<8x8xf32>
    %cst_146 = arith.constant dense<0.000000e+00> : vector<8x8xf32>
    %327 = tpu.matmul %324, %325, %cst_146 {dimension_numbers = #tpu.dot_dimension_numbers<[1], [1], [0], [0], [0, 0, 1, 0], [], []>} : vector<8x8xf32>, vector<8x8xf32>, vector<8x8xf32> -> vector<8x8xf32>
    %cst_147 = arith.constant 0.353553385 : f32
    %328 = vector.broadcast %cst_147 : f32 to vector<8x8xf32>
    %329 = arith.mulf %327, %328 : vector<8x8xf32>
    %330 = vector.broadcast %283 : vector<1x8xf32> to vector<8x8xf32>
    %331 = arith.addf %329, %330 : vector<8x8xf32>
    %cst_148 = arith.constant dense<0xFF800000> : vector<8xf32>
    %332 = vector.multi_reduction <maximumf>, %331, %cst_148 [1] : vector<8x8xf32> to vector<8xf32>
    %333 = vector.shape_cast %332 : vector<8xf32> to vector<8x1xf32>
    %334 = vector.broadcast %333 : vector<8x1xf32> to vector<8x8xf32>
    %335 = arith.subf %331, %334 : vector<8x8xf32>
    %336 = math.exp %335 : vector<8x8xf32>
    %cst_149 = arith.constant dense<0.000000e+00> : vector<8xf32>
    %337 = vector.multi_reduction <add>, %336, %cst_149 [1] : vector<8x8xf32> to vector<8xf32>
    %338 = vector.shape_cast %337 : vector<8xf32> to vector<8x1xf32>
    %339 = tpu.reciprocal %338 {approx = true} : vector<8x1xf32> -> vector<8x1xf32>
    %340 = vector.broadcast %339 : vector<8x1xf32> to vector<8x8xf32>
    %341 = arith.mulf %336, %340 : vector<8x8xf32>
    %cst_150 = arith.constant dense<0.000000e+00> : vector<8x8xf32>
    %342 = tpu.matmul %341, %326, %cst_150 {dimension_numbers = #tpu.dot_dimension_numbers<[1], [0], [0], [1], [0, 0, 1, 1], [], []>} : vector<8x8xf32>, vector<8x8xf32>, vector<8x8xf32> -> vector<8x8xf32>
    %c0_151 = arith.constant 0 : index
    %c16_152 = arith.constant 16 : index
    %343 = vector.load %arg26[%c0_151, %c16_152] : memref<16x32xf32, #tpu.memory_space<vmem>>, vector<8x8xf32>
    tpu.vector_store %arg26[%c0_151, %c16_152], %342 {strides = array<i32>} : memref<16x32xf32, #tpu.memory_space<vmem>>, vector<8x8xf32>,
    %344 = vector.extract_strided_slice %282 {offsets = [0, 24], sizes = [8, 8], strides = [1, 1]} : vector<16x96xf32> to vector<8x8xf32>
    %345 = vector.extract_strided_slice %282 {offsets = [0, 56], sizes = [8, 8], strides = [1, 1]} : vector<16x96xf32> to vector<8x8xf32>
    %346 = vector.extract_strided_slice %282 {offsets = [0, 88], sizes = [8, 8], strides = [1, 1]} : vector<16x96xf32> to vector<8x8xf32>
    %cst_153 = arith.constant dense<0.000000e+00> : vector<8x8xf32>
    %347 = tpu.matmul %344, %345, %cst_153 {dimension_numbers = #tpu.dot_dimension_numbers<[1], [1], [0], [0], [0, 0, 1, 0], [], []>} : vector<8x8xf32>, vector<8x8xf32>, vector<8x8xf32> -> vector<8x8xf32>
    %cst_154 = arith.constant 0.353553385 : f32
    %348 = vector.broadcast %cst_154 : f32 to vector<8x8xf32>
    %349 = arith.mulf %347, %348 : vector<8x8xf32>
    %350 = vector.broadcast %283 : vector<1x8xf32> to vector<8x8xf32>
    %351 = arith.addf %349, %350 : vector<8x8xf32>
    %cst_155 = arith.constant dense<0xFF800000> : vector<8xf32>
    %352 = vector.multi_reduction <maximumf>, %351, %cst_155 [1] : vector<8x8xf32> to vector<8xf32>
    %353 = vector.shape_cast %352 : vector<8xf32> to vector<8x1xf32>
    %354 = vector.broadcast %353 : vector<8x1xf32> to vector<8x8xf32>
    %355 = arith.subf %351, %354 : vector<8x8xf32>
    %356 = math.exp %355 : vector<8x8xf32>
    %cst_156 = arith.constant dense<0.000000e+00> : vector<8xf32>
    %357 = vector.multi_reduction <add>, %356, %cst_156 [1] : vector<8x8xf32> to vector<8xf32>
    %358 = vector.shape_cast %357 : vector<8xf32> to vector<8x1xf32>
    %359 = tpu.reciprocal %358 {approx = true} : vector<8x1xf32> -> vector<8x1xf32>
    %360 = vector.broadcast %359 : vector<8x1xf32> to vector<8x8xf32>
    %361 = arith.mulf %356, %360 : vector<8x8xf32>
    %cst_157 = arith.constant dense<0.000000e+00> : vector<8x8xf32>
    %362 = tpu.matmul %361, %346, %cst_157 {dimension_numbers = #tpu.dot_dimension_numbers<[1], [0], [0], [1], [0, 0, 1, 1], [], []>} : vector<8x8xf32>, vector<8x8xf32>, vector<8x8xf32> -> vector<8x8xf32>
    %c0_158 = arith.constant 0 : index
    %c24_159 = arith.constant 24 : index
    %363 = vector.load %arg26[%c0_158, %c24_159] : memref<16x32xf32, #tpu.memory_space<vmem>>, vector<8x8xf32>
    tpu.vector_store %arg26[%c0_158, %c24_159], %362 {strides = array<i32>} : memref<16x32xf32, #tpu.memory_space<vmem>>, vector<8x8xf32>,
    %364 = vector.extract_strided_slice %8 {offsets = [1, 0], sizes = [1, 8], strides = [1, 1]} : vector<2x8xf32> to vector<1x8xf32>
    %365 = vector.extract_strided_slice %282 {offsets = [8, 0], sizes = [8, 8], strides = [1, 1]} : vector<16x96xf32> to vector<8x8xf32>
    %366 = vector.extract_strided_slice %282 {offsets = [8, 32], sizes = [8, 8], strides = [1, 1]} : vector<16x96xf32> to vector<8x8xf32>
    %367 = vector.extract_strided_slice %282 {offsets = [8, 64], sizes = [8, 8], strides = [1, 1]} : vector<16x96xf32> to vector<8x8xf32>
    %cst_160 = arith.constant dense<0.000000e+00> : vector<8x8xf32>
    %368 = tpu.matmul %365, %366, %cst_160 {dimension_numbers = #tpu.dot_dimension_numbers<[1], [1], [0], [0], [0, 0, 1, 0], [], []>} : vector<8x8xf32>, vector<8x8xf32>, vector<8x8xf32> -> vector<8x8xf32>
    %cst_161 = arith.constant 0.353553385 : f32
    %369 = vector.broadcast %cst_161 : f32 to vector<8x8xf32>
    %370 = arith.mulf %368, %369 : vector<8x8xf32>
    %371 = vector.broadcast %364 : vector<1x8xf32> to vector<8x8xf32>
    %372 = arith.addf %370, %371 : vector<8x8xf32>
    %cst_162 = arith.constant dense<0xFF800000> : vector<8xf32>
    %373 = vector.multi_reduction <maximumf>, %372, %cst_162 [1] : vector<8x8xf32> to vector<8xf32>
    %374 = vector.shape_cast %373 : vector<8xf32> to vector<8x1xf32>
    %375 = vector.broadcast %374 : vector<8x1xf32> to vector<8x8xf32>
    %376 = arith.subf %372, %375 : vector<8x8xf32>
    %377 = math.exp %376 : vector<8x8xf32>
    %cst_163 = arith.constant dense<0.000000e+00> : vector<8xf32>
    %378 = vector.multi_reduction <add>, %377, %cst_163 [1] : vector<8x8xf32> to vector<8xf32>
    %379 = vector.shape_cast %378 : vector<8xf32> to vector<8x1xf32>
    %380 = tpu.reciprocal %379 {approx = true} : vector<8x1xf32> -> vector<8x1xf32>
    %381 = vector.broadcast %380 : vector<8x1xf32> to vector<8x8xf32>
    %382 = arith.mulf %377, %381 : vector<8x8xf32>
    %cst_164 = arith.constant dense<0.000000e+00> : vector<8x8xf32>
    %383 = tpu.matmul %382, %367, %cst_164 {dimension_numbers = #tpu.dot_dimension_numbers<[1], [0], [0], [1], [0, 0, 1, 1], [], []>} : vector<8x8xf32>, vector<8x8xf32>, vector<8x8xf32> -> vector<8x8xf32>
    %c8_165 = arith.constant 8 : index
    %c0_166 = arith.constant 0 : index
    %384 = vector.load %arg26[%c8_165, %c0_166] : memref<16x32xf32, #tpu.memory_space<vmem>>, vector<8x8xf32>
    tpu.vector_store %arg26[%c8_165, %c0_166], %383 {strides = array<i32>} : memref<16x32xf32, #tpu.memory_space<vmem>>, vector<8x8xf32>,
    %385 = vector.extract_strided_slice %282 {offsets = [8, 8], sizes = [8, 8], strides = [1, 1]} : vector<16x96xf32> to vector<8x8xf32>
    %386 = vector.extract_strided_slice %282 {offsets = [8, 40], sizes = [8, 8], strides = [1, 1]} : vector<16x96xf32> to vector<8x8xf32>
    %387 = vector.extract_strided_slice %282 {offsets = [8, 72], sizes = [8, 8], strides = [1, 1]} : vector<16x96xf32> to vector<8x8xf32>
    %cst_167 = arith.constant dense<0.000000e+00> : vector<8x8xf32>
    %388 = tpu.matmul %385, %386, %cst_167 {dimension_numbers = #tpu.dot_dimension_numbers<[1], [1], [0], [0], [0, 0, 1, 0], [], []>} : vector<8x8xf32>, vector<8x8xf32>, vector<8x8xf32> -> vector<8x8xf32>
    %cst_168 = arith.constant 0.353553385 : f32
    %389 = vector.broadcast %cst_168 : f32 to vector<8x8xf32>
    %390 = arith.mulf %388, %389 : vector<8x8xf32>
    %391 = vector.broadcast %364 : vector<1x8xf32> to vector<8x8xf32>
    %392 = arith.addf %390, %391 : vector<8x8xf32>
    %cst_169 = arith.constant dense<0xFF800000> : vector<8xf32>
    %393 = vector.multi_reduction <maximumf>, %392, %cst_169 [1] : vector<8x8xf32> to vector<8xf32>
    %394 = vector.shape_cast %393 : vector<8xf32> to vector<8x1xf32>
    %395 = vector.broadcast %394 : vector<8x1xf32> to vector<8x8xf32>
    %396 = arith.subf %392, %395 : vector<8x8xf32>
    %397 = math.exp %396 : vector<8x8xf32>
    %cst_170 = arith.constant dense<0.000000e+00> : vector<8xf32>
    %398 = vector.multi_reduction <add>, %397, %cst_170 [1] : vector<8x8xf32> to vector<8xf32>
    %399 = vector.shape_cast %398 : vector<8xf32> to vector<8x1xf32>
    %400 = tpu.reciprocal %399 {approx = true} : vector<8x1xf32> -> vector<8x1xf32>
    %401 = vector.broadcast %400 : vector<8x1xf32> to vector<8x8xf32>
    %402 = arith.mulf %397, %401 : vector<8x8xf32>
    %cst_171 = arith.constant dense<0.000000e+00> : vector<8x8xf32>
    %403 = tpu.matmul %402, %387, %cst_171 {dimension_numbers = #tpu.dot_dimension_numbers<[1], [0], [0], [1], [0, 0, 1, 1], [], []>} : vector<8x8xf32>, vector<8x8xf32>, vector<8x8xf32> -> vector<8x8xf32>
    %c8_172 = arith.constant 8 : index
    %c8_173 = arith.constant 8 : index
    %404 = vector.load %arg26[%c8_172, %c8_173] : memref<16x32xf32, #tpu.memory_space<vmem>>, vector<8x8xf32>
    tpu.vector_store %arg26[%c8_172, %c8_173], %403 {strides = array<i32>} : memref<16x32xf32, #tpu.memory_space<vmem>>, vector<8x8xf32>,
    %405 = vector.extract_strided_slice %282 {offsets = [8, 16], sizes = [8, 8], strides = [1, 1]} : vector<16x96xf32> to vector<8x8xf32>
    %406 = vector.extract_strided_slice %282 {offsets = [8, 48], sizes = [8, 8], strides = [1, 1]} : vector<16x96xf32> to vector<8x8xf32>
    %407 = vector.extract_strided_slice %282 {offsets = [8, 80], sizes = [8, 8], strides = [1, 1]} : vector<16x96xf32> to vector<8x8xf32>
    %cst_174 = arith.constant dense<0.000000e+00> : vector<8x8xf32>
    %408 = tpu.matmul %405, %406, %cst_174 {dimension_numbers = #tpu.dot_dimension_numbers<[1], [1], [0], [0], [0, 0, 1, 0], [], []>} : vector<8x8xf32>, vector<8x8xf32>, vector<8x8xf32> -> vector<8x8xf32>
    %cst_175 = arith.constant 0.353553385 : f32
    %409 = vector.broadcast %cst_175 : f32 to vector<8x8xf32>
    %410 = arith.mulf %408, %409 : vector<8x8xf32>
    %411 = vector.broadcast %364 : vector<1x8xf32> to vector<8x8xf32>
    %412 = arith.addf %410, %411 : vector<8x8xf32>
    %cst_176 = arith.constant dense<0xFF800000> : vector<8xf32>
    %413 = vector.multi_reduction <maximumf>, %412, %cst_176 [1] : vector<8x8xf32> to vector<8xf32>
    %414 = vector.shape_cast %413 : vector<8xf32> to vector<8x1xf32>
    %415 = vector.broadcast %414 : vector<8x1xf32> to vector<8x8xf32>
    %416 = arith.subf %412, %415 : vector<8x8xf32>
    %417 = math.exp %416 : vector<8x8xf32>
    %cst_177 = arith.constant dense<0.000000e+00> : vector<8xf32>
    %418 = vector.multi_reduction <add>, %417, %cst_177 [1] : vector<8x8xf32> to vector<8xf32>
    %419 = vector.shape_cast %418 : vector<8xf32> to vector<8x1xf32>
    %420 = tpu.reciprocal %419 {approx = true} : vector<8x1xf32> -> vector<8x1xf32>
    %421 = vector.broadcast %420 : vector<8x1xf32> to vector<8x8xf32>
    %422 = arith.mulf %417, %421 : vector<8x8xf32>
    %cst_178 = arith.constant dense<0.000000e+00> : vector<8x8xf32>
    %423 = tpu.matmul %422, %407, %cst_178 {dimension_numbers = #tpu.dot_dimension_numbers<[1], [0], [0], [1], [0, 0, 1, 1], [], []>} : vector<8x8xf32>, vector<8x8xf32>, vector<8x8xf32> -> vector<8x8xf32>
    %c8_179 = arith.constant 8 : index
    %c16_180 = arith.constant 16 : index
    %424 = vector.load %arg26[%c8_179, %c16_180] : memref<16x32xf32, #tpu.memory_space<vmem>>, vector<8x8xf32>
    tpu.vector_store %arg26[%c8_179, %c16_180], %423 {strides = array<i32>} : memref<16x32xf32, #tpu.memory_space<vmem>>, vector<8x8xf32>,
    %425 = vector.extract_strided_slice %282 {offsets = [8, 24], sizes = [8, 8], strides = [1, 1]} : vector<16x96xf32> to vector<8x8xf32>
    %426 = vector.extract_strided_slice %282 {offsets = [8, 56], sizes = [8, 8], strides = [1, 1]} : vector<16x96xf32> to vector<8x8xf32>
    %427 = vector.extract_strided_slice %282 {offsets = [8, 88], sizes = [8, 8], strides = [1, 1]} : vector<16x96xf32> to vector<8x8xf32>
    %cst_181 = arith.constant dense<0.000000e+00> : vector<8x8xf32>
    %428 = tpu.matmul %425, %426, %cst_181 {dimension_numbers = #tpu.dot_dimension_numbers<[1], [1], [0], [0], [0, 0, 1, 0], [], []>} : vector<8x8xf32>, vector<8x8xf32>, vector<8x8xf32> -> vector<8x8xf32>
    %cst_182 = arith.constant 0.353553385 : f32
    %429 = vector.broadcast %cst_182 : f32 to vector<8x8xf32>
    %430 = arith.mulf %428, %429 : vector<8x8xf32>
    %431 = vector.broadcast %364 : vector<1x8xf32> to vector<8x8xf32>
    %432 = arith.addf %430, %431 : vector<8x8xf32>
    %cst_183 = arith.constant dense<0xFF800000> : vector<8xf32>
    %433 = vector.multi_reduction <maximumf>, %432, %cst_183 [1] : vector<8x8xf32> to vector<8xf32>
    %434 = vector.shape_cast %433 : vector<8xf32> to vector<8x1xf32>
    %435 = vector.broadcast %434 : vector<8x1xf32> to vector<8x8xf32>
    %436 = arith.subf %432, %435 : vector<8x8xf32>
    %437 = math.exp %436 : vector<8x8xf32>
    %cst_184 = arith.constant dense<0.000000e+00> : vector<8xf32>
    %438 = vector.multi_reduction <add>, %437, %cst_184 [1] : vector<8x8xf32> to vector<8xf32>
    %439 = vector.shape_cast %438 : vector<8xf32> to vector<8x1xf32>
    %440 = tpu.reciprocal %439 {approx = true} : vector<8x1xf32> -> vector<8x1xf32>
    %441 = vector.broadcast %440 : vector<8x1xf32> to vector<8x8xf32>
    %442 = arith.mulf %437, %441 : vector<8x8xf32>
    %cst_185 = arith.constant dense<0.000000e+00> : vector<8x8xf32>
    %443 = tpu.matmul %442, %427, %cst_185 {dimension_numbers = #tpu.dot_dimension_numbers<[1], [0], [0], [1], [0, 0, 1, 1], [], []>} : vector<8x8xf32>, vector<8x8xf32>, vector<8x8xf32> -> vector<8x8xf32>
    %c8_186 = arith.constant 8 : index
    %c24_187 = arith.constant 24 : index
    %444 = vector.load %arg26[%c8_186, %c24_187] : memref<16x32xf32, #tpu.memory_space<vmem>>, vector<8x8xf32>
    tpu.vector_store %arg26[%c8_186, %c24_187], %443 {strides = array<i32>} : memref<16x32xf32, #tpu.memory_space<vmem>>, vector<8x8xf32>,
    %c0_188 = arith.constant 0 : index
    %c0_189 = arith.constant 0 : index
    %445 = vector.load %arg26[%c0_188, %c0_189] : memref<16x32xf32, #tpu.memory_space<vmem>>, vector<16x32xf32>
    %c1_190 = arith.constant 1 : index
    %c0_191 = arith.constant 0 : index
    %c0_192 = arith.constant 0 : index
    %446 = vector.load %arg10[%c1_190, %c0_191, %c0_192] : memref<2x32x32xf32, #tpu.memory_space<vmem>>, vector<1x32x32xf32>
    %447 = vector.shape_cast %446 : vector<1x32x32xf32> to vector<32x32xf32>
    %cst_193 = arith.constant dense<0.000000e+00> : vector<16x32xf32>
    %448 = tpu.matmul %445, %447, %cst_193 {dimension_numbers = #tpu.dot_dimension_numbers<[1], [0], [0], [1], [0, 0, 1, 1], [], []>} : vector<16x32xf32>, vector<32x32xf32>, vector<16x32xf32> -> vector<16x32xf32>
    %c1_194 = arith.constant 1 : index
    %c0_195 = arith.constant 0 : index
    %c0_196 = arith.constant 0 : index
    %449 = vector.load %arg11[%c1_194, %c0_195, %c0_196] : memref<2x1x32xf32, #tpu.memory_space<vmem>>, vector<1x1x32xf32>
    %450 = vector.shape_cast %449 : vector<1x1x32xf32> to vector<1x32xf32>
    %451 = vector.broadcast %450 : vector<1x32xf32> to vector<16x32xf32>
    %452 = arith.addf %448, %451 : vector<16x32xf32>
    %453 = arith.addf %251, %452 : vector<16x32xf32>
    %c1_197 = arith.constant 1 : index
    %c0_198 = arith.constant 0 : index
    %c0_199 = arith.constant 0 : index
    %454 = vector.load %arg12[%c1_197, %c0_198, %c0_199] : memref<2x1x32xf32, #tpu.memory_space<vmem>>, vector<1x1x32xf32>
    %455 = vector.shape_cast %454 : vector<1x1x32xf32> to vector<1x32xf32>
    %c1_200 = arith.constant 1 : index
    %c0_201 = arith.constant 0 : index
    %c0_202 = arith.constant 0 : index
    %456 = vector.load %arg13[%c1_200, %c0_201, %c0_202] : memref<2x1x32xf32, #tpu.memory_space<vmem>>, vector<1x1x32xf32>
    %457 = vector.shape_cast %456 : vector<1x1x32xf32> to vector<1x32xf32>
    %cst_203 = arith.constant dense<0.000000e+00> : vector<16xf32>
    %458 = vector.multi_reduction <add>, %453, %cst_203 [1] : vector<16x32xf32> to vector<16xf32>
    %459 = vector.shape_cast %458 : vector<16xf32> to vector<16x1xf32>
    %cst_204 = arith.constant 3.200000e+01 : f32
    %460 = vector.broadcast %cst_204 : f32 to vector<16x1xf32>
    %461 = arith.divf %459, %460 : vector<16x1xf32>
    %462 = vector.broadcast %461 : vector<16x1xf32> to vector<16x32xf32>
    %463 = arith.subf %453, %462 : vector<16x32xf32>
    %464 = arith.mulf %463, %463 : vector<16x32xf32>
    %cst_205 = arith.constant dense<0.000000e+00> : vector<16xf32>
    %465 = vector.multi_reduction <add>, %464, %cst_205 [1] : vector<16x32xf32> to vector<16xf32>
    %466 = vector.shape_cast %465 : vector<16xf32> to vector<16x1xf32>
    %cst_206 = arith.constant 3.200000e+01 : f32
    %467 = vector.broadcast %cst_206 : f32 to vector<16x1xf32>
    %468 = arith.divf %466, %467 : vector<16x1xf32>
    %cst_207 = arith.constant 9.99999974E-6 : f32
    %469 = vector.broadcast %cst_207 : f32 to vector<16x1xf32>
    %470 = arith.addf %468, %469 : vector<16x1xf32>
    %471 = math.rsqrt %470 : vector<16x1xf32>
    %472 = vector.broadcast %471 : vector<16x1xf32> to vector<16x32xf32>
    %473 = arith.mulf %463, %472 : vector<16x32xf32>
    %474 = vector.broadcast %455 : vector<1x32xf32> to vector<16x32xf32>
    %475 = arith.mulf %473, %474 : vector<16x32xf32>
    %476 = vector.broadcast %457 : vector<1x32xf32> to vector<16x32xf32>
    %477 = arith.addf %475, %476 : vector<16x32xf32>
    %c1_208 = arith.constant 1 : index
    %c0_209 = arith.constant 0 : index
    %c0_210 = arith.constant 0 : index
    %478 = vector.load %arg14[%c1_208, %c0_209, %c0_210] : memref<2x32x64xf32, #tpu.memory_space<vmem>>, vector<1x32x64xf32>
    %479 = vector.shape_cast %478 : vector<1x32x64xf32> to vector<32x64xf32>
    %cst_211 = arith.constant dense<0.000000e+00> : vector<16x64xf32>
    %480 = tpu.matmul %477, %479, %cst_211 {dimension_numbers = #tpu.dot_dimension_numbers<[1], [0], [0], [1], [0, 0, 1, 1], [], []>} : vector<16x32xf32>, vector<32x64xf32>, vector<16x64xf32> -> vector<16x64xf32>
    %c1_212 = arith.constant 1 : index
    %c0_213 = arith.constant 0 : index
    %c0_214 = arith.constant 0 : index
    %481 = vector.load %arg15[%c1_212, %c0_213, %c0_214] : memref<2x1x64xf32, #tpu.memory_space<vmem>>, vector<1x1x64xf32>
    %482 = vector.shape_cast %481 : vector<1x1x64xf32> to vector<1x64xf32>
    %483 = vector.broadcast %482 : vector<1x64xf32> to vector<16x64xf32>
    %484 = arith.addf %480, %483 : vector<16x64xf32>
    %cst_215 = arith.constant 0.000000e+00 : f32
    %485 = vector.broadcast %cst_215 : f32 to vector<16x64xf32>
    %486 = arith.maximumf %484, %485 : vector<16x64xf32>
    %c1_216 = arith.constant 1 : index
    %c0_217 = arith.constant 0 : index
    %c0_218 = arith.constant 0 : index
    %487 = vector.load %arg16[%c1_216, %c0_217, %c0_218] : memref<2x64x32xf32, #tpu.memory_space<vmem>>, vector<1x64x32xf32>
    %488 = vector.shape_cast %487 : vector<1x64x32xf32> to vector<64x32xf32>
    %cst_219 = arith.constant dense<0.000000e+00> : vector<16x32xf32>
    %489 = tpu.matmul %486, %488, %cst_219 {dimension_numbers = #tpu.dot_dimension_numbers<[1], [0], [0], [1], [0, 0, 1, 1], [], []>} : vector<16x64xf32>, vector<64x32xf32>, vector<16x32xf32> -> vector<16x32xf32>
    %490 = arith.addf %453, %489 : vector<16x32xf32>
    %c1_220 = arith.constant 1 : index
    %c0_221 = arith.constant 0 : index
    %c0_222 = arith.constant 0 : index
    %491 = vector.load %arg17[%c1_220, %c0_221, %c0_222] : memref<2x1x32xf32, #tpu.memory_space<vmem>>, vector<1x1x32xf32>
    %492 = vector.shape_cast %491 : vector<1x1x32xf32> to vector<1x32xf32>
    %493 = vector.broadcast %492 : vector<1x32xf32> to vector<16x32xf32>
    %494 = arith.addf %490, %493 : vector<16x32xf32>
    %c0_223 = arith.constant 0 : index
    %c0_224 = arith.constant 0 : index
    %495 = vector.load %arg3[%c0_223, %c0_224] : memref<2x5xf32, #tpu.memory_space<vmem>>, vector<2x5xf32>
    %c0_225 = arith.constant 0 : index
    %c0_226 = arith.constant 0 : index
    %496 = vector.load %arg18[%c0_225, %c0_226] : memref<5x16xf32, #tpu.memory_space<vmem>>, vector<5x16xf32>
    %cst_227 = arith.constant dense<0.000000e+00> : vector<2x16xf32>
    %497 = tpu.matmul %495, %496, %cst_227 {dimension_numbers = #tpu.dot_dimension_numbers<[1], [0], [0], [1], [0, 0, 1, 1], [], []>} : vector<2x5xf32>, vector<5x16xf32>, vector<2x16xf32> -> vector<2x16xf32>
    %c0_228 = arith.constant 0 : index
    %c0_229 = arith.constant 0 : index
    %498 = vector.load %arg19[%c0_228, %c0_229] : memref<1x16xf32, #tpu.memory_space<vmem>>, vector<1x16xf32>
    %499 = vector.broadcast %498 : vector<1x16xf32> to vector<2x16xf32>
    %500 = arith.addf %497, %499 : vector<2x16xf32>
    %c0_230 = arith.constant 0 : index
    %c0_231 = arith.constant 0 : index
    %501 = vector.load %arg21[%c0_230, %c0_231] : memref<16x32xf32, #tpu.memory_space<vmem>>, vector<16x32xf32>
    %cst_232 = arith.constant dense<0.000000e+00> : vector<2x32xf32>
    %502 = tpu.matmul %500, %501, %cst_232 {dimension_numbers = #tpu.dot_dimension_numbers<[1], [0], [0], [1], [0, 0, 1, 1], [], []>} : vector<2x16xf32>, vector<16x32xf32>, vector<2x32xf32> -> vector<2x32xf32>
    %c0_233 = arith.constant 0 : index
    %c0_234 = arith.constant 0 : index
    %503 = vector.load %arg20[%c0_233, %c0_234] : memref<32x32xf32, #tpu.memory_space<vmem>>, vector<32x32xf32>
    %cst_235 = arith.constant dense<0.000000e+00> : vector<16x32xf32>
    %504 = tpu.matmul %494, %503, %cst_235 {dimension_numbers = #tpu.dot_dimension_numbers<[1], [0], [0], [1], [0, 0, 1, 1], [], []>} : vector<16x32xf32>, vector<32x32xf32>, vector<16x32xf32> -> vector<16x32xf32>
    %c0_236 = arith.constant 0 : index
    %c0_237 = arith.constant 0 : index
    %505 = vector.load %arg22[%c0_236, %c0_237] : memref<1x32xf32, #tpu.memory_space<vmem>>, vector<1x32xf32>
    %506 = vector.broadcast %505 : vector<1x32xf32> to vector<16x32xf32>
    %507 = arith.addf %504, %506 : vector<16x32xf32>
    %c0_238 = arith.constant 0 : index
    %c0_239 = arith.constant 0 : index
    %508 = vector.load %arg23[%c0_238, %c0_239] : memref<32x6xf32, #tpu.memory_space<vmem>>, vector<32x6xf32>
    %c0_240 = arith.constant 0 : index
    %c0_241 = arith.constant 0 : index
    %509 = vector.load %arg24[%c0_240, %c0_241] : memref<1x6xf32, #tpu.memory_space<vmem>>, vector<1x6xf32>
    %510 = vector.extract_strided_slice %507 {offsets = [0, 0], sizes = [8, 32], strides = [1, 1]} : vector<16x32xf32> to vector<8x32xf32>
    %511 = vector.extract_strided_slice %502 {offsets = [0, 0], sizes = [1, 32], strides = [1, 1]} : vector<2x32xf32> to vector<1x32xf32>
    %512 = vector.broadcast %511 : vector<1x32xf32> to vector<8x32xf32>
    %513 = arith.addf %510, %512 : vector<8x32xf32>
    %cst_242 = arith.constant 0.000000e+00 : f32
    %514 = vector.broadcast %cst_242 : f32 to vector<8x32xf32>
    %515 = arith.maximumf %513, %514 : vector<8x32xf32>
    %cst_243 = arith.constant dense<0.000000e+00> : vector<8x6xf32>
    %516 = tpu.matmul %515, %508, %cst_243 {dimension_numbers = #tpu.dot_dimension_numbers<[1], [0], [0], [1], [0, 0, 1, 1], [], []>} : vector<8x32xf32>, vector<32x6xf32>, vector<8x6xf32> -> vector<8x6xf32>
    %517 = vector.broadcast %509 : vector<1x6xf32> to vector<8x6xf32>
    %518 = arith.addf %516, %517 : vector<8x6xf32>
    %c0_244 = arith.constant 0 : index
    %c0_245 = arith.constant 0 : index
    %519 = vector.load %arg25[%c0_244, %c0_245] : memref<16x6xf32, #tpu.memory_space<vmem>>, vector<8x6xf32>
    tpu.vector_store %arg25[%c0_244, %c0_245], %518 {strides = array<i32>} : memref<16x6xf32, #tpu.memory_space<vmem>>, vector<8x6xf32>,
    %520 = vector.extract_strided_slice %507 {offsets = [8, 0], sizes = [8, 32], strides = [1, 1]} : vector<16x32xf32> to vector<8x32xf32>
    %521 = vector.extract_strided_slice %502 {offsets = [1, 0], sizes = [1, 32], strides = [1, 1]} : vector<2x32xf32> to vector<1x32xf32>
    %522 = vector.broadcast %521 : vector<1x32xf32> to vector<8x32xf32>
    %523 = arith.addf %520, %522 : vector<8x32xf32>
    %cst_246 = arith.constant 0.000000e+00 : f32
    %524 = vector.broadcast %cst_246 : f32 to vector<8x32xf32>
    %525 = arith.maximumf %523, %524 : vector<8x32xf32>
    %cst_247 = arith.constant dense<0.000000e+00> : vector<8x6xf32>
    %526 = tpu.matmul %525, %508, %cst_247 {dimension_numbers = #tpu.dot_dimension_numbers<[1], [0], [0], [1], [0, 0, 1, 1], [], []>} : vector<8x32xf32>, vector<32x6xf32>, vector<8x6xf32> -> vector<8x6xf32>
    %527 = vector.broadcast %509 : vector<1x6xf32> to vector<8x6xf32>
    %528 = arith.addf %526, %527 : vector<8x6xf32>
    %c8_248 = arith.constant 8 : index
    %c0_249 = arith.constant 0 : index
    %529 = vector.load %arg25[%c8_248, %c0_249] : memref<16x6xf32, #tpu.memory_space<vmem>>, vector<8x6xf32>
    tpu.vector_store %arg25[%c8_248, %c0_249], %528 {strides = array<i32>} : memref<16x6xf32, #tpu.memory_space<vmem>>, vector<8x6xf32>,
    return
  }
}

</mosaic_0001>

<bundles_post_ra>
// kernel: model_forward.1
= control target key start
LH: loop header
LB: loop body
LE: loop exit
PB: predicated region body
PF: predicated region fallthrough
CT: control target
= control target key end

     0   :  { %s6512_s0 = inlined_call_operand.vmem [shape: f32[16,6], index: 0, kind: input, shape index: {}]   ;;  %s6513_s1 = inlined_call_operand.vmem [shape: f32[16,32], index: 1, kind: input, shape index: {}]   ;;  %s6514_s2 = inlined_call_operand.vmem [shape: f32[2,8], index: 2, kind: input, shape index: {}]   ;;  %s6515_s3 = inlined_call_operand.vmem [shape: f32[2,5], index: 3, kind: input, shape index: {}]   ;;  %s6516_s4 = inlined_call_operand.vmem [shape: f32[6,32], index: 4, kind: input, shape index: {}]   ;;  %s6517_s5 = inlined_call_operand.hbm [shape: f32[1,32], index: 5, kind: input, shape index: {}]   ;;  %s6518_s6 = inlined_call_operand.hbm [shape: f32[2,1,32], index: 6, kind: input, shape index: {}]   ;;  %s6519_s7 = inlined_call_operand.hbm [shape: f32[2,1,32], index: 7, kind: input, shape index: {}]   ;;  %s6520_s8 = inlined_call_operand.vmem [shape: f32[2,32,96], index: 8, kind: input, shape index: {}]   ;;  %s6521_s9 = inlined_call_operand.hbm [shape: f32[2,1,96], index: 9, kind: input, shape index: {}]   ;;  %s6522_s10 = inlined_call_operand.vmem [shape: f32[2,32,32], index: 10, kind: input, shape index: {}]   ;;  %s6523_s11 = inlined_call_operand.hbm [shape: f32[2,1,32], index: 11, kind: input, shape index: {}]   ;;  %s6524_s12 = inlined_call_operand.hbm [shape: f32[2,1,32], index: 12, kind: input, shape index: {}]   ;;  %s6525_s13 = inlined_call_operand.hbm [shape: f32[2,1,32], index: 13, kind: input, shape index: {}]   ;;  %s6526_s14 = inlined_call_operand.vmem [shape: f32[2,32,64], index: 14, kind: input, shape index: {}]   ;;  %s6527_s15 = inlined_call_operand.hbm [shape: f32[2,1,64], index: 15, kind: input, shape index: {}]   ;;  %s6528_s16 = inlined_call_operand.vmem [shape: f32[2,64,32], index: 16, kind: input, shape index: {}]   ;;  %s6529_s17 = inlined_call_operand.hbm [shape: f32[2,1,32], index: 17, kind: input, shape index: {}]   ;;  %s6530_s18 = inlined_call_operand.vmem [shape: f32[5,16], index: 18, kind: input, shape index: {}]   ;;  %s6531_s19 = inlined_call_operand.hbm [shape: f32[1,16], index: 19, kind: input, shape index: {}]   ;;  %s6532_s20 = inlined_call_operand.vmem [shape: f32[32,32], index: 20, kind: input, shape index: {}]   ;;  %s6533_s21 = inlined_call_operand.vmem [shape: f32[16,32], index: 21, kind: input, shape index: {}]   ;;  %s6534_s22 = inlined_call_operand.hbm [shape: f32[1,32], index: 22, kind: input, shape index: {}]   ;;  %s6535_s23 = inlined_call_operand.vmem [shape: f32[32,6], index: 23, kind: input, shape index: {}]   ;;  %s6536_s24 = inlined_call_operand.hbm [shape: f32[1,6], index: 24, kind: input, shape index: {}]   ;;  %s6537_s25 = inlined_call_operand.vmem [shape: f32[16,6], index: 25, kind: output, shape index: {}]  }
   0x1   :  { %6548 = sst [smem:[#allocation29_spill]] %s6512_s0 }
   0x2   :  { %6549 = sst [smem:[#allocation30_spill]] %s6513_s1 }
   0x3   :  { %6550 = sst [smem:[#allocation31_spill]] %s6514_s2 }
   0x4   :  { %6551 = sst [smem:[#allocation32_spill]] %s6515_s3 }
   0x5   :  { %6552 = sst [smem:[#allocation33_spill]] %s6516_s4 }
   0x6   :  { %6553 = sst [smem:[#allocation34_spill]] %s6517_s5 }
   0x7   :  { %6554 = sst [smem:[#allocation35_spill]] %s6518_s6 }
   0x8   :  { %6555 = sst [smem:[#allocation36_spill]] %s6519_s7 }
   0x9   :  { %6556 = sst [smem:[#allocation37_spill]] %s6520_s8 }
   0xa   :  { %6557 = sst [smem:[#allocation38_spill]] %s6521_s9 }
   0xb   :  { %6558 = sst [smem:[#allocation39_spill]] %s6532_s20 }
   0xc   :  { %6559 = sst [smem:[#allocation40_spill]] %s6535_s23 }
   0xd   :  { %6560 = sst [smem:[#allocation41_spill]] %s6537_s25 }
   0xe   :  { %30 = vsyncpa [#allocation4], 0 }
   0xf   :  { %31 = vsyncpa [#allocation6], 0 }
  0x10   :  { %32 = vsyncpa [#allocation9], 0 }
  0x11   :  { %33 = vsyncpa [#allocation12], 0 }
  0x12   :  { %34 = vsyncpa [#allocation15], 0 }
  0x13   :  { %35 = vsyncpa [#allocation18], 0 }
  0x14   :  { %36 = vsyncpa [#allocation21], 0  ;;  %s5535_s29 = smov [#allocation5]   ;;  %s6561_s7 = sld [smem:[#allocation35_spill]] }
  0x15   :  { %s62_s2 = sshll.u32 %s5535_s29, 4  ;;  %s63_s2 = int_to_ptr.vmem [resolvable:$true] %s62_s2 }
  0x1a   :  { %s5257_s3 = scalar_lea.hbm %s6561_s7, 32 }
  0x1b   :  { %p5258_p0 = scmp.ne.s32.totalorder %s6561_s7, %s5257_s3  ;;  %p5261_p1 = scmp.lt.u32.totalorder %s5257_s3, %s6561_s7 }
  0x1d   :  { %p5263_p2 = pnand %p5261_p1, %p5258_p0 }
  0x1f   :  { %5266 = shalt.err (!%p5263_p2)
}
  0x20   :  { %s5267_s4 = scalar_lea.vmem %s63_s2, 32  ;;  %p5272_p4 = scmp.lt.s32.totalorder %s63_s2, %s63_s2 }
  0x21   :  { %p5268_p3 = scmp.ne.s32.totalorder %s63_s2, %s5267_s4  ;;  %p5273_p5 = scmp.lt.s32.totalorder %s5267_s4, %s5267_s4 }
  0x23   :  { %p5274_p6 = por %p5273_p5, %p5272_p4 }
  0x25   :  { %p5275_p7 = pnand %p5274_p6, %p5268_p3 }
  0x27   :  { %5278 = shalt.err (!%p5275_p7)
}
  0x28   :  { %s5536_s28 = smov 16   ;;  %s5537_s9 = smov 1  }
  0x29   :  { %68 = dma.hbm_to_vmem [thread:$0]  %s6561_s7, 32, %s63_s2, [#allocation6], %s5536_s28, %s5536_s28, %s5537_s9  }
  0x2a   :  { %s5538_s29 = smov [#allocation8]   ;;  %s5539_s30 = smov [#allocation11]  }
  0x2b   :  { %s88_s6 = sshll.u32 %s5538_s29, 4  ;;  %s114_s3 = sshll.u32 %s5539_s30, 4  ;;  %s89_s6 = int_to_ptr.vmem [resolvable:$true] %s88_s6  ;;  %s115_s3 = int_to_ptr.vmem [resolvable:$true] %s114_s3 }
  0x2c   :  { %s6562_s8 = sld [smem:[#allocation38_spill]] }
  0x32   :  { %s5279_s27 = scalar_lea.hbm %s6562_s8, 32 }
  0x33   :  { %p5280_p8 = scmp.ne.s32.totalorder %s6562_s8, %s5279_s27  ;;  %p5283_p9 = scmp.lt.u32.totalorder %s5279_s27, %s6562_s8 }
  0x35   :  { %p5285_p10 = pnand %p5283_p9, %p5280_p8 }
  0x37   :  { %5288 = shalt.err (!%p5285_p10)
}
  0x38   :  { %s5289_s2 = scalar_lea.vmem %s89_s6, 32  ;;  %p5294_p12 = scmp.lt.s32.totalorder %s89_s6, %s89_s6 }
  0x39   :  { %p5290_p11 = scmp.ne.s32.totalorder %s89_s6, %s5289_s2  ;;  %p5295_p13 = scmp.lt.s32.totalorder %s5289_s2, %s5289_s2 }
  0x3b   :  { %p5296_p0 = por %p5295_p13, %p5294_p12 }
  0x3d   :  { %p5297_p1 = pnand %p5296_p0, %p5290_p11 }
  0x3f   :  { %5300 = shalt.err (!%p5297_p1)
}
  0x40   :  { %94 = dma.hbm_to_vmem [thread:$0]  %s6562_s8, 32, %s89_s6, [#allocation9], %s5536_s28, %s5536_s28, %s5537_s9  }
  0x41   :  { %s5301_s23 = scalar_lea.hbm %s6524_s12, 32 }
  0x42   :  { %p5302_p2 = scmp.ne.s32.totalorder %s6524_s12, %s5301_s23  ;;  %p5305_p3 = scmp.lt.u32.totalorder %s5301_s23, %s6524_s12 }
  0x44   :  { %p5307_p4 = pnand %p5305_p3, %p5302_p2 }
  0x46   :  { %5310 = shalt.err (!%p5307_p4)
}
  0x47   :  { %s5311_s1 = scalar_lea.vmem %s115_s3, 32  ;;  %p5316_p6 = scmp.lt.s32.totalorder %s115_s3, %s115_s3 }
  0x48   :  { %p5312_p5 = scmp.ne.s32.totalorder %s115_s3, %s5311_s1  ;;  %p5317_p7 = scmp.lt.s32.totalorder %s5311_s1, %s5311_s1 }
  0x4a   :  { %p5318_p8 = por %p5317_p7, %p5316_p6 }
  0x4c   :  { %p5319_p9 = pnand %p5318_p8, %p5312_p5 }
  0x4e   :  { %5322 = shalt.err (!%p5319_p9)
}
  0x4f   :  { %120 = dma.hbm_to_vmem [thread:$0]  %s6524_s12, 32, %s115_s3, [#allocation12], %s5536_s28, %s5536_s28, %s5537_s9  }
  0x50   :  { %s5540_s27 = smov [#allocation14]   ;;  %s5541_s2 = smov [#allocation17]  }
  0x51   :  { %s140_s4 = sshll.u32 %s5540_s27, 4  ;;  %s169_s7 = sshll.u32 %s5541_s2, 4  ;;  %s141_s4 = int_to_ptr.vmem [resolvable:$true] %s140_s4  ;;  %s170_s7 = int_to_ptr.vmem [resolvable:$true] %s169_s7 }
  0x52   :  { %s5323_s20 = scalar_lea.hbm %s6527_s15, 32 }
  0x53   :  { %p5324_p10 = scmp.ne.s32.totalorder %s6527_s15, %s5323_s20  ;;  %p5327_p11 = scmp.lt.u32.totalorder %s5323_s20, %s6527_s15 }
  0x55   :  { %p5329_p12 = pnand %p5327_p11, %p5324_p10 }
  0x57   :  { %5332 = shalt.err (!%p5329_p12)
}
  0x58   :  { %s5333_s12 = scalar_lea.vmem %s141_s4, 32  ;;  %p5338_p0 = scmp.lt.s32.totalorder %s141_s4, %s141_s4 }
  0x59   :  { %p5334_p13 = scmp.ne.s32.totalorder %s141_s4, %s5333_s12  ;;  %p5339_p1 = scmp.lt.s32.totalorder %s5333_s12, %s5333_s12 }
  0x5b   :  { %p5340_p2 = por %p5339_p1, %p5338_p0 }
  0x5d   :  { %p5341_p3 = pnand %p5340_p2, %p5334_p13 }
  0x5f   :  { %5344 = shalt.err (!%p5341_p3)
}
  0x60   :  { %146 = dma.hbm_to_vmem [thread:$0]  %s6527_s15, 32, %s141_s4, [#allocation15], %s5536_s28, %s5536_s28, %s5537_s9  }
  0x61   :  { %s5345_s8 = scalar_lea.hbm %s6531_s19, 16 }
  0x62   :  { %p5346_p4 = scmp.ne.s32.totalorder %s6531_s19, %s5345_s8  ;;  %p5349_p5 = scmp.lt.u32.totalorder %s5345_s8, %s6531_s19 }
  0x64   :  { %p5351_p6 = pnand %p5349_p5, %p5346_p4 }
  0x66   :  { %5354 = shalt.err (!%p5351_p6)
}
  0x67   :  { %s5355_s20 = scalar_lea.vmem %s170_s7, 16  ;;  %s5359_s23 = scalar_lea.vmem %s170_s7, 32 }
  0x68   :  { %p5356_p7 = scmp.ne.s32.totalorder %s170_s7, %s5355_s20  ;;  %p5360_p8 = scmp.lt.s32.totalorder %s170_s7, %s170_s7 }
  0x69   :  { %p5361_p9 = scmp.lt.s32.totalorder %s5359_s23, %s5355_s20 }
  0x6b   :  { %p5362_p10 = por %p5361_p9, %p5360_p8 }
  0x6d   :  { %p5363_p11 = pnand %p5362_p10, %p5356_p7 }
  0x6f   :  { %5366 = shalt.err (!%p5363_p11)
}
  0x70   :  { %172 = dma.hbm_to_vmem [thread:$0]  %s6531_s19, 16, %s170_s7, [#allocation18]  }
  0x71   :  { %s5542_s0 = smov [#allocation3]   ;;  %s5543_s30 = smov [#allocation7]  }
  0x72   :  { %s53_s29 = sshll.u32 %s5542_s0, 4  ;;  %s74_s12 = sshll.u32 %s5543_s30, 4  ;;  %s54_s29 = int_to_ptr.vmem [resolvable:$true] %s53_s29  ;;  %s75_s12 = int_to_ptr.vmem [resolvable:$true] %s74_s12 }
  0x73   :  { %s6563_s1 = sld [smem:[#allocation34_spill]] }
  0x79   :  { %s5367_s6 = scalar_lea.hbm %s6563_s1, 16 }
  0x7a   :  { %p5368_p12 = scmp.ne.s32.totalorder %s6563_s1, %s5367_s6  ;;  %p5371_p13 = scmp.lt.u32.totalorder %s5367_s6, %s6563_s1 }
  0x7c   :  { %p5373_p0 = pnand %p5371_p13, %p5368_p12 }
  0x7e   :  { %5376 = shalt.err (!%p5373_p0)
}
  0x7f   :  { %s5377_s19 = scalar_lea.vmem %s54_s29, 16  ;;  %s5381_s7 = scalar_lea.vmem %s54_s29, 32 }
  0x80   :  { %p5378_p1 = scmp.ne.s32.totalorder %s54_s29, %s5377_s19  ;;  %p5382_p2 = scmp.lt.s32.totalorder %s54_s29, %s54_s29 }
  0x81   :  { %p5383_p3 = scmp.lt.s32.totalorder %s5381_s7, %s5377_s19 }
  0x83   :  { %p5384_p4 = por %p5383_p3, %p5382_p2 }
  0x85   :  { %p5385_p5 = pnand %p5384_p4, %p5378_p1 }
  0x87   :  { %5388 = shalt.err (!%p5385_p5)
}
  0x88   :  { %56 = dma.hbm_to_vmem [thread:$0]  %s6563_s1, 16, %s54_s29, [#allocation4]  }
  0x89   :  { %s6564_s4 = sld [smem:[#allocation36_spill]] }
  0x8f   :  { %s5389_s0 = scalar_lea.hbm %s6564_s4, 32 }
  0x90   :  { %p5390_p6 = scmp.ne.s32.totalorder %s6564_s4, %s5389_s0  ;;  %p5393_p7 = scmp.lt.u32.totalorder %s5389_s0, %s6564_s4 }
  0x92   :  { %p5395_p8 = pnand %p5393_p7, %p5390_p6 }
  0x94   :  { %5398 = shalt.err (!%p5395_p8)
}
  0x95   :  { %s5399_s8 = scalar_lea.vmem %s75_s12, 32  ;;  %p5404_p10 = scmp.lt.s32.totalorder %s75_s12, %s75_s12 }
  0x96   :  { %p5400_p9 = scmp.ne.s32.totalorder %s75_s12, %s5399_s8  ;;  %p5405_p11 = scmp.lt.s32.totalorder %s5399_s8, %s5399_s8 }
  0x98   :  { %p5406_p12 = por %p5405_p11, %p5404_p10 }
  0x9a   :  { %p5407_p13 = pnand %p5406_p12, %p5400_p9 }
  0x9c   :  { %5410 = shalt.err (!%p5407_p13)
}
  0x9d   :  { %80 = dma.hbm_to_vmem [thread:$0]  %s6564_s4, 32, %s75_s12, [#allocation6], %s5536_s28, %s5536_s28, %s5537_s9  }
  0x9e   :  { %s5544_s27 = smov [#allocation10]   ;;  %s5545_s5 = smov [#allocation13]  }
  0x9f   :  { %s102_s2 = sshll.u32 %s5544_s27, 4  ;;  %s126_s19 = sshll.u32 %s5545_s5, 4  ;;  %s103_s2 = int_to_ptr.vmem [resolvable:$true] %s102_s2  ;;  %s127_s19 = int_to_ptr.vmem [resolvable:$true] %s126_s19 }
  0xa0   :  { %s5411_s20 = scalar_lea.hbm %s6523_s11, 32 }
  0xa1   :  { %p5412_p0 = scmp.ne.s32.totalorder %s6523_s11, %s5411_s20  ;;  %p5415_p1 = scmp.lt.u32.totalorder %s5411_s20, %s6523_s11 }
  0xa3   :  { %p5417_p2 = pnand %p5415_p1, %p5412_p0 }
  0xa5   :  { %5420 = shalt.err (!%p5417_p2)
}
  0xa6   :  { %s5421_s12 = scalar_lea.vmem %s103_s2, 32  ;;  %p5426_p4 = scmp.lt.s32.totalorder %s103_s2, %s103_s2 }
  0xa7   :  { %p5422_p3 = scmp.ne.s32.totalorder %s103_s2, %s5421_s12  ;;  %p5427_p5 = scmp.lt.s32.totalorder %s5421_s12, %s5421_s12 }
  0xa9   :  { %p5428_p6 = por %p5427_p5, %p5426_p4 }
  0xab   :  { %p5429_p7 = pnand %p5428_p6, %p5422_p3 }
  0xad   :  { %5432 = shalt.err (!%p5429_p7)
}
  0xae   :  { %108 = dma.hbm_to_vmem [thread:$0]  %s6523_s11, 32, %s103_s2, [#allocation9], %s5536_s28, %s5536_s28, %s5537_s9  }
  0xaf   :  { %s5433_s8 = scalar_lea.hbm %s6525_s13, 32 }
  0xb0   :  { %p5434_p8 = scmp.ne.s32.totalorder %s6525_s13, %s5433_s8  ;;  %p5437_p9 = scmp.lt.u32.totalorder %s5433_s8, %s6525_s13 }
  0xb2   :  { %p5439_p10 = pnand %p5437_p9, %p5434_p8 }
  0xb4   :  { %5442 = shalt.err (!%p5439_p10)
}
  0xb5   :  { %s5443_s7 = scalar_lea.vmem %s127_s19, 32  ;;  %p5448_p12 = scmp.lt.s32.totalorder %s127_s19, %s127_s19 }
  0xb6   :  { %p5444_p11 = scmp.ne.s32.totalorder %s127_s19, %s5443_s7  ;;  %p5449_p13 = scmp.lt.s32.totalorder %s5443_s7, %s5443_s7 }
  0xb8   :  { %p5450_p0 = por %p5449_p13, %p5448_p12 }
  0xba   :  { %p5451_p1 = pnand %p5450_p0, %p5444_p11 }
  0xbc   :  { %5454 = shalt.err (!%p5451_p1)
}
  0xbd   :  { %132 = dma.hbm_to_vmem [thread:$0]  %s6525_s13, 32, %s127_s19, [#allocation12], %s5536_s28, %s5536_s28, %s5537_s9  }
  0xbe   :  { %s5546_s25 = smov [#allocation16]   ;;  %s5547_s23 = smov [#allocation19]  }
  0xbf   :  { %s154_s20 = sshll.u32 %s5546_s25, 4  ;;  %s183_s15 = sshll.u32 %s5547_s23, 4  ;;  %s155_s20 = int_to_ptr.vmem [resolvable:$true] %s154_s20  ;;  %s184_s15 = int_to_ptr.vmem [resolvable:$true] %s183_s15 }
  0xc0   :  { %s5455_s12 = scalar_lea.hbm %s6529_s17, 32 }
  0xc1   :  { %p5456_p2 = scmp.ne.s32.totalorder %s6529_s17, %s5455_s12  ;;  %p5459_p3 = scmp.lt.u32.totalorder %s5455_s12, %s6529_s17 }
  0xc3   :  { %p5461_p4 = pnand %p5459_p3, %p5456_p2 }
  0xc5   :  { %5464 = shalt.err (!%p5461_p4)
}
  0xc6   :  { %s5465_s13 = scalar_lea.vmem %s155_s20, 32  ;;  %p5470_p6 = scmp.lt.s32.totalorder %s155_s20, %s155_s20 }
  0xc7   :  { %p5466_p5 = scmp.ne.s32.totalorder %s155_s20, %s5465_s13  ;;  %p5471_p7 = scmp.lt.s32.totalorder %s5465_s13, %s5465_s13 }
  0xc9   :  { %p5472_p8 = por %p5471_p7, %p5470_p6 }
  0xcb   :  { %p5473_p9 = pnand %p5472_p8, %p5466_p5 }
  0xcd   :  { %5476 = shalt.err (!%p5473_p9)
}
  0xce   :  { %160 = dma.hbm_to_vmem [thread:$0]  %s6529_s17, 32, %s155_s20, [#allocation15], %s5536_s28, %s5536_s28, %s5537_s9  }
  0xcf   :  { %s5477_s27 = scalar_lea.hbm %s6534_s22, 16 }
  0xd0   :  { %p5478_p10 = scmp.ne.s32.totalorder %s6534_s22, %s5477_s27  ;;  %p5481_p11 = scmp.lt.u32.totalorder %s5477_s27, %s6534_s22 }
  0xd2   :  { %p5483_p12 = pnand %p5481_p11, %p5478_p10 }
  0xd4   :  { %5486 = shalt.err (!%p5483_p12)
}
  0xd5   :  { %s5487_s25 = scalar_lea.vmem %s184_s15, 16  ;;  %s5491_s23 = scalar_lea.vmem %s184_s15, 32 }
  0xd6   :  { %p5488_p13 = scmp.ne.s32.totalorder %s184_s15, %s5487_s25  ;;  %p5492_p0 = scmp.lt.s32.totalorder %s184_s15, %s184_s15 }
  0xd7   :  { %p5493_p1 = scmp.lt.s32.totalorder %s5491_s23, %s5487_s25 }
  0xd9   :  { %p5494_p2 = por %p5493_p1, %p5492_p0 }
  0xdb   :  { %p5495_p3 = pnand %p5494_p2, %p5488_p13 }
  0xdd   :  { %5498 = shalt.err (!%p5495_p3)
}
  0xde   :  { %186 = dma.hbm_to_vmem [thread:$0]  %s6534_s22, 16, %s184_s15, [#allocation18]  }
  0xdf   :  { %s5548_s20 = smov [#allocation20]   ;;  %s5499_s4 = scalar_lea.hbm %s6536_s24, 16 }
  0xe0   :  { %s195_s0 = sshll.u32 %s5548_s20, 4  ;;  %p5500_p4 = scmp.ne.s32.totalorder %s6536_s24, %s5499_s4  ;;  %s196_s0 = int_to_ptr.vmem [resolvable:$true] %s195_s0 }
  0xe1   :  { %p5503_p5 = scmp.lt.u32.totalorder %s5499_s4, %s6536_s24 }
  0xe3   :  { %p5505_p6 = pnand %p5503_p5, %p5500_p4 }
  0xe5   :  { %5508 = shalt.err (!%p5505_p6)
}
  0xe6   :  { %s5509_s19 = scalar_lea.vmem %s196_s0, 16  ;;  %s5513_s22 = scalar_lea.vmem %s196_s0, 32 }
  0xe7   :  { %p5510_p7 = scmp.ne.s32.totalorder %s196_s0, %s5509_s19  ;;  %p5514_p8 = scmp.lt.s32.totalorder %s196_s0, %s196_s0 }
  0xe8   :  { %p5515_p9 = scmp.lt.s32.totalorder %s5513_s22, %s5509_s19 }
  0xea   :  { %p5516_p10 = por %p5515_p9, %p5514_p8 }
  0xec   :  { %p5517_p11 = pnand %p5516_p10, %p5510_p7 }
  0xee   :  { %5520 = shalt.err (!%p5517_p11)
}
  0xef   :  { %198 = dma.hbm_to_vmem [thread:$0]  %s6536_s24, 16, %s196_s0, [#allocation21]  }
  0xf0   :  { %5521 = dma.done.wait [#allocation4], 16  }
  0xf1   :  { %5522 = vsyncadd [#allocation4], 4294967280 }
  0xf2   :  { %5523 = dma.done.wait [#allocation6], 64  }
  0xf3   :  { %5524 = vsyncadd [#allocation6], 4294967232 }
  0xf4   :  { %5525 = dma.done.wait [#allocation9], 64  }
  0xf5   :  { %5526 = vsyncadd [#allocation9], 4294967232 }
  0xf6   :  { %5527 = dma.done.wait [#allocation12], 64  }
  0xf7   :  { %5528 = vsyncadd [#allocation12], 4294967232 }
  0xf8   :  { %5529 = dma.done.wait [#allocation15], 64  }
  0xf9   :  { %5530 = vsyncadd [#allocation15], 4294967232 }
  0xfa   :  { %5531 = dma.done.wait [#allocation18], 32  }
  0xfb   :  { %5532 = vsyncadd [#allocation18], 4294967264 }
  0xfc   :  { %5533 = dma.done.wait [#allocation21], 16  }
  0xfd   :  { %5534 = vsyncadd [#allocation21], 4294967280  ;;  %vm252_vm0 = vcmask 1045504   ;;  %vm245_vm1 = vcmask 48128   ;;  %s6565_s27 = sld [smem:[#allocation33_spill]]  ;;  %s6566_s7 = sld [smem:[#allocation29_spill]] }
  0xfe   :  { %v4472_v3 = vld [vmem:[#allocation3] ss:$0 sm:$0xff]  ;;  %s6567_s17 = sld [smem:[#allocation30_spill]]  ;;  %vm338_vm2 = vcmask 261120   ;;  %s6568_s12 = sld [smem:[#allocation37_spill]]  ;;  %v5549_v46 = vmov 0.0  }
  0xff   :  { %v4476_v37 = vld [vmem:[#allocation5] ss:$0 sm:$0xff]  ;;  %v4477_v39 = vld [vmem:[#allocation7] ss:$0 sm:$0xff]  ;;  %vm5550_vm3 = vmmov 0   ;;  %s5551_s22 = smov 88  }
 0x100   :  { %v4478_v47 = vld [vmem:[#allocation8] ss:$0 sm:$0xff]  ;;  %s5552_s15 = smov 96   ;;  %s5553_s8 = smov 120   ;;  %vm477_vm4 = vcmask 64512   ;;  %vm817_vm5 = vcmask 130112  }
 0x101   :  { %s5554_s29 = smov 112   ;;  %s5555_s1 = smov 80   ;;  %vm990_vm6 = vcmask 195712   ;;  %vm1163_vm7 = vcmask 261312   ;;  %vm2094_vm8 = vcmask 523264   ;;  %vm4048_vm9 = vcmask 1044480  }
 0x102   :  { %s5557_s24 = smov 72   ;;  %s6569_s11 = sld [smem:[#allocation31_spill]]  ;;  %vm4044_vm10 = vcmask 39936   ;;  %vm4124_vm11 = vcmask 130048  }
 0x103   :  { %v237_v0 = vld [vmem:[%s6565_s27] sm:$0x3f]  ;;  %v236_v2 = vld [vmem:[%s6566_s7 + $0x8] sm:$0xff]  ;;  %s5556_s27 = smov 104   ;;  %s5558_s2 = smov 64  }
 0x104   :  { %v235_v1 = vld [vmem:[%s6566_s7] sm:$0xff]  ;;  %4730 = vmatprep.subr.msk.mxu0 %vm252_vm0, %v237_v0  ;;  %v332_v9 = vld [vmem:[%s6567_s17 + $0x8] sm:$0xff]  ;;  %v384_v26 = vld [vmem:[%s6568_s12 + $0x10] sm:$0xff]  ;;  %s5559_s25 = smov 48   ;;  %s5560_s23 = smov 40  }
 0x105   :  { %4732 = vmatprep.mubr.msk.f32.mxu0 %vm245_vm1, %v235_v1  ;;  %4731 = vmatpush3.msk.msra.mxu0 %vm252_vm0, %v237_v0  ;;  %v331_v6 = vld [vmem:[%s6567_s17] sm:$0xff]  ;;  %v383_v25 = vld [vmem:[%s6568_s12 + $0x8] sm:$0xff]  ;;  %v385_v28 = vld [vmem:[%s6568_s12 + $0x18] sm:$0xff]  ;;  %s5561_s17 = smov 56   ;;  %s5562_s9 = smov 8  }
 0x106   :  { %4733 = vmatmul.mubr.msk.f32.vlgmr.msra.gmra.mrb[0].mxu0 %vm245_vm1, %v236_v2  ;;  %v382_v24 = vld [vmem:[%s6568_s12] sm:$0xff]  ;;  %v5048_v29 = vpack.c.bf16 %v385_v28, %v384_v26  ;;  %4746 = vmatprep.subr.mxu0 %v5549_v46  ;;  %v553_v2 = vlaneseq  ;;  %s5563_s20 = smov 24   ;;  %s6572_s30 = sld [smem:[#allocation40_spill]] }
 0x107   :  { %v5044_v27 = vpack.c.bf16 %v383_v25, %v382_v24  ;;  %4748 = vmatprep.mubr.msk.f32.mxu0 %vm5550_vm3, %v5549_v46 }
 0x109   :  { %5045 = vmatprep.subr.bf16.mxu1 %v5044_v27 }
 0x10a   :  { %5047 = vmatpush3.bf16.msra.mxu1 %v5044_v27 }
 0x10b   :  { %5049 = vmatprep.subr.bf16.mxu1 %v5048_v29 }
 0x10e   :  { %5051 = vmatpush3.bf16.msra.mxu1 %v5048_v29 }
 0x10f   :  { %4756 = vmatprep.subr.mxu1 %v5549_v46 }
 0x1d9   :  { %v4734_v4 = vpop.f32.mrb[0].mxu0 }
 0x1da   :  { %v322_v5 = vpop.f32.mrb[1].mxu0  ;;  %v328_v7 = vadd.f32 %v4734_v4, %v4472_v3 }
 0x1db   :  { %v323_v8 = vadd.f32 %v4472_v3, %v322_v5  ;;  %v5983_v3 = vshrl.u32 %v553_v2, 7  ;;  %v335_v5 = vld [vmem:[%s6569_s11] sm:$0x3] }
 0x1dc   :  { %v5882_v11 = vadd.f32 %v332_v9, %v328_v7 }
 0x1dd   :  { %v5880_v10 = vadd.f32 %v331_v6, %v323_v8  ;;  %v555_v4 = vsub.s32 0, %v5983_v3 }
 0x1de   :  { %v342_v13 = vsel %vm338_vm2, %v5882_v11, 0.0 }
 0x1df   :  { %v339_v12 = vsel %vm338_vm2, %v5880_v10, 0.0  ;;  %v5991_v6 = vrot.slane %v335_v5, %v555_v4 }
 0x1e0   :  { %340 = vadd.xlane.f32.xlu0 %v339_v12 }
 0x1e4   :  { %343 = vadd.xlane.f32.xlu0 %v342_v13 }
 0x26d   :  { %v341_v14 = vpop.xlane.xlu0 %340 }
 0x26e   :  { %v346_v15 = vmul.f32 0.03125, %v341_v14 }
 0x270   :  { %v348_v16 = vsub.f32 %v5880_v10, %v346_v15 }
 0x271   :  { %v344_v17 = vpop.xlane.xlu0 %343 }
 0x272   :  { %v347_v18 = vmul.f32 0.03125, %v344_v17  ;;  %v350_v19 = vmul.f32 %v348_v16, %v348_v16 }
 0x274   :  { %v349_v20 = vsub.f32 %v5882_v11, %v347_v18  ;;  %v352_v21 = vsel %vm338_vm2, %v350_v19, 0.0 }
 0x275   :  { %353 = vadd.xlane.f32.xlu1 %v352_v21 }
 0x276   :  { %v351_v22 = vmul.f32 %v349_v20, %v349_v20 }
 0x278   :  { %v355_v23 = vsel %vm338_vm2, %v351_v22, 0.0 }
 0x279   :  { %356 = vadd.xlane.f32.xlu1 %v355_v23  ;;  %v1245_v23 = vsub.s32 1, %v5983_v3 }
 0x27b   :  { %v6006_v29 = vrot.slane %v335_v5, %v1245_v23 }
 0x302   :  { %v354_v30 = vpop.xlane.xlu1 %353 }
 0x303   :  { %v358_v31 = vmul.f32 0.03125, %v354_v30 }
 0x305   :  { %v360_v32 = vadd.f32 1e-05, %v358_v31 }
 0x306   :  { %v357_v33 = vpop.xlane.xlu1 %356 }
 0x307   :  { %5177 = vrsqrt.f32 %v360_v32  ;;  %v359_v34 = vmul.f32 0.03125, %v357_v33 }
 0x309   :  { %v361_v35 = vadd.f32 1e-05, %v359_v34 }
 0x30b   :  { %5179 = vrsqrt.f32 %v361_v35 }
 0x311   :  { %v5178_v36 = vpop.eup %5177 }
 0x312   :  { %v364_v38 = vmul.f32 %v5178_v36, %v348_v16 }
 0x314   :  { %v372_v40 = vmul.f32 %v4476_v37, %v364_v38 }
 0x315   :  { %v5180_v41 = vpop.eup %5179 }
 0x316   :  { %v365_v42 = vmul.f32 %v5180_v41, %v349_v20  ;;  %v380_v43 = vadd.f32 %v4477_v39, %v372_v40 }
 0x318   :  { %v373_v44 = vmul.f32 %v4476_v37, %v365_v42  ;;  %4743 = vmatprep.mubr.msk.f32.mxu1 %vm338_vm2, %v380_v43 }
 0x31a   :  { %v381_v45 = vadd.f32 %v4477_v39, %v373_v44 }
 0x31c   :  { %4744 = vmatmul.mubr.msk.f32.vlgmr.msra.gmra.mrb[0].mxu1 %vm338_vm2, %v381_v45 }
 0x31d   :  { %4758 = vmatprep.mubr.msk.f32.mxu1 %vm5550_vm3, %v5549_v46 }
 0x3ef   :  { %v4745_v48 = vpop.f32.mrb[0].mxu1 }
 0x3f0   :  { %v465_v49 = vpop.f32.mrb[1].mxu1  ;;  %v5926_v51 = vadd.f32 %v4745_v48, %v4478_v47 }
 0x3f1   :  { %v5912_v50 = vadd.f32 %v4478_v47, %v465_v49 }
 0x3f3   :  { %648 = vrot.lane.b32.xlu1 %v5912_v50, %s5551_s22  ;;  %475 = vrot.lane.b32.xlu0 %v5912_v50, %s5552_s15 }
 0x3f7   :  { %646 = vrot.lane.b32.xlu1 %v5912_v50, %s5553_s8  ;;  %819 = vrot.lane.b32.xlu0 %v5912_v50, %s5554_s29 }
 0x3fb   :  { %821 = vrot.lane.b32.xlu1 %v5912_v50, %s5555_s1  ;;  %992 = vrot.lane.b32.xlu0 %v5912_v50, %s5556_s27 }
 0x3ff   :  { %994 = vrot.lane.b32.xlu1 %v5912_v50, %s5557_s24  ;;  %1338 = vrot.lane.b32.xlu0 %v5926_v51, %s5551_s22 }
 0x403   :  { %1166 = vrot.lane.b32.xlu1 %v5926_v51, %s5552_s15  ;;  %1510 = vrot.lane.b32.xlu0 %v5926_v51, %s5555_s1 }
 0x407   :  { %1336 = vrot.lane.b32.xlu1 %v5926_v51, %s5553_s8  ;;  %1682 = vrot.lane.b32.xlu0 %v5926_v51, %s5557_s24 }
 0x40b   :  { %1508 = vrot.lane.b32.xlu1 %v5926_v51, %s5554_s29 }
 0x40f   :  { %1680 = vrot.lane.b32.xlu1 %v5926_v51, %s5556_s27 }
 0x465   :  { %v649_v52 = vpop.permute.xlu1 %648  ;;  %v476_v53 = vpop.permute.xlu0 %475 }
 0x466   :  { %4747 = vmatpush3.xpose.msk.msra.mxu0 %vm477_vm4, %v476_v53  ;;  %4757 = vmatpush3.xpose.msk.msra.mxu1 %vm477_vm4, %v649_v52 }
 0x467   :  { %4766 = vmatprep.subr.mxu1 %v5549_v46  ;;  %4751 = vmatprep.subr.mxu0 %v5549_v46 }
 0x469   :  { %v647_v54 = vpop.permute.xlu1 %646  ;;  %4749 = vmatmul.mubr.msk.f32.vlgmr.msra.gmra.mrb[2].mxu0 %vm477_vm4, %v5912_v50  ;;  %v820_v55 = vpop.permute.xlu0 %819 }
 0x46a   :  { %4759 = vmatmul.mubr.msk.f32.vlgmr.msra.gmra.mrb[2].mxu1 %vm477_vm4, %v647_v54  ;;  %4753 = vmatprep.mubr.msk.f32.mxu0 %vm5550_vm3, %v5549_v46 }
 0x46b   :  { %4768 = vmatprep.mubr.msk.f32.mxu1 %vm5550_vm3, %v5549_v46 }
 0x46d   :  { %v822_v56 = vpop.permute.xlu1 %821  ;;  %v993_v57 = vpop.permute.xlu0 %992 }
 0x46e   :  { %4767 = vmatpush3.xpose.msk.msra.mxu1 %vm477_vm4, %v822_v56 }
 0x46f   :  { %4776 = vmatprep.subr.mxu1 %v5549_v46 }
 0x471   :  { %v995_v58 = vpop.permute.xlu1 %994  ;;  %4769 = vmatmul.mubr.msk.f32.vlgmr.msra.gmra.mrb[4].mxu1 %vm477_vm4, %v820_v55  ;;  %v1339_v59 = vpop.permute.xlu0 %1338 }
 0x472   :  { %4777 = vmatpush3.xpose.msk.msra.mxu1 %vm477_vm4, %v995_v58  ;;  %4778 = vmatprep.mubr.msk.f32.mxu1 %vm5550_vm3, %v5549_v46 }
 0x473   :  { %4786 = vmatprep.subr.mxu1 %v5549_v46 }
 0x475   :  { %v1167_v60 = vpop.permute.xlu1 %1166  ;;  %4779 = vmatmul.mubr.msk.f32.vlgmr.msra.gmra.mrb[6].mxu1 %vm477_vm4, %v993_v57  ;;  %v1511_v62 = vpop.permute.xlu0 %1510 }
 0x476   :  { %4787 = vmatpush3.xpose.msk.msra.mxu1 %vm477_vm4, %v1167_v60  ;;  %4788 = vmatprep.mubr.msk.f32.mxu1 %vm5550_vm3, %v5549_v46 }
 0x477   :  { %4796 = vmatprep.subr.mxu1 %v5549_v46 }
 0x479   :  { %v1337_v61 = vpop.permute.xlu1 %1336  ;;  %4789 = vmatmul.mubr.msk.f32.vlgmr.msra.gmra.mrb[8].mxu1 %vm477_vm4, %v5926_v51  ;;  %v1683_v0 = vpop.permute.xlu0 %1682 }
 0x47a   :  { %4797 = vmatpush3.xpose.msk.msra.mxu1 %vm477_vm4, %v1339_v59  ;;  %4798 = vmatprep.mubr.msk.f32.mxu1 %vm5550_vm3, %v5549_v46 }
 0x47b   :  { %4806 = vmatprep.subr.mxu1 %v5549_v46 }
 0x47d   :  { %4799 = vmatmul.mubr.msk.f32.vlgmr.msra.gmra.mrb[10].mxu1 %vm477_vm4, %v1337_v61  ;;  %v1509_v63 = vpop.permute.xlu1 %1508 }
 0x47e   :  { %4807 = vmatpush3.xpose.msk.msra.mxu1 %vm477_vm4, %v1511_v62  ;;  %4808 = vmatprep.mubr.msk.f32.mxu1 %vm5550_vm3, %v5549_v46 }
 0x47f   :  { %4816 = vmatprep.subr.mxu1 %v5549_v46 }
 0x481   :  { %4809 = vmatmul.mubr.msk.f32.vlgmr.msra.gmra.mrb[12].mxu1 %vm477_vm4, %v1509_v63  ;;  %v1681_v1 = vpop.permute.xlu1 %1680 }
 0x482   :  { %4817 = vmatpush3.xpose.msk.msra.mxu1 %vm477_vm4, %v1683_v0  ;;  %4818 = vmatprep.mubr.msk.f32.mxu1 %vm5550_vm3, %v5549_v46 }
 0x485   :  { %4819 = vmatmul.mubr.msk.f32.vlgmr.msra.gmra.mrb[14].mxu1 %vm477_vm4, %v1681_v1 }
 0x53c   :  { %v548_v7 = vpop.f32.mrb[2].mxu0 }
 0x53d   :  { %v552_v8 = vmul.f32 0.35355338, %v548_v7  ;;  %v4750_v9 = vpop.f32.mrb[3].mxu0  ;;  %v720_v12 = vpop.f32.mrb[2].mxu1 }
 0x53e   :  { %v724_v13 = vmul.f32 0.35355338, %v720_v12  ;;  %v4760_v14 = vpop.f32.mrb[3].mxu1 }
 0x53f   :  { %v557_v15 = vadd.f32 %v5991_v6, %v552_v8 }
 0x540   :  { %v725_v16 = vadd.f32 %v724_v13, %v5991_v6 }
 0x541   :  { %v558_v17 = vsel %vm477_vm4, %v557_v15, -inf }
 0x542   :  { %559 = vmax.xlane.f32.xlu0 %v558_v17  ;;  %v726_v18 = vsel %vm477_vm4, %v725_v16, -inf }
 0x543   :  { %727 = vmax.xlane.f32.xlu1 %v726_v18 }
 0x544   :  { %v893_v19 = vpop.f32.mrb[4].mxu1 }
 0x545   :  { %v897_v20 = vmul.f32 0.35355338, %v893_v19  ;;  %v4770_v21 = vpop.f32.mrb[5].mxu1 }
 0x547   :  { %v5998_v22 = vadd.f32 %v897_v20, %v5991_v6 }
 0x548   :  { %v1066_v24 = vpop.f32.mrb[6].mxu1 }
 0x549   :  { %v1070_v25 = vmul.f32 0.35355338, %v1066_v24  ;;  %v4780_v26 = vpop.f32.mrb[7].mxu1  ;;  %v899_v27 = vsel %vm477_vm4, %v5998_v22, -inf }
 0x54a   :  { %900 = vmax.xlane.f32.xlu0 %v899_v27 }
 0x54b   :  { %v1071_v28 = vadd.f32 %v1070_v25, %v5991_v6 }
 0x54c   :  { %v1238_v30 = vpop.f32.mrb[8].mxu1 }
 0x54d   :  { %v1242_v31 = vmul.f32 0.35355338, %v1238_v30  ;;  %v4790_v32 = vpop.f32.mrb[9].mxu1  ;;  %v1072_v33 = vsel %vm477_vm4, %v1071_v28, -inf }
 0x54e   :  { %1073 = vmax.xlane.f32.xlu0 %v1072_v33 }
 0x54f   :  { %v6010_v34 = vadd.f32 %v6006_v29, %v1242_v31 }
 0x550   :  { %v1410_v35 = vpop.f32.mrb[10].mxu1 }
 0x551   :  { %v1414_v36 = vmul.f32 0.35355338, %v1410_v35  ;;  %v4800_v37 = vpop.f32.mrb[11].mxu1  ;;  %v1248_v38 = vsel %vm477_vm4, %v6010_v34, -inf }
 0x552   :  { %1249 = vmax.xlane.f32.xlu0 %v1248_v38 }
 0x553   :  { %v1415_v39 = vadd.f32 %v1414_v36, %v6006_v29 }
 0x554   :  { %v1582_v40 = vpop.f32.mrb[12].mxu1 }
 0x555   :  { %v1586_v41 = vmul.f32 0.35355338, %v1582_v40  ;;  %v4810_v42 = vpop.f32.mrb[13].mxu1  ;;  %v1416_v43 = vsel %vm477_vm4, %v1415_v39, -inf }
 0x556   :  { %1417 = vmax.xlane.f32.xlu1 %v1416_v43 }
 0x557   :  { %v1587_v44 = vadd.f32 %v1586_v41, %v6006_v29 }
 0x558   :  { %v1754_v45 = vpop.f32.mrb[14].mxu1 }
 0x559   :  { %v4820_v47 = vpop.f32.mrb[15].mxu1  ;;  %v1588_v48 = vsel %vm477_vm4, %v1587_v44, -inf  ;;  %v1758_v49 = vmul.f32 0.35355338, %v1754_v45 }
 0x55a   :  { %1589 = vmax.xlane.f32.xlu0 %v1588_v48 }
 0x55b   :  { %v1759_v52 = vadd.f32 %v1758_v49, %v6006_v29 }
 0x55d   :  { %v1760_v53 = vsel %vm477_vm4, %v1759_v52, -inf }
 0x567   :  { %569 = vrot.lane.b32.xlu1 %v5912_v50, %s5558_s2 }
 0x58b   :  { %1761 = vmax.xlane.f32.xlu1 %v1760_v53 }
 0x59c   :  { %910 = vrot.lane.b32.xlu1 %v5912_v50, %s5559_s25 }
 0x5a0   :  { %1083 = vrot.lane.b32.xlu1 %v5912_v50, %s5560_s23 }
 0x5a4   :  { %1259 = vrot.lane.b32.xlu1 %v5926_v51, %s5558_s2 }
 0x5cf   :  { %v560_v54 = vpop.xlane.xlu0 %559 }
 0x5d0   :  { %v561_v55 = vsub.f32 %v557_v15, %v560_v54  ;;  %v728_v56 = vpop.xlane.xlu1 %727 }
 0x5d1   :  { %v729_v57 = vsub.f32 %v725_v16, %v728_v56 }
 0x5d2   :  { %v562_v58 = vmul.f32 1.442695, %v561_v55 }
 0x5d3   :  { %v730_v59 = vmul.f32 1.442695, %v729_v57 }
 0x5d4   :  { %5181 = vpow2.f32 %v562_v58 }
 0x5d5   :  { %5183 = vpow2.f32 %v730_v59 }
 0x5d7   :  { %v901_v60 = vpop.xlane.xlu0 %900 }
 0x5d8   :  { %v902_v13 = vsub.f32 %v5998_v22, %v901_v60 }
 0x5da   :  { %v903_v15 = vmul.f32 1.442695, %v902_v13 }
 0x5db   :  { %v1074_v61 = vpop.xlane.xlu0 %1073 }
 0x5dc   :  { %v1075_v62 = vsub.f32 %v1071_v28, %v1074_v61 }
 0x5de   :  { %v5182_v63 = vpop.eup %5181  ;;  %v1076_v0 = vmul.f32 1.442695, %v1075_v62 }
 0x5df   :  { %v6028_v1 = vpop.eup %5183  ;;  %v564_v2 = vsel %vm477_vm4, %v5182_v63, 0.0  ;;  %v1250_v14 = vpop.xlane.xlu0 %1249 }
 0x5e0   :  { %5185 = vpow2.f32 %v1076_v0  ;;  %565 = vadd.xlane.f32.xlu0 %v564_v2  ;;  %v732_v5 = vsel %vm477_vm4, %v6028_v1, 0.0  ;;  %v1251_v16 = vsub.f32 %v6010_v34, %v1250_v14 }
 0x5e1   :  { %733 = vadd.xlane.f32.xlu1 %v732_v5  ;;  %5187 = vpow2.f32 %v903_v15 }
 0x5e2   :  { %v1252_v18 = vmul.f32 1.442695, %v1251_v16 }
 0x5e3   :  { %v1418_v7 = vpop.xlane.xlu1 %1417 }
 0x5e4   :  { %5189 = vpow2.f32 %v1252_v18  ;;  %v1419_v20 = vsub.f32 %v1415_v39, %v1418_v7 }
 0x5e6   :  { %v1420_v24 = vmul.f32 1.442695, %v1419_v20  ;;  %v1855_v20 = vld [vmem:[%s6522_s10 + $0x8] sm:$0xff] }
 0x5e7   :  { %v570_v8 = vpop.permute.xlu1 %569  ;;  %v1590_v17 = vpop.xlane.xlu0 %1589 }
 0x5e8   :  { %4752 = vmatpush3.msra.mxu0 %v570_v8  ;;  %v1591_v19 = vsub.f32 %v1587_v44, %v1590_v17 }
 0x5e9   :  { %4761 = vmatprep.subr.mxu0 %v5549_v46 }
 0x5ea   :  { %v6034_v9 = vpop.eup %5185  ;;  %v1592_v21 = vmul.f32 1.442695, %v1591_v19  ;;  %v1854_v19 = vld [vmem:[%s6522_s10] sm:$0xff] }
 0x5eb   :  { %v1078_v12 = vsel %vm477_vm4, %v6034_v9, 0.0  ;;  %v5188_v25 = vpop.eup %5187 }
 0x5ec   :  { %1079 = vadd.xlane.f32.xlu1 %v1078_v12  ;;  %5191 = vpow2.f32 %v1592_v21  ;;  %v5052_v21 = vpack.c.bf16 %v1855_v20, %v1854_v19 }
 0x5ed   :  { %5193 = vpow2.f32 %v1420_v24 }
 0x5ee   :  { %v5190_v26 = vpop.eup %5189  ;;  %5053 = vmatprep.subr.bf16.mxu1 %v5052_v21 }
 0x5ef   :  { %v1254_v27 = vsel %vm477_vm4, %v5190_v26, 0.0  ;;  %5055 = vmatpush3.bf16.msra.mxu1 %v5052_v21 }
 0x5f6   :  { %737 = vrot.lane.b32.xlu0 %v5912_v50, %s5561_s17  ;;  %v905_v50 = vsel %vm477_vm4, %v5188_v25, 0.0  ;;  %v6046_v28 = vpop.eup %5191 }
 0x5f7   :  { %v1594_v32 = vsel %vm477_vm4, %v6046_v28, 0.0  ;;  %v5194_v33 = vpop.eup %5193 }
 0x5f8   :  { %v1422_v34 = vsel %vm477_vm4, %v5194_v33, 0.0 }
 0x5fd   :  { %1427 = vrot.lane.b32.xlu1 %v5926_v51, %s5561_s17 }
 0x615   :  { %906 = vadd.xlane.f32.xlu0 %v905_v50  ;;  %v1857_v50 = vld [vmem:[%s6522_s10 + $0x18] sm:$0xff] }
 0x618   :  { %v1762_v22 = vpop.xlane.xlu1 %1761 }
 0x619   :  { %v1763_v30 = vsub.f32 %v1759_v52, %v1762_v22  ;;  %1255 = vadd.xlane.f32.xlu0 %v1254_v27 }
 0x61b   :  { %v1764_v31 = vmul.f32 1.442695, %v1763_v30 }
 0x61c   :  { %v911_v37 = vpop.permute.xlu1 %910 }
 0x61d   :  { %5195 = vpow2.f32 %v1764_v31  ;;  %1595 = vadd.xlane.f32.xlu0 %v1594_v32 }
 0x620   :  { %v1084_v38 = vpop.permute.xlu1 %1083 }
 0x621   :  { %1423 = vadd.xlane.f32.xlu1 %v1422_v34 }
 0x624   :  { %v1260_v39 = vpop.permute.xlu1 %1259 }
 0x627   :  { %v6051_v35 = vpop.eup %5195 }
 0x628   :  { %v1766_v36 = vsel %vm477_vm4, %v6051_v35, 0.0 }
 0x629   :  { %1767 = vadd.xlane.f32.xlu0 %v1766_v36 }
 0x632   :  { %1771 = vrot.lane.b32.xlu1 %v5926_v51, %s5560_s23 }
 0x63f   :  { %1599 = vrot.lane.b32.xlu0 %v5926_v51, %s5559_s25 }
 0x66d   :  { %v566_v40 = vpop.xlane.xlu0 %565 }
 0x66e   :  { %5197 = vrcp.f32 %v566_v40  ;;  %v734_v41 = vpop.xlane.xlu1 %733 }
 0x66f   :  { %5199 = vrcp.f32 %v734_v41 }
 0x671   :  { %v738_v45 = vpop.permute.xlu0 %737 }
 0x678   :  { %v5198_v42 = vpop.eup %5197 }
 0x679   :  { %v568_v43 = vmul.f32 %v5198_v42, %v5182_v63  ;;  %v5200_v44 = vpop.eup %5199  ;;  %v1080_v51 = vpop.xlane.xlu1 %1079  ;;  %v4505_v42 = vld [vmem:[#allocation10] ss:$0 sm:$0xff] }
 0x67a   :  { %v736_v47 = vmul.f32 %v5200_v44, %v6028_v1 }
 0x67b   :  { %4754 = vmatmul.mubr.msk.f32.vlgmr.msra.gmra.mrb[4].mxu0 %vm477_vm4, %v568_v43 }
 0x67c   :  { %4762 = vmatpush3.msra.mxu0 %v738_v45  ;;  %4763 = vmatprep.mubr.msk.f32.mxu0 %vm5550_vm3, %v5549_v46 }
 0x67d   :  { %4771 = vmatprep.subr.mxu0 %v5549_v46  ;;  %v1428_v52 = vpop.permute.xlu1 %1427 }
 0x67f   :  { %4764 = vmatmul.mubr.msk.f32.vlgmr.msra.gmra.mrb[6].mxu0 %vm477_vm4, %v736_v47 }
 0x680   :  { %4772 = vmatpush3.msra.mxu0 %v911_v37  ;;  %4773 = vmatprep.mubr.msk.f32.mxu0 %vm5550_vm3, %v5549_v46 }
 0x681   :  { %4781 = vmatprep.subr.mxu0 %v5549_v46 }
 0x6a2   :  { %v907_v48 = vpop.xlane.xlu0 %906 }
 0x6a3   :  { %5201 = vrcp.f32 %v907_v48 }
 0x6a4   :  { %5203 = vrcp.f32 %v1080_v51 }
 0x6a6   :  { %v1256_v49 = vpop.xlane.xlu0 %1255 }
 0x6a7   :  { %5205 = vrcp.f32 %v1256_v49 }
 0x6aa   :  { %v1596_v55 = vpop.xlane.xlu0 %1595 }
 0x6ad   :  { %v5202_v53 = vpop.eup %5201 }
 0x6ae   :  { %v909_v54 = vmul.f32 %v5202_v53, %v5188_v25  ;;  %v1424_v56 = vpop.xlane.xlu1 %1423  ;;  %v5204_v57 = vpop.eup %5203  ;;  %v1856_v25 = vld [vmem:[%s6522_s10 + $0x10] sm:$0xff] }
 0x6af   :  { %5207 = vrcp.f32 %v1424_v56  ;;  %v1082_v58 = vmul.f32 %v5204_v57, %v6034_v9  ;;  %v5056_v22 = vpack.c.bf16 %v1857_v50, %v1856_v25  ;;  %v4508_v50 = vld [vmem:[#allocation11] ss:$0 sm:$0xff] }
 0x6b0   :  { %4774 = vmatmul.mubr.msk.f32.vlgmr.msra.gmra.mrb[8].mxu0 %vm477_vm4, %v909_v54  ;;  %5209 = vrcp.f32 %v1596_v55 }
 0x6b1   :  { %4782 = vmatpush3.msra.mxu0 %v1084_v38  ;;  %4783 = vmatprep.mubr.msk.f32.mxu0 %vm5550_vm3, %v5549_v46  ;;  %v5206_v59 = vpop.eup %5205 }
 0x6b2   :  { %4791 = vmatprep.subr.mxu0 %v5549_v46  ;;  %v1258_v60 = vmul.f32 %v5206_v59, %v5190_v26  ;;  %v1772_v5 = vpop.permute.xlu1 %1771  ;;  %5057 = vmatprep.subr.bf16.mxu1 %v5056_v22 }
 0x6b3   :  { %5059 = vmatpush3.bf16.msra.mxu1 %v5056_v22  ;;  %v4509_v22 = vld [vmem:[#allocation13] ss:$0 sm:$0xff] }
 0x6b4   :  { %4784 = vmatmul.mubr.msk.f32.vlgmr.msra.gmra.mrb[10].mxu0 %vm477_vm4, %v1082_v58 }
 0x6b5   :  { %4792 = vmatpush3.msra.mxu0 %v1260_v39  ;;  %4793 = vmatprep.mubr.msk.f32.mxu0 %vm5550_vm3, %v5549_v46 }
 0x6b6   :  { %v1768_v61 = vpop.xlane.xlu0 %1767  ;;  %4801 = vmatprep.subr.mxu0 %v5549_v46 }
 0x6b7   :  { %5211 = vrcp.f32 %v1768_v61  ;;  %v1992_v61 = vld [vmem:[%s6526_s14] sm:$0xff] }
 0x6b8   :  { %4794 = vmatmul.mubr.msk.f32.vlgmr.msra.gmra.mrb[12].mxu0 %vm477_vm4, %v1258_v60 }
 0x6b9   :  { %v5208_v62 = vpop.eup %5207  ;;  %4802 = vmatpush3.msra.mxu0 %v1428_v52  ;;  %4803 = vmatprep.mubr.msk.f32.mxu0 %vm5550_vm3, %v5549_v46 }
 0x6ba   :  { %v1426_v63 = vmul.f32 %v5208_v62, %v5194_v33  ;;  %v1600_v0 = vpop.permute.xlu0 %1599  ;;  %4811 = vmatprep.subr.mxu0 %v5549_v46  ;;  %v5210_v1 = vpop.eup %5209  ;;  %v1993_v62 = vld [vmem:[%s6526_s14 + $0x8] sm:$0xff] }
 0x6bb   :  { %v1598_v2 = vmul.f32 %v5210_v1, %v6046_v28  ;;  %v1995_v1 = vld [vmem:[%s6526_s14 + $0x18] sm:$0xff] }
 0x6bc   :  { %4804 = vmatmul.mubr.msk.f32.vlgmr.msra.gmra.mrb[14].mxu0 %vm477_vm4, %v1426_v63  ;;  %v5060_v63 = vpack.c.bf16 %v1993_v62, %v1992_v61 }
 0x6bd   :  { %4812 = vmatpush3.msra.mxu0 %v1600_v0  ;;  %4813 = vmatprep.mubr.msk.f32.mxu0 %vm5550_vm3, %v5549_v46  ;;  %v1994_v0 = vld [vmem:[%s6526_s14 + $0x10] sm:$0xff] }
 0x6be   :  { %4821 = vmatprep.subr.mxu0 %v5549_v46 }
 0x6c0   :  { %4814 = vmatmul.mubr.msk.f32.vlgmr.msra.gmra.mrb[16].mxu0 %vm477_vm4, %v1598_v2  ;;  %v5064_v2 = vpack.c.bf16 %v1995_v1, %v1994_v0  ;;  %v4519_v0 = vld [vmem:[%s6568_s12 + $0x28] sm:$0xff] }
 0x6c1   :  { %v5212_v7 = vpop.eup %5211  ;;  %4822 = vmatpush3.msra.mxu0 %v1772_v5  ;;  %4823 = vmatprep.mubr.msk.f32.mxu0 %vm5550_vm3, %v5549_v46  ;;  %v2086_v5 = vld [vmem:[%s6528_s16] sm:$0xff] }
 0x6c2   :  { %v1770_v8 = vmul.f32 %v5212_v7, %v6051_v35  ;;  %5061 = vmatprep.subr.bf16.mxu0 %v5060_v63  ;;  %v2087_v7 = vld [vmem:[%s6528_s16 + $0x8] sm:$0xff] }
 0x6c4   :  { %4824 = vmatmul.mubr.msk.f32.vlgmr.msra.gmra.mrb[18].mxu0 %vm477_vm4, %v1770_v8  ;;  %v2088_v8 = vld [vmem:[%s6528_s16 + $0x10] sm:$0xff] }
 0x6c5   :  { %5063 = vmatpush3.bf16.msra.mxu0 %v5060_v63  ;;  %v4518_v63 = vld [vmem:[%s6568_s12 + $0x20] sm:$0xff] }
 0x6c6   :  { %5065 = vmatprep.subr.bf16.mxu0 %v5064_v2  ;;  %v5084_v1 = vpack.c.bf16 %v4519_v0, %v4518_v63 }
 0x6c9   :  { %5067 = vmatpush3.bf16.msra.mxu0 %v5064_v2  ;;  %v4520_v2 = vld [vmem:[%s6568_s12 + $0x30] sm:$0xff] }
 0x6ca   :  { %5085 = vmatprep.subr.bf16.mxu0 %v5084_v1 }
 0x74e   :  { %v641_v9 = vpop.f32.mrb[4].mxu0 }
 0x74f   :  { %645 = vst.msk [vmem:[#allocation2] sm:$0xff] %vm477_vm4, %v641_v9  ;;  %v4755_v12 = vpop.f32.mrb[5].mxu0  ;;  %v5068_v9 = vpack.c.bf16 %v2087_v7, %v2086_v5  ;;  %v4521_v5 = vld [vmem:[%s6568_s12 + $0x38] sm:$0xff] }
 0x750   :  { %v2089_v12 = vld [vmem:[%s6528_s16 + $0x18] sm:$0xff]  ;;  %v5088_v7 = vpack.c.bf16 %v4521_v5, %v4520_v2 }
 0x751   :  { %5069 = vmatprep.subr.bf16.mxu1 %v5068_v9 }
 0x752   :  { %v809_v13 = vpop.f32.mrb[6].mxu0 }
 0x753   :  { %814 = vrot.lane.b32.xlu0 %v809_v13, %s5562_s9  ;;  %v4765_v14 = vpop.f32.mrb[7].mxu0  ;;  %v5072_v13 = vpack.c.bf16 %v2089_v12, %v2088_v8 }
 0x754   :  { %v2090_v14 = vld [vmem:[%s6528_s16 + $0x20] sm:$0xff] }
 0x783   :  { %v982_v15 = vpop.f32.mrb[8].mxu0 }
 0x784   :  { %987 = vrot.lane.b32.xlu1 %v982_v15, %s5536_s28  ;;  %v4775_v16 = vpop.f32.mrb[9].mxu0  ;;  %v2091_v15 = vld [vmem:[%s6528_s16 + $0x28] sm:$0xff] }
 0x785   :  { %v5076_v16 = vpack.c.bf16 %v2091_v15, %v2090_v14 }
 0x787   :  { %v1155_v17 = vpop.f32.mrb[10].mxu0 }
 0x788   :  { %1160 = vrot.lane.b32.xlu1 %v1155_v17, %s5563_s20  ;;  %v4785_v18 = vpop.f32.mrb[11].mxu0 }
 0x78b   :  { %v1331_v24 = vpop.f32.mrb[12].mxu0 }
 0x78c   :  { %1335 = vst.msk [vmem:[#allocation2 + $0x8] sm:$0xff] %vm477_vm4, %v1331_v24  ;;  %v4795_v26 = vpop.f32.mrb[13].mxu0 }
 0x78f   :  { %v1499_v27 = vpop.f32.mrb[14].mxu0 }
 0x790   :  { %1504 = vrot.lane.b32.xlu0 %v1499_v27, %s5562_s9  ;;  %v4805_v28 = vpop.f32.mrb[15].mxu0 }
 0x793   :  { %v1671_v30 = vpop.f32.mrb[16].mxu0 }
 0x794   :  { %1676 = vrot.lane.b32.xlu0 %v1671_v30, %s5536_s28  ;;  %v4815_v31 = vpop.f32.mrb[17].mxu0 }
 0x797   :  { %v1843_v32 = vpop.f32.mrb[18].mxu0 }
 0x798   :  { %1848 = vrot.lane.b32.xlu1 %v1843_v32, %s5563_s20  ;;  %v4825_v33 = vpop.f32.mrb[19].mxu0 }
 0x7c5   :  { %v815_v34 = vpop.permute.xlu0 %814 }
 0x7c6   :  { %818 = vst.msk [vmem:[#allocation2] sm:$0xff] %vm817_vm5, %v815_v34  ;;  %v2092_v34 = vld [vmem:[%s6528_s16 + $0x30] sm:$0xff] }
 0x7f6   :  { %v988_v35 = vpop.permute.xlu1 %987 }
 0x7f7   :  { %991 = vst.msk [vmem:[#allocation2] sm:$0xff] %vm990_vm6, %v988_v35  ;;  %v2093_v35 = vld [vmem:[%s6528_s16 + $0x38] sm:$0xff] }
 0x7fa   :  { %v1161_v36 = vpop.permute.xlu1 %1160 }
 0x7fb   :  { %1164 = vst.msk [vmem:[#allocation2] sm:$0xff] %vm1163_vm7, %v1161_v36  ;;  %v5080_v36 = vpack.c.bf16 %v2093_v35, %v2092_v34 }
 0x802   :  { %v1505_v37 = vpop.permute.xlu0 %1504  ;;  %v1852_v38 = vld [vmem:[#allocation2] sm:$0xff] }
 0x803   :  { %1507 = vst.msk [vmem:[#allocation2 + $0x8] sm:$0xff] %vm817_vm5, %v1505_v37  ;;  %4834 = vmatprep.mubr.msk.f32.mxu1 %vm338_vm2, %v1852_v38  ;;  %v4510_v37 = vld [vmem:[#allocation14] ss:$0 sm:$0xff] }
 0x806   :  { %v1677_v39 = vpop.permute.xlu0 %1676 }
 0x807   :  { %1679 = vst.msk [vmem:[#allocation2 + $0x8] sm:$0xff] %vm990_vm6, %v1677_v39 }
 0x80a   :  { %v1849_v40 = vpop.permute.xlu1 %1848 }
 0x80b   :  { %1851 = vst.msk [vmem:[#allocation2 + $0x8] sm:$0xff] %vm1163_vm7, %v1849_v40 }
 0x812   :  { %v1853_v41 = vld [vmem:[#allocation2 + $0x8] sm:$0xff] }
 0x813   :  { %4835 = vmatmul.mubr.msk.f32.vlgmr.msra.gmra.mrb[16].mxu1 %vm338_vm2, %v1853_v41 }
 0x814   :  { %5071 = vmatpush3.bf16.msra.mxu1 %v5068_v9 }
 0x815   :  { %5073 = vmatprep.subr.bf16.mxu1 %v5072_v13 }
 0x818   :  { %5075 = vmatpush3.bf16.msra.mxu1 %v5072_v13 }
 0x819   :  { %5077 = vmatprep.subr.bf16.mxu1 %v5076_v16 }
 0x81c   :  { %5079 = vmatpush3.bf16.msra.mxu1 %v5076_v16 }
 0x81d   :  { %5081 = vmatprep.subr.bf16.mxu1 %v5080_v36 }
 0x820   :  { %5083 = vmatpush3.bf16.msra.mxu1 %v5080_v36 }
 0x821   :  { %4888 = vmatprep.subr.mxu1 %v5549_v46 }
 0x8e6   :  { %v4836_v43 = vpop.f32.mrb[16].mxu1 }
 0x8e7   :  { %v1943_v44 = vadd.f32 %v4836_v43, %v4505_v42  ;;  %v1937_v45 = vpop.f32.mrb[17].mxu1 }
 0x8e8   :  { %v1938_v47 = vadd.f32 %v4505_v42, %v1937_v45  ;;  %v4515_v45 = vld [vmem:[#allocation16] ss:$0 sm:$0xff] }
 0x8e9   :  { %v6120_v51 = vadd.f32 %v1943_v44, %v5882_v11 }
 0x8ea   :  { %v6123_v48 = vadd.f32 %v1938_v47, %v5880_v10 }
 0x8eb   :  { %v1953_v49 = vsel %vm338_vm2, %v6120_v51, 0.0 }
 0x8ec   :  { %1954 = vadd.xlane.f32.xlu1 %v1953_v49  ;;  %v1950_v52 = vsel %vm338_vm2, %v6123_v48, 0.0 }
 0x8ed   :  { %1951 = vadd.xlane.f32.xlu0 %v1950_v52 }
 0x979   :  { %v1955_v53 = vpop.xlane.xlu1 %1954 }
 0x97a   :  { %v1957_v54 = vmul.f32 0.03125, %v1955_v53  ;;  %v1952_v55 = vpop.xlane.xlu0 %1951 }
 0x97b   :  { %v1956_v56 = vmul.f32 0.03125, %v1952_v55 }
 0x97c   :  { %v1959_v57 = vsub.f32 %v6120_v51, %v1957_v54 }
 0x97d   :  { %v1958_v11 = vsub.f32 %v6123_v48, %v1956_v56 }
 0x97e   :  { %v1961_v59 = vmul.f32 %v1959_v57, %v1959_v57 }
 0x97f   :  { %v1960_v58 = vmul.f32 %v1958_v11, %v1958_v11 }
 0x980   :  { %v1965_v60 = vsel %vm338_vm2, %v1961_v59, 0.0 }
 0x981   :  { %v1962_v10 = vsel %vm338_vm2, %v1960_v58, 0.0 }
 0x982   :  { %1963 = vadd.xlane.f32.xlu0 %v1962_v10 }
 0x986   :  { %1966 = vadd.xlane.f32.xlu0 %v1965_v60 }
 0xa0f   :  { %v1964_v17 = vpop.xlane.xlu0 %1963 }
 0xa10   :  { %v1968_v18 = vmul.f32 0.03125, %v1964_v17  ;;  %v4516_v17 = vld [vmem:[#allocation5 + $0x1] ss:$0 sm:$0xff] }
 0xa12   :  { %v1970_v19 = vadd.f32 1e-05, %v1968_v18 }
 0xa13   :  { %v1967_v20 = vpop.xlane.xlu0 %1966 }
 0xa14   :  { %5213 = vrsqrt.f32 %v1970_v19  ;;  %v1969_v21 = vmul.f32 0.03125, %v1967_v20 }
 0xa16   :  { %v1971_v24 = vadd.f32 1e-05, %v1969_v21  ;;  %v4517_v21 = vld [vmem:[#allocation7 + $0x1] ss:$0 sm:$0xff] }
 0xa18   :  { %5215 = vrsqrt.f32 %v1971_v24 }
 0xa1e   :  { %v5214_v25 = vpop.eup %5213 }
 0xa1f   :  { %v1974_v26 = vmul.f32 %v5214_v25, %v1958_v11 }
 0xa21   :  { %v1982_v27 = vmul.f32 %v4508_v50, %v1974_v26 }
 0xa22   :  { %v5216_v28 = vpop.eup %5215 }
 0xa23   :  { %v1975_v30 = vmul.f32 %v5216_v28, %v1959_v57  ;;  %v1990_v31 = vadd.f32 %v4509_v22, %v1982_v27 }
 0xa25   :  { %v1983_v32 = vmul.f32 %v4508_v50, %v1975_v30  ;;  %4845 = vmatprep.mubr.msk.f32.mxu0 %vm338_vm2, %v1990_v31 }
 0xa27   :  { %v1991_v33 = vadd.f32 %v4509_v22, %v1983_v32  ;;  %v4522_v22 = vld [vmem:[#allocation8 + $0x1] ss:$0 sm:$0xff] }
 0xa29   :  { %4846 = vmatmul.mubr.msk.f32.vlgmr.msra.gmra.mrb[20].mxu0 %vm338_vm2, %v1991_v33 }
 0xa2a   :  { %5087 = vmatpush3.bf16.msra.mxu0 %v5084_v1 }
 0xa2b   :  { %5089 = vmatprep.subr.bf16.mxu0 %v5088_v7 }
 0xa2e   :  { %5091 = vmatpush3.bf16.msra.mxu0 %v5088_v7 }
 0xa2f   :  { %4878 = vmatprep.subr.mxu0 %v5549_v46 }
 0xafc   :  { %v4847_v38 = vpop.f32.mrb[20].mxu0 }
 0xafd   :  { %v2081_v39 = vadd.f32 %v4847_v38, %v4510_v37  ;;  %v2075_v40 = vpop.f32.mrb[21].mxu0 }
 0xafe   :  { %v2076_v41 = vadd.f32 %v4510_v37, %v2075_v40 }
 0xaff   :  { %v2085_v43 = vmax.f32 %v2081_v39, 0.0 }
 0xb00   :  { %v2084_v42 = vmax.f32 %v2076_v41, 0.0 }
 0xb02   :  { %4864 = vmatprep.mubr.msk.f32.mxu1 %vm2094_vm8, %v2084_v42 }
 0xb03   :  { %4865 = vmatmul.mubr.msk.f32.vlgmr.msra.gmra.mrb[18].mxu1 %vm2094_vm8, %v2085_v43 }
 0xb04   :  { %4890 = vmatprep.mubr.msk.f32.mxu1 %vm5550_vm3, %v5549_v46 }
 0xbd6   :  { %v4866_v44 = vpop.f32.mrb[18].mxu1 }
 0xbd7   :  { %v2177_v47 = vadd.f32 %v4866_v44, %v6120_v51  ;;  %v2167_v49 = vpop.f32.mrb[19].mxu1 }
 0xbd8   :  { %v2176_v52 = vadd.f32 %v2167_v49, %v6123_v48 }
 0xbd9   :  { %v6178_v53 = vadd.f32 %v4515_v45, %v2177_v47 }
 0xbda   :  { %v6180_v54 = vadd.f32 %v4515_v45, %v2176_v52 }
 0xbdb   :  { %v2194_v55 = vsel %vm338_vm2, %v6178_v53, 0.0 }
 0xbdc   :  { %2195 = vadd.xlane.f32.xlu1 %v2194_v55  ;;  %v2191_v56 = vsel %vm338_vm2, %v6180_v54, 0.0 }
 0xbdd   :  { %2192 = vadd.xlane.f32.xlu0 %v2191_v56 }
 0xc69   :  { %v2196_v57 = vpop.xlane.xlu1 %2195 }
 0xc6a   :  { %v2198_v11 = vmul.f32 0.03125, %v2196_v57  ;;  %v2193_v58 = vpop.xlane.xlu0 %2192 }
 0xc6b   :  { %v2197_v10 = vmul.f32 0.03125, %v2193_v58 }
 0xc6c   :  { %v2200_v51 = vsub.f32 %v6178_v53, %v2198_v11 }
 0xc6d   :  { %v2199_v48 = vsub.f32 %v6180_v54, %v2197_v10 }
 0xc6e   :  { %v2202_v59 = vmul.f32 %v2200_v51, %v2200_v51 }
 0xc6f   :  { %v2201_v60 = vmul.f32 %v2199_v48, %v2199_v48 }
 0xc70   :  { %v2206_v61 = vsel %vm338_vm2, %v2202_v59, 0.0 }
 0xc71   :  { %2207 = vadd.xlane.f32.xlu1 %v2206_v61  ;;  %v2203_v62 = vsel %vm338_vm2, %v2201_v60, 0.0 }
 0xc72   :  { %2204 = vadd.xlane.f32.xlu0 %v2203_v62 }
 0xcfe   :  { %v2208_v8 = vpop.xlane.xlu1 %2207 }
 0xcff   :  { %v2210_v9 = vmul.f32 0.03125, %v2208_v8  ;;  %v2205_v12 = vpop.xlane.xlu0 %2204 }
 0xd00   :  { %v2209_v13 = vmul.f32 0.03125, %v2205_v12 }
 0xd01   :  { %v2212_v14 = vadd.f32 1e-05, %v2210_v9 }
 0xd02   :  { %v2211_v15 = vadd.f32 1e-05, %v2209_v13 }
 0xd03   :  { %5217 = vrsqrt.f32 %v2212_v14 }
 0xd04   :  { %5219 = vrsqrt.f32 %v2211_v15 }
 0xd0d   :  { %v5218_v16 = vpop.eup %5217 }
 0xd0e   :  { %v5220_v18 = vpop.eup %5219  ;;  %v2216_v19 = vmul.f32 %v5218_v16, %v2200_v51 }
 0xd0f   :  { %v2215_v20 = vmul.f32 %v5220_v18, %v2199_v48 }
 0xd10   :  { %v2224_v24 = vmul.f32 %v4516_v17, %v2216_v19 }
 0xd11   :  { %v2223_v25 = vmul.f32 %v4516_v17, %v2215_v20 }
 0xd12   :  { %v2232_v26 = vadd.f32 %v4517_v21, %v2224_v24 }
 0xd13   :  { %v2231_v50 = vadd.f32 %v4517_v21, %v2223_v25 }
 0xd15   :  { %4875 = vmatprep.mubr.msk.f32.mxu0 %vm338_vm2, %v2231_v50 }
 0xd16   :  { %4876 = vmatmul.mubr.msk.f32.vlgmr.msra.gmra.mrb[22].mxu0 %vm338_vm2, %v2232_v26 }
 0xd17   :  { %4880 = vmatprep.mubr.msk.f32.mxu0 %vm5550_vm3, %v5549_v46 }
 0xde9   :  { %v4877_v27 = vpop.f32.mrb[22].mxu0 }
 0xdea   :  { %v2318_v28 = vpop.f32.mrb[23].mxu0  ;;  %v6221_v31 = vadd.f32 %v4877_v27, %v4522_v22 }
 0xdeb   :  { %v6207_v30 = vadd.f32 %v4522_v22, %v2318_v28 }
 0xded   :  { %2496 = vrot.lane.b32.xlu1 %v6207_v30, %s5551_s22  ;;  %2328 = vrot.lane.b32.xlu0 %v6207_v30, %s5552_s15 }
 0xdf1   :  { %2494 = vrot.lane.b32.xlu1 %v6207_v30, %s5553_s8  ;;  %2666 = vrot.lane.b32.xlu0 %v6207_v30, %s5554_s29 }
 0xdf5   :  { %2668 = vrot.lane.b32.xlu1 %v6207_v30, %s5555_s1  ;;  %2838 = vrot.lane.b32.xlu0 %v6207_v30, %s5556_s27 }
 0xdf9   :  { %2840 = vrot.lane.b32.xlu1 %v6207_v30, %s5557_s24  ;;  %3179 = vrot.lane.b32.xlu0 %v6221_v31, %s5551_s22 }
 0xdfd   :  { %3011 = vrot.lane.b32.xlu1 %v6221_v31, %s5552_s15  ;;  %3351 = vrot.lane.b32.xlu0 %v6221_v31, %s5555_s1  ;;  %s6573_s15 = sld [smem:[#allocation41_spill]] }
 0xe01   :  { %3177 = vrot.lane.b32.xlu1 %v6221_v31, %s5553_s8  ;;  %3523 = vrot.lane.b32.xlu0 %v6221_v31, %s5557_s24 }
 0xe05   :  { %3349 = vrot.lane.b32.xlu1 %v6221_v31, %s5554_s29 }
 0xe09   :  { %3521 = vrot.lane.b32.xlu1 %v6221_v31, %s5556_s27 }
 0xe5f   :  { %v2497_v32 = vpop.permute.xlu1 %2496  ;;  %v2329_v33 = vpop.permute.xlu0 %2328 }
 0xe60   :  { %4879 = vmatpush3.xpose.msk.msra.mxu0 %vm477_vm4, %v2329_v33  ;;  %4889 = vmatpush3.xpose.msk.msra.mxu1 %vm477_vm4, %v2497_v32 }
 0xe61   :  { %4898 = vmatprep.subr.mxu1 %v5549_v46  ;;  %4883 = vmatprep.subr.mxu0 %v5549_v46 }
 0xe63   :  { %v2495_v34 = vpop.permute.xlu1 %2494  ;;  %4881 = vmatmul.mubr.msk.f32.vlgmr.msra.gmra.mrb[24].mxu0 %vm477_vm4, %v6207_v30  ;;  %v2667_v35 = vpop.permute.xlu0 %2666 }
 0xe64   :  { %4891 = vmatmul.mubr.msk.f32.vlgmr.msra.gmra.mrb[20].mxu1 %vm477_vm4, %v2495_v34  ;;  %4885 = vmatprep.mubr.msk.f32.mxu0 %vm5550_vm3, %v5549_v46 }
 0xe65   :  { %4900 = vmatprep.mubr.msk.f32.mxu1 %vm5550_vm3, %v5549_v46 }
 0xe67   :  { %v2669_v36 = vpop.permute.xlu1 %2668  ;;  %v2839_v37 = vpop.permute.xlu0 %2838 }
 0xe68   :  { %4899 = vmatpush3.xpose.msk.msra.mxu1 %vm477_vm4, %v2669_v36 }
 0xe69   :  { %4908 = vmatprep.subr.mxu1 %v5549_v46 }
 0xe6b   :  { %v2841_v38 = vpop.permute.xlu1 %2840  ;;  %4901 = vmatmul.mubr.msk.f32.vlgmr.msra.gmra.mrb[22].mxu1 %vm477_vm4, %v2667_v35  ;;  %v3180_v39 = vpop.permute.xlu0 %3179 }
 0xe6c   :  { %4909 = vmatpush3.xpose.msk.msra.mxu1 %vm477_vm4, %v2841_v38  ;;  %4910 = vmatprep.mubr.msk.f32.mxu1 %vm5550_vm3, %v5549_v46 }
 0xe6d   :  { %4918 = vmatprep.subr.mxu1 %v5549_v46 }
 0xe6f   :  { %v3012_v40 = vpop.permute.xlu1 %3011  ;;  %4911 = vmatmul.mubr.msk.f32.vlgmr.msra.gmra.mrb[24].mxu1 %vm477_vm4, %v2839_v37  ;;  %v3352_v42 = vpop.permute.xlu0 %3351 }
 0xe70   :  { %4919 = vmatpush3.xpose.msk.msra.mxu1 %vm477_vm4, %v3012_v40  ;;  %4920 = vmatprep.mubr.msk.f32.mxu1 %vm5550_vm3, %v5549_v46 }
 0xe71   :  { %4928 = vmatprep.subr.mxu1 %v5549_v46 }
 0xe73   :  { %v3178_v41 = vpop.permute.xlu1 %3177  ;;  %4921 = vmatmul.mubr.msk.f32.vlgmr.msra.gmra.mrb[26].mxu1 %vm477_vm4, %v6221_v31  ;;  %v3524_v44 = vpop.permute.xlu0 %3523 }
 0xe74   :  { %4929 = vmatpush3.xpose.msk.msra.mxu1 %vm477_vm4, %v3180_v39  ;;  %4930 = vmatprep.mubr.msk.f32.mxu1 %vm5550_vm3, %v5549_v46 }
 0xe75   :  { %4938 = vmatprep.subr.mxu1 %v5549_v46 }
 0xe77   :  { %4931 = vmatmul.mubr.msk.f32.vlgmr.msra.gmra.mrb[28].mxu1 %vm477_vm4, %v3178_v41  ;;  %v3350_v43 = vpop.permute.xlu1 %3349 }
 0xe78   :  { %4939 = vmatpush3.xpose.msk.msra.mxu1 %vm477_vm4, %v3352_v42  ;;  %4940 = vmatprep.mubr.msk.f32.mxu1 %vm5550_vm3, %v5549_v46 }
 0xe79   :  { %4948 = vmatprep.subr.mxu1 %v5549_v46 }
 0xe7b   :  { %4941 = vmatmul.mubr.msk.f32.vlgmr.msra.gmra.mrb[30].mxu1 %vm477_vm4, %v3350_v43  ;;  %v3522_v45 = vpop.permute.xlu1 %3521 }
 0xe7c   :  { %4949 = vmatpush3.xpose.msk.msra.mxu1 %vm477_vm4, %v3524_v44  ;;  %4950 = vmatprep.mubr.msk.f32.mxu1 %vm5550_vm3, %v5549_v46 }
 0xe7f   :  { %4951 = vmatmul.mubr.msk.f32.vlgmr.msra.gmra.mrb[32].mxu1 %vm477_vm4, %v3522_v45 }
 0xf36   :  { %v2400_v47 = vpop.f32.mrb[24].mxu0 }
 0xf37   :  { %v2404_v49 = vmul.f32 0.35355338, %v2400_v47  ;;  %v4882_v52 = vpop.f32.mrb[25].mxu0  ;;  %v2568_v55 = vpop.f32.mrb[20].mxu1 }
 0xf38   :  { %v2572_v56 = vmul.f32 0.35355338, %v2568_v55  ;;  %v4892_v57 = vpop.f32.mrb[21].mxu1 }
 0xf39   :  { %v2405_v11 = vadd.f32 %v2404_v49, %v5991_v6 }
 0xf3a   :  { %v2573_v58 = vadd.f32 %v2572_v56, %v5991_v6 }
 0xf3b   :  { %v2406_v10 = vsel %vm477_vm4, %v2405_v11, -inf }
 0xf3c   :  { %2407 = vmax.xlane.f32.xlu0 %v2406_v10  ;;  %v2574_v51 = vsel %vm477_vm4, %v2573_v58, -inf }
 0xf3d   :  { %2575 = vmax.xlane.f32.xlu1 %v2574_v51 }
 0xf3e   :  { %v2740_v48 = vpop.f32.mrb[22].mxu1 }
 0xf3f   :  { %v2744_v59 = vmul.f32 0.35355338, %v2740_v48  ;;  %v4902_v60 = vpop.f32.mrb[23].mxu1 }
 0xf41   :  { %v6283_v61 = vadd.f32 %v2744_v59, %v5991_v6 }
 0xf42   :  { %v2912_v62 = vpop.f32.mrb[24].mxu1 }
 0xf43   :  { %v2916_v63 = vmul.f32 0.35355338, %v2912_v62  ;;  %v4912_v0 = vpop.f32.mrb[25].mxu1  ;;  %v2746_v1 = vsel %vm477_vm4, %v6283_v61, -inf }
 0xf44   :  { %2747 = vmax.xlane.f32.xlu0 %v2746_v1 }
 0xf45   :  { %v2917_v2 = vadd.f32 %v2916_v63, %v5991_v6 }
 0xf46   :  { %v3083_v5 = vpop.f32.mrb[26].mxu1 }
 0xf47   :  { %v3087_v7 = vmul.f32 0.35355338, %v3083_v5  ;;  %v4922_v8 = vpop.f32.mrb[27].mxu1  ;;  %v2918_v9 = vsel %vm477_vm4, %v2917_v2, -inf }
 0xf48   :  { %2919 = vmax.xlane.f32.xlu0 %v2918_v9 }
 0xf49   :  { %v3088_v12 = vadd.f32 %v3087_v7, %v6006_v29 }
 0xf4a   :  { %v3251_v13 = vpop.f32.mrb[28].mxu1 }
 0xf4b   :  { %v3255_v14 = vmul.f32 0.35355338, %v3251_v13  ;;  %v4932_v15 = vpop.f32.mrb[29].mxu1  ;;  %v3089_v16 = vsel %vm477_vm4, %v3088_v12, -inf }
 0xf4c   :  { %3090 = vmax.xlane.f32.xlu0 %v3089_v16 }
 0xf4d   :  { %v3256_v17 = vadd.f32 %v3255_v14, %v6006_v29 }
 0xf4e   :  { %v3423_v18 = vpop.f32.mrb[30].mxu1 }
 0xf4f   :  { %v3427_v19 = vmul.f32 0.35355338, %v3423_v18  ;;  %v4942_v20 = vpop.f32.mrb[31].mxu1  ;;  %v3257_v6 = vsel %vm477_vm4, %v3256_v17, -inf }
 0xf50   :  { %3258 = vmax.xlane.f32.xlu1 %v3257_v6 }
 0xf51   :  { %v3428_v21 = vadd.f32 %v3427_v19, %v6006_v29 }
 0xf52   :  { %v3595_v24 = vpop.f32.mrb[32].mxu1 }
 0xf53   :  { %v4952_v25 = vpop.f32.mrb[33].mxu1  ;;  %v3429_v50 = vsel %vm477_vm4, %v3428_v21, -inf  ;;  %v3599_v26 = vmul.f32 0.35355338, %v3595_v24 }
 0xf54   :  { %3430 = vmax.xlane.f32.xlu0 %v3429_v50 }
 0xf55   :  { %v3600_v22 = vadd.f32 %v3599_v26, %v6006_v29 }
 0xf57   :  { %v3601_v27 = vsel %vm477_vm4, %v3600_v22, -inf }
 0xf61   :  { %2417 = vrot.lane.b32.xlu1 %v6207_v30, %s5558_s2 }
 0xf85   :  { %3602 = vmax.xlane.f32.xlu1 %v3601_v27 }
 0xf96   :  { %2757 = vrot.lane.b32.xlu1 %v6207_v30, %s5559_s25 }
 0xf9a   :  { %2929 = vrot.lane.b32.xlu1 %v6207_v30, %s5560_s23 }
 0xf9e   :  { %3100 = vrot.lane.b32.xlu1 %v6221_v31, %s5558_s2 }
 0xfc9   :  { %v2408_v28 = vpop.xlane.xlu0 %2407 }
 0xfca   :  { %v2409_v32 = vsub.f32 %v2405_v11, %v2408_v28  ;;  %v2576_v33 = vpop.xlane.xlu1 %2575 }
 0xfcb   :  { %v2577_v34 = vsub.f32 %v2573_v58, %v2576_v33 }
 0xfcc   :  { %v2410_v35 = vmul.f32 1.442695, %v2409_v32 }
 0xfcd   :  { %v2578_v36 = vmul.f32 1.442695, %v2577_v34 }
 0xfce   :  { %5221 = vpow2.f32 %v2410_v35 }
 0xfcf   :  { %5223 = vpow2.f32 %v2578_v36 }
 0xfd1   :  { %v2748_v29 = vpop.xlane.xlu0 %2747 }
 0xfd2   :  { %v2749_v52 = vsub.f32 %v6283_v61, %v2748_v29 }
 0xfd4   :  { %v2750_v56 = vmul.f32 1.442695, %v2749_v52 }
 0xfd5   :  { %v2920_v37 = vpop.xlane.xlu0 %2919 }
 0xfd6   :  { %v2921_v38 = vsub.f32 %v2917_v2, %v2920_v37 }
 0xfd8   :  { %v5222_v39 = vpop.eup %5221  ;;  %v2922_v40 = vmul.f32 1.442695, %v2921_v38 }
 0xfd9   :  { %v6305_v41 = vpop.eup %5223  ;;  %v2412_v42 = vsel %vm477_vm4, %v5222_v39, 0.0  ;;  %v3091_v55 = vpop.xlane.xlu0 %3090 }
 0xfda   :  { %5225 = vpow2.f32 %v2922_v40  ;;  %2413 = vadd.xlane.f32.xlu0 %v2412_v42  ;;  %v2580_v43 = vsel %vm477_vm4, %v6305_v41, 0.0  ;;  %v3092_v57 = vsub.f32 %v3088_v12, %v3091_v55 }
 0xfdb   :  { %2581 = vadd.xlane.f32.xlu1 %v2580_v43  ;;  %5227 = vpow2.f32 %v2750_v56 }
 0xfdc   :  { %v3093_v58 = vmul.f32 1.442695, %v3092_v57 }
 0xfdd   :  { %v3259_v44 = vpop.xlane.xlu1 %3258 }
 0xfde   :  { %5229 = vpow2.f32 %v3093_v58  ;;  %v3260_v51 = vsub.f32 %v3256_v17, %v3259_v44  ;;  %v4550_v58 = vld [vmem:[%s6522_s10 + $0x28] sm:$0xff] }
 0xfe0   :  { %v3261_v59 = vmul.f32 1.442695, %v3260_v51 }
 0xfe1   :  { %v2418_v45 = vpop.permute.xlu1 %2417  ;;  %v3431_v11 = vpop.xlane.xlu0 %3430 }
 0xfe2   :  { %4884 = vmatpush3.msra.mxu0 %v2418_v45  ;;  %v3432_v10 = vsub.f32 %v3428_v21, %v3431_v11  ;;  %v4549_v11 = vld [vmem:[%s6522_s10 + $0x20] sm:$0xff] }
 0xfe3   :  { %4893 = vmatprep.subr.mxu0 %v5549_v46 }
 0xfe4   :  { %v6311_v47 = vpop.eup %5225  ;;  %v3433_v48 = vmul.f32 1.442695, %v3432_v10  ;;  %v5092_v10 = vpack.c.bf16 %v4550_v58, %v4549_v11 }
 0xfe5   :  { %v2924_v49 = vsel %vm477_vm4, %v6311_v47, 0.0  ;;  %v5228_v60 = vpop.eup %5227 }
 0xfe6   :  { %2925 = vadd.xlane.f32.xlu1 %v2924_v49  ;;  %5231 = vpow2.f32 %v3433_v48  ;;  %v4551_v48 = vld [vmem:[%s6522_s10 + $0x30] sm:$0xff]  ;;  %5093 = vmatprep.subr.bf16.mxu1 %v5092_v10 }
 0xfe7   :  { %5233 = vpow2.f32 %v3261_v59  ;;  %v4552_v59 = vld [vmem:[%s6522_s10 + $0x38] sm:$0xff]  ;;  %5095 = vmatpush3.bf16.msra.mxu1 %v5092_v10  ;;  %s6570_s10 = sld [smem:[#allocation32_spill]] }
 0xfe8   :  { %v5230_v62 = vpop.eup %5229 }
 0xfe9   :  { %v3095_v61 = vsel %vm477_vm4, %v5230_v62, 0.0 }
 0xff0   :  { %2585 = vrot.lane.b32.xlu0 %v6207_v30, %s5561_s17  ;;  %v2752_v30 = vsel %vm477_vm4, %v5228_v60, 0.0  ;;  %v6322_v0 = vpop.eup %5231 }
 0xff1   :  { %v3435_v5 = vsel %vm477_vm4, %v6322_v0, 0.0  ;;  %v5234_v7 = vpop.eup %5233 }
 0xff2   :  { %v3263_v8 = vsel %vm477_vm4, %v5234_v7, 0.0 }
 0xff7   :  { %3268 = vrot.lane.b32.xlu1 %v6221_v31, %s5561_s17  ;;  %s6571_s17 = sld [smem:[#allocation39_spill]] }
0x100f   :  { %2753 = vadd.xlane.f32.xlu0 %v2752_v30  ;;  %v5096_v30 = vpack.c.bf16 %v4552_v59, %v4551_v48  ;;  %v4557_v59 = vld [vmem:[#allocation13 + $0x1] ss:$0 sm:$0xff] }
0x1011   :  { %5097 = vmatprep.subr.bf16.mxu1 %v5096_v30 }
0x1012   :  { %v3603_v63 = vpop.xlane.xlu1 %3602  ;;  %5099 = vmatpush3.bf16.msra.mxu1 %v5096_v30 }
0x1013   :  { %v3604_v1 = vsub.f32 %v3600_v22, %v3603_v63  ;;  %3096 = vadd.xlane.f32.xlu0 %v3095_v61 }
0x1015   :  { %v3605_v2 = vmul.f32 1.442695, %v3604_v1 }
0x1016   :  { %v2758_v13 = vpop.permute.xlu1 %2757 }
0x1017   :  { %5235 = vpow2.f32 %v3605_v2  ;;  %3436 = vadd.xlane.f32.xlu0 %v3435_v5 }
0x101a   :  { %v2930_v14 = vpop.permute.xlu1 %2929 }
0x101b   :  { %3264 = vadd.xlane.f32.xlu1 %v3263_v8 }
0x101e   :  { %v3101_v15 = vpop.permute.xlu1 %3100 }
0x1021   :  { %v6327_v9 = vpop.eup %5235 }
0x1022   :  { %v3607_v12 = vsel %vm477_vm4, %v6327_v9, 0.0 }
0x1023   :  { %3608 = vadd.xlane.f32.xlu0 %v3607_v12 }
0x102c   :  { %3612 = vrot.lane.b32.xlu1 %v6221_v31, %s5560_s23 }
0x1039   :  { %3440 = vrot.lane.b32.xlu0 %v6221_v31, %s5559_s25 }
0x1067   :  { %v2414_v16 = vpop.xlane.xlu0 %2413 }
0x1068   :  { %5237 = vrcp.f32 %v2414_v16  ;;  %v2582_v17 = vpop.xlane.xlu1 %2581  ;;  %v4553_v16 = vld [vmem:[#allocation10 + $0x1] ss:$0 sm:$0xff] }
0x1069   :  { %5239 = vrcp.f32 %v2582_v17 }
0x106b   :  { %v2586_v6 = vpop.permute.xlu0 %2585 }
0x1072   :  { %v5238_v18 = vpop.eup %5237 }
0x1073   :  { %v2416_v19 = vmul.f32 %v5238_v18, %v5222_v39  ;;  %v5240_v20 = vpop.eup %5239  ;;  %v2926_v31 = vpop.xlane.xlu1 %2925 }
0x1074   :  { %v2584_v21 = vmul.f32 %v5240_v20, %v6305_v41 }
0x1075   :  { %4886 = vmatmul.mubr.msk.f32.vlgmr.msra.gmra.mrb[26].mxu0 %vm477_vm4, %v2416_v19 }
0x1076   :  { %4894 = vmatpush3.msra.mxu0 %v2586_v6  ;;  %4895 = vmatprep.mubr.msk.f32.mxu0 %vm5550_vm3, %v5549_v46 }
0x1077   :  { %4903 = vmatprep.subr.mxu0 %v5549_v46  ;;  %v3269_v50 = vpop.permute.xlu1 %3268 }
0x1079   :  { %4896 = vmatmul.mubr.msk.f32.vlgmr.msra.gmra.mrb[28].mxu0 %vm477_vm4, %v2584_v21 }
0x107a   :  { %4904 = vmatpush3.msra.mxu0 %v2758_v13  ;;  %4905 = vmatprep.mubr.msk.f32.mxu0 %vm5550_vm3, %v5549_v46 }
0x107b   :  { %4913 = vmatprep.subr.mxu0 %v5549_v46 }
0x109c   :  { %v2754_v24 = vpop.xlane.xlu0 %2753 }
0x109d   :  { %5241 = vrcp.f32 %v2754_v24 }
0x109e   :  { %5243 = vrcp.f32 %v2926_v31 }
0x10a0   :  { %v3097_v25 = vpop.xlane.xlu0 %3096 }
0x10a1   :  { %5245 = vrcp.f32 %v3097_v25 }
0x10a4   :  { %v3437_v27 = vpop.xlane.xlu0 %3436 }
0x10a7   :  { %v5242_v26 = vpop.eup %5241 }
0x10a8   :  { %v2756_v22 = vmul.f32 %v5242_v26, %v5228_v60  ;;  %v3265_v28 = vpop.xlane.xlu1 %3264  ;;  %v5244_v32 = vpop.eup %5243 }
0x10a9   :  { %5247 = vrcp.f32 %v3265_v28  ;;  %v2928_v33 = vmul.f32 %v5244_v32, %v6311_v47 }
0x10aa   :  { %4906 = vmatmul.mubr.msk.f32.vlgmr.msra.gmra.mrb[30].mxu0 %vm477_vm4, %v2756_v22  ;;  %5249 = vrcp.f32 %v3437_v27 }
0x10ab   :  { %4914 = vmatpush3.msra.mxu0 %v2930_v14  ;;  %4915 = vmatprep.mubr.msk.f32.mxu0 %vm5550_vm3, %v5549_v46  ;;  %v5246_v34 = vpop.eup %5245 }
0x10ac   :  { %4923 = vmatprep.subr.mxu0 %v5549_v46  ;;  %v3099_v35 = vmul.f32 %v5246_v34, %v5230_v62  ;;  %v3613_v41 = vpop.permute.xlu1 %3612  ;;  %v4558_v34 = vld [vmem:[%s6526_s14 + $0x20] sm:$0xff] }
0x10ae   :  { %4916 = vmatmul.mubr.msk.f32.vlgmr.msra.gmra.mrb[32].mxu0 %vm477_vm4, %v2928_v33 }
0x10af   :  { %4924 = vmatpush3.msra.mxu0 %v3101_v15  ;;  %4925 = vmatprep.mubr.msk.f32.mxu0 %vm5550_vm3, %v5549_v46 }
0x10b0   :  { %v3609_v36 = vpop.xlane.xlu0 %3608  ;;  %4933 = vmatprep.subr.mxu0 %v5549_v46 }
0x10b1   :  { %5251 = vrcp.f32 %v3609_v36 }
0x10b2   :  { %4926 = vmatmul.mubr.msk.f32.vlgmr.msra.gmra.mrb[34].mxu0 %vm477_vm4, %v3099_v35  ;;  %v4559_v35 = vld [vmem:[%s6526_s14 + $0x28] sm:$0xff] }
0x10b3   :  { %v5248_v29 = vpop.eup %5247  ;;  %4934 = vmatpush3.msra.mxu0 %v3269_v50  ;;  %4935 = vmatprep.mubr.msk.f32.mxu0 %vm5550_vm3, %v5549_v46  ;;  %v5100_v36 = vpack.c.bf16 %v4559_v35, %v4558_v34  ;;  %v4575_v35 = vld [vmem:[#allocation16 + $0x1] ss:$0 sm:$0xff] }
0x10b4   :  { %v3267_v37 = vmul.f32 %v5248_v29, %v5234_v7  ;;  %v3441_v38 = vpop.permute.xlu0 %3440  ;;  %4943 = vmatprep.subr.mxu0 %v5549_v46  ;;  %v5250_v39 = vpop.eup %5249  ;;  %v4560_v29 = vld [vmem:[%s6526_s14 + $0x30] sm:$0xff] }
0x10b5   :  { %v3439_v40 = vmul.f32 %v5250_v39, %v6322_v0  ;;  %v4565_v39 = vld [vmem:[%s6528_s16 + $0x40] sm:$0xff] }
0x10b6   :  { %4936 = vmatmul.mubr.msk.f32.vlgmr.msra.gmra.mrb[36].mxu0 %vm477_vm4, %v3267_v37  ;;  %v4561_v37 = vld [vmem:[%s6526_s14 + $0x38] sm:$0xff] }
0x10b7   :  { %4944 = vmatpush3.msra.mxu0 %v3441_v38  ;;  %4945 = vmatprep.mubr.msk.f32.mxu0 %vm5550_vm3, %v5549_v46  ;;  %v5104_v38 = vpack.c.bf16 %v4561_v37, %v4560_v29 }
0x10b8   :  { %4953 = vmatprep.subr.mxu0 %v5549_v46 }
0x10ba   :  { %4946 = vmatmul.mubr.msk.f32.vlgmr.msra.gmra.mrb[38].mxu0 %vm477_vm4, %v3439_v40  ;;  %v4566_v40 = vld [vmem:[%s6528_s16 + $0x48] sm:$0xff] }
0x10bb   :  { %v5252_v42 = vpop.eup %5251  ;;  %4954 = vmatpush3.msra.mxu0 %v3613_v41  ;;  %4955 = vmatprep.mubr.msk.f32.mxu0 %vm5550_vm3, %v5549_v46  ;;  %v4567_v41 = vld [vmem:[%s6528_s16 + $0x50] sm:$0xff] }
0x10bc   :  { %v3611_v43 = vmul.f32 %v5252_v42, %v6327_v9  ;;  %5101 = vmatprep.subr.bf16.mxu0 %v5100_v36  ;;  %v5108_v42 = vpack.c.bf16 %v4566_v40, %v4565_v39 }
0x10be   :  { %4956 = vmatmul.mubr.msk.f32.vlgmr.msra.gmra.mrb[40].mxu0 %vm477_vm4, %v3611_v43  ;;  %v4568_v43 = vld [vmem:[%s6528_s16 + $0x58] sm:$0xff]  ;;  %5109 = vmatprep.subr.bf16.mxu1 %v5108_v42 }
0x10bf   :  { %5103 = vmatpush3.bf16.msra.mxu0 %v5100_v36 }
0x10c0   :  { %5105 = vmatprep.subr.bf16.mxu0 %v5104_v38 }
0x10c3   :  { %5107 = vmatpush3.bf16.msra.mxu0 %v5104_v38 }
0x10c4   :  { %4999 = vmatprep.subr.mxu0 %v5549_v46 }
0x1148   :  { %v2489_v44 = vpop.f32.mrb[26].mxu0 }
0x1149   :  { %2493 = vst.msk [vmem:[#allocation2] sm:$0xff] %vm477_vm4, %v2489_v44  ;;  %v4887_v45 = vpop.f32.mrb[27].mxu0  ;;  %v5112_v44 = vpack.c.bf16 %v4568_v43, %v4567_v41  ;;  %v4290_v41 = vld [vmem:[%s6572_s30] sm:$0xff] }
0x114a   :  { %v4569_v45 = vld [vmem:[%s6528_s16 + $0x60] sm:$0xff] }
0x114c   :  { %v2657_v47 = vpop.f32.mrb[28].mxu0 }
0x114d   :  { %2662 = vrot.lane.b32.xlu0 %v2657_v47, %s5562_s9  ;;  %v4897_v49 = vpop.f32.mrb[29].mxu0  ;;  %v4570_v47 = vld [vmem:[%s6528_s16 + $0x68] sm:$0xff] }
0x114e   :  { %v5116_v49 = vpack.c.bf16 %v4570_v47, %v4569_v45 }
0x117d   :  { %v2829_v52 = vpop.f32.mrb[30].mxu0 }
0x117e   :  { %2834 = vrot.lane.b32.xlu1 %v2829_v52, %s5536_s28  ;;  %v4907_v55 = vpop.f32.mrb[31].mxu0 }
0x1181   :  { %v3001_v56 = vpop.f32.mrb[32].mxu0 }
0x1182   :  { %3006 = vrot.lane.b32.xlu1 %v3001_v56, %s5563_s20  ;;  %v4917_v57 = vpop.f32.mrb[33].mxu0 }
0x1185   :  { %v3172_v51 = vpop.f32.mrb[34].mxu0 }
0x1186   :  { %3176 = vst.msk [vmem:[#allocation2 + $0x8] sm:$0xff] %vm477_vm4, %v3172_v51  ;;  %v4927_v60 = vpop.f32.mrb[35].mxu0  ;;  %v4556_v51 = vld [vmem:[#allocation11 + $0x1] ss:$0 sm:$0xff] }
0x1189   :  { %v3340_v62 = vpop.f32.mrb[36].mxu0 }
0x118a   :  { %3345 = vrot.lane.b32.xlu0 %v3340_v62, %s5562_s9  ;;  %v4937_v63 = vpop.f32.mrb[37].mxu0 }
0x118d   :  { %v3512_v61 = vpop.f32.mrb[38].mxu0 }
0x118e   :  { %3517 = vrot.lane.b32.xlu0 %v3512_v61, %s5536_s28  ;;  %v4947_v0 = vpop.f32.mrb[39].mxu0 }
0x1191   :  { %v3684_v1 = vpop.f32.mrb[40].mxu0 }
0x1192   :  { %3689 = vrot.lane.b32.xlu1 %v3684_v1, %s5563_s20  ;;  %v4957_v2 = vpop.f32.mrb[41].mxu0  ;;  %v4571_v1 = vld [vmem:[%s6528_s16 + $0x70] sm:$0xff] }
0x1193   :  { %v4572_v2 = vld [vmem:[%s6528_s16 + $0x78] sm:$0xff] }
0x11bf   :  { %v2663_v5 = vpop.permute.xlu0 %2662 }
0x11c0   :  { %2665 = vst.msk [vmem:[#allocation2] sm:$0xff] %vm817_vm5, %v2663_v5  ;;  %v4036_v5 = vld [vmem:[%s6530_s18] sm:$0x1f] }
0x11f0   :  { %v2835_v7 = vpop.permute.xlu1 %2834 }
0x11f1   :  { %2837 = vst.msk [vmem:[#allocation2] sm:$0xff] %vm990_vm6, %v2835_v7  ;;  %v5120_v7 = vpack.c.bf16 %v4572_v2, %v4571_v1 }
0x11f4   :  { %v3007_v8 = vpop.permute.xlu1 %3006 }
0x11f5   :  { %3009 = vst.msk [vmem:[#allocation2] sm:$0xff] %vm1163_vm7, %v3007_v8  ;;  %v4035_v8 = vld [vmem:[%s6570_s10] sm:$0x3] }
0x11fc   :  { %v3346_v9 = vpop.permute.xlu0 %3345  ;;  %v3693_v12 = vld [vmem:[#allocation2] sm:$0xff] }
0x11fd   :  { %3348 = vst.msk [vmem:[#allocation2 + $0x8] sm:$0xff] %vm817_vm5, %v3346_v9  ;;  %4966 = vmatprep.mubr.msk.f32.mxu1 %vm338_vm2, %v3693_v12  ;;  %v4122_v9 = vld [vmem:[%s6533_s21] sm:$0xff]  ;;  %v4123_v12 = vld [vmem:[%s6533_s21 + $0x8] sm:$0xff] }
0x1200   :  { %v3518_v13 = vpop.permute.xlu0 %3517 }
0x1201   :  { %3520 = vst.msk [vmem:[#allocation2 + $0x8] sm:$0xff] %vm990_vm6, %v3518_v13  ;;  %v5564_v13 = vmov 0.0|0.0  }
0x1204   :  { %v3690_v14 = vpop.permute.xlu1 %3689 }
0x1205   :  { %3692 = vst.msk [vmem:[#allocation2 + $0x8] sm:$0xff] %vm1163_vm7, %v3690_v14  ;;  %v5125_v14 = vpack.c.bf16 %v4123_v12, %v4122_v9 }
0x120c   :  { %v3694_v15 = vld [vmem:[#allocation2 + $0x8] sm:$0xff] }
0x120d   :  { %4967 = vmatmul.mubr.msk.f32.vlgmr.msra.gmra.mrb[34].mxu1 %vm338_vm2, %v3694_v15  ;;  %v4198_v15 = vld [vmem:[%s6571_s17] sm:$0xff] }
0x120e   :  { %5111 = vmatpush3.bf16.msra.mxu1 %v5108_v42  ;;  %v4292_v42 = vld [vmem:[%s6572_s30 + $0x10] sm:$0xff] }
0x120f   :  { %5113 = vmatprep.subr.bf16.mxu1 %v5112_v44 }
0x1212   :  { %5115 = vmatpush3.bf16.msra.mxu1 %v5112_v44  ;;  %v4580_v44 = vld [vmem:[#allocation19] ss:$0 sm:$0xff] }
0x1213   :  { %5117 = vmatprep.subr.bf16.mxu1 %v5116_v49 }
0x1216   :  { %5119 = vmatpush3.bf16.msra.mxu1 %v5116_v49 }
0x1217   :  { %5121 = vmatprep.subr.bf16.mxu1 %v5120_v7 }
0x121a   :  { %5123 = vmatpush3.bf16.msra.mxu1 %v5120_v7 }
0x121b   :  { %5135 = vmatprep.subr.bf16.mxu1 %v5564_v13 }
0x12e0   :  { %v4968_v17 = vpop.f32.mrb[34].mxu1 }
0x12e1   :  { %v3786_v18 = vadd.f32 %v4968_v17, %v4553_v16  ;;  %v3780_v19 = vpop.f32.mrb[35].mxu1 }
0x12e2   :  { %v3781_v20 = vadd.f32 %v4553_v16, %v3780_v19  ;;  %v4199_v16 = vld [vmem:[%s6571_s17 + $0x8] sm:$0xff] }
0x12e3   :  { %v6396_v6 = vadd.f32 %v3786_v18, %v6178_v53  ;;  %v5127_v17 = vpack.c.bf16 %v4199_v16, %v4198_v15  ;;  %v4562_v18 = vld [vmem:[#allocation14 + $0x1] ss:$0 sm:$0xff] }
0x12e4   :  { %v6399_v21 = vadd.f32 %v3781_v20, %v6180_v54 }
0x12e5   :  { %v3798_v31 = vsel %vm338_vm2, %v6396_v6, 0.0 }
0x12e6   :  { %3799 = vadd.xlane.f32.xlu1 %v3798_v31  ;;  %v3795_v24 = vsel %vm338_vm2, %v6399_v21, 0.0 }
0x12e7   :  { %3796 = vadd.xlane.f32.xlu0 %v3795_v24 }
0x1373   :  { %v3800_v25 = vpop.xlane.xlu1 %3799 }
0x1374   :  { %v3802_v50 = vmul.f32 0.03125, %v3800_v25  ;;  %v3797_v26 = vpop.xlane.xlu0 %3796 }
0x1375   :  { %v3801_v22 = vmul.f32 0.03125, %v3797_v26  ;;  %v4576_v26 = vld [vmem:[#allocation17] ss:$0 sm:$0xff] }
0x1376   :  { %v3804_v27 = vsub.f32 %v6396_v6, %v3802_v50 }
0x1377   :  { %v3803_v53 = vsub.f32 %v6399_v21, %v3801_v22 }
0x1378   :  { %v3806_v32 = vmul.f32 %v3804_v27, %v3804_v27 }
0x1379   :  { %v3805_v28 = vmul.f32 %v3803_v53, %v3803_v53 }
0x137a   :  { %v3810_v33 = vsel %vm338_vm2, %v3806_v32, 0.0 }
0x137b   :  { %v3807_v54 = vsel %vm338_vm2, %v3805_v28, 0.0  ;;  %v4200_v28 = vld [vmem:[%s6571_s17 + $0x10] sm:$0xff] }
0x137c   :  { %3808 = vadd.xlane.f32.xlu0 %v3807_v54  ;;  %v4201_v54 = vld [vmem:[%s6571_s17 + $0x18] sm:$0xff] }
0x137d   :  { %v5131_v32 = vpack.c.bf16 %v4201_v54, %v4200_v28 }
0x1380   :  { %3811 = vadd.xlane.f32.xlu0 %v3810_v33 }
0x1409   :  { %v3809_v52 = vpop.xlane.xlu0 %3808 }
0x140a   :  { %v3813_v55 = vmul.f32 0.03125, %v3809_v52 }
0x140c   :  { %v3815_v56 = vadd.f32 1e-05, %v3813_v55 }
0x140d   :  { %v3812_v57 = vpop.xlane.xlu0 %3811 }
0x140e   :  { %5253 = vrsqrt.f32 %v3815_v56  ;;  %v3814_v11 = vmul.f32 0.03125, %v3812_v57 }
0x1410   :  { %v3816_v58 = vadd.f32 1e-05, %v3814_v11 }
0x1412   :  { %5255 = vrsqrt.f32 %v3816_v58 }
0x1418   :  { %v5254_v10 = vpop.eup %5253 }
0x1419   :  { %v3819_v48 = vmul.f32 %v5254_v10, %v3803_v53 }
0x141b   :  { %v3827_v60 = vmul.f32 %v4556_v51, %v3819_v48 }
0x141c   :  { %v5256_v30 = vpop.eup %5255 }
0x141d   :  { %v3820_v62 = vmul.f32 %v5256_v30, %v3804_v27  ;;  %v3835_v63 = vadd.f32 %v4557_v59, %v3827_v60 }
0x141f   :  { %v3828_v61 = vmul.f32 %v4556_v51, %v3820_v62  ;;  %4977 = vmatprep.mubr.msk.f32.mxu0 %vm338_vm2, %v3835_v63  ;;  %v4583_v51 = vld [vmem:[#allocation20] ss:$0 sm:$0xff] }
0x1421   :  { %v3836_v0 = vadd.f32 %v4557_v59, %v3828_v61 }
0x1423   :  { %4978 = vmatmul.mubr.msk.f32.vlgmr.msra.gmra.mrb[42].mxu0 %vm338_vm2, %v3836_v0 }
0x1424   :  { %5001 = vmatprep.mubr.msk.f32.mxu0 %vm5550_vm3, %v5549_v46  ;;  %5000 = vmatpush3.msk.msra.mxu0 %vm4048_vm9, %v4036_v5 }
0x1425   :  { %5124 = vmatprep.subr.bf16.mxu0 %v5564_v13 }
0x1427   :  { %5002 = vmatmul.mubr.msk.f32.vlgmr.msra.gmra.mrb[44].mxu0 %vm4044_vm10, %v4035_v8 }
0x1428   :  { %5008 = vmatprep.mubr.msk.f32.mxu0 %vm5550_vm3, %v5549_v46  ;;  %5126 = vmatpush3.bf16.msra.mxu0 %v5125_v14 }
0x1429   :  { %5128 = vmatprep.subr.bf16.mxu0 %v5127_v17 }
0x14f6   :  { %v4979_v19 = vpop.f32.mrb[42].mxu0 }
0x14f7   :  { %v3928_v20 = vadd.f32 %v4979_v19, %v4562_v18  ;;  %v3922_v31 = vpop.f32.mrb[43].mxu0 }
0x14f8   :  { %v3923_v24 = vadd.f32 %v4562_v18, %v3922_v31 }
0x14f9   :  { %v3932_v50 = vmax.f32 %v3928_v20, 0.0 }
0x14fa   :  { %v3931_v25 = vmax.f32 %v3923_v24, 0.0  ;;  %v4118_v22 = vpop.f32.mrb[44].mxu0 }
0x14fb   :  { %v4119_v27 = vadd.f32 %v4576_v26, %v4118_v22  ;;  %v5003_v53 = vpop.f32.mrb[45].mxu0 }
0x14fc   :  { %4996 = vmatprep.mubr.msk.f32.mxu1 %vm2094_vm8, %v3931_v25 }
0x14fd   :  { %4997 = vmatmul.mubr.msk.f32.vlgmr.msra.gmra.mrb[36].mxu1 %vm2094_vm8, %v3932_v50  ;;  %5009 = vmatmul.mubr.msk.f32.vlgmr.msra.gmra.mrb[46].mxu0 %vm4124_vm11, %v4119_v27 }
0x14fe   :  { %5030 = vmatprep.mubr.msk.f32.mxu1 %vm5550_vm3, %v5549_v46  ;;  %5130 = vmatpush3.bf16.msra.mxu0 %v5127_v17 }
0x14ff   :  { %5132 = vmatprep.subr.bf16.mxu0 %v5131_v32 }
0x1502   :  { %5134 = vmatpush3.bf16.msra.mxu0 %v5131_v32 }
0x1503   :  { %5141 = vmatprep.subr.bf16.mxu0 %v5564_v13 }
0x15d0   :  { %v4998_v33 = vpop.f32.mrb[36].mxu1  ;;  %v4194_v39 = vpop.f32.mrb[46].mxu0 }
0x15d1   :  { %v4024_v34 = vadd.f32 %v4998_v33, %v6396_v6  ;;  %v4014_v36 = vpop.f32.mrb[37].mxu1  ;;  %v5010_v40 = vpop.f32.mrb[47].mxu0  ;;  %v4291_v6 = vld [vmem:[%s6572_s30 + $0x8] sm:$0xff]  ;;  %v4384_v47 = vrot.slane %v4194_v39, %v1245_v23  ;;  %v4298_v55 = vrot.slane %v4194_v39, %v555_v4 }
0x15d2   :  { %v4023_v29 = vadd.f32 %v4014_v36, %v6399_v21  ;;  %v5136_v21 = vpack.c.bf16 %v4291_v6, %v4290_v41 }
0x15d3   :  { %v4034_v38 = vadd.f32 %v4575_v35, %v4024_v34 }
0x15d4   :  { %v4033_v37 = vadd.f32 %v4575_v35, %v4023_v29  ;;  %5137 = vmatpush3.bf16.msra.mxu1 %v5136_v21 }
0x15d5   :  { %5138 = vmatprep.subr.bf16.mxu1 %v5564_v13 }
0x15d6   :  { %5019 = vmatprep.mubr.msk.f32.mxu0 %vm338_vm2, %v4033_v37 }
0x15d7   :  { %5020 = vmatmul.mubr.msk.f32.vlgmr.msra.gmra.mrb[48].mxu0 %vm338_vm2, %v4034_v38 }
0x15d8   :  { %5041 = vmatprep.mubr.msk.f32.mxu0 %vm5550_vm3, %v5549_v46  ;;  %5143 = vmatpush3.bf16.msra.mxu0 %v5136_v21  ;;  %v4293_v46 = vld [vmem:[%s6572_s30 + $0x18] sm:$0xff] }
0x15d9   :  { %5144 = vmatprep.subr.bf16.mxu0 %v5564_v13  ;;  %v5139_v43 = vpack.c.bf16 %v4293_v46, %v4292_v42 }
0x15db   :  { %5140 = vmatpush3.bf16.msra.mxu1 %v5139_v43 }
0x15dc   :  { %5146 = vmatpush3.bf16.msra.mxu0 %v5139_v43 }
0x16aa   :  { %v5021_v45 = vpop.f32.mrb[48].mxu0 }
0x16ab   :  { %v4287_v49 = vadd.f32 %v5021_v45, %v4580_v44  ;;  %v4281_v52 = vpop.f32.mrb[49].mxu0 }
0x16ac   :  { %v4282_v56 = vadd.f32 %v4580_v44, %v4281_v52 }
0x16ad   :  { %v4385_v57 = vadd.f32 %v4384_v47, %v4287_v49 }
0x16ae   :  { %v4299_v11 = vadd.f32 %v4298_v55, %v4282_v56 }
0x16af   :  { %v4386_v58 = vmax.f32 %v4385_v57, 0.0 }
0x16b0   :  { %v4300_v10 = vmax.f32 %v4299_v11, 0.0 }
0x16b1   :  { %5042 = vmatmul.mubr.msk.f32.vlgmr.msra.gmra.mrb[50].mxu0 %vm338_vm2, %v4386_v58 }
0x16b2   :  { %5031 = vmatmul.mubr.msk.f32.vlgmr.msra.gmra.mrb[38].mxu1 %vm338_vm2, %v4300_v10 }
0x1784   :  { %v4456_v48 = vpop.f32.mrb[50].mxu0 }
0x1785   :  { %v4457_v59 = vadd.f32 %v4583_v51, %v4456_v48  ;;  %v4376_v60 = vpop.f32.mrb[38].mxu1  ;;  %v5043_v30 = vpop.f32.mrb[51].mxu0 }
0x1786   :  { %v4377_v23 = vadd.f32 %v4583_v51, %v4376_v60  ;;  %v5032_v62 = vpop.f32.mrb[39].mxu1 }
0x1787   :  { %4460 = vst.msk [vmem:[%s6573_s15 + $0x8] sm:$0xff] %vm245_vm1, %v4457_v59 }
0x1788   :  { %4380 = vst.msk [vmem:[%s6573_s15] sm:$0xff] %vm245_vm1, %v4377_v23 }
0x1789   :  { %4465 = vsyncpa [#allocation4], 1 }
0x178a   :  { %4466 = vsyncpa [#allocation6], 1 }
0x178b   :  { %4467 = vsyncpa [#allocation9], 1 }
0x178c   :  { %4468 = vsyncpa [#allocation12], 1 }
0x178d   :  { %4469 = vsyncpa [#allocation15], 1 }
0x178e   :  { %4470 = vsyncpa [#allocation18], 1 }
0x178f   :  { %4471 = vsyncpa [#allocation21], 1 }

</bundles_post_ra>
